<compile_context>
chip_gen: v7x
topology: tpu7x:2x2x1
jax: 0.10.0
libtpu: 0.0.40
codegen_flags: <defaults>
</compile_context>

<pallas_src>
import functools

import jax
import jax.numpy as jnp
from jax import lax
from jax.experimental import pallas as pl
from jax.experimental.pallas import tpu as pltpu

VMEM = pltpu.MemorySpace.VMEM

# Ordered names of the VMEM inputs passed to the fused kernel.
_IN_NAMES = (
    # data
    "vcat", "src_col", "dst_col", "has_in",
    # hx  (node encoder):  cat(v, goal, d, d^2) @ W1 -> split into 4 partial mats
    "hx_w1v", "hx_w1g", "hx_w1d", "hx_w1q", "hx_w2", "hx_b1", "hx_b2",
    # hy  (edge encoder):  cat(vj-vi, vj, vi) folded to vj@(A+B) + vi@(C-A)
    "hy_w1j", "hy_w1i", "hy_w2", "hy_b1", "hy_b2",
    # fx  (MPNN message):  cat(xj-xi, xj, xi, y) folded
    "fx_w1j", "fx_w1i", "fx_w1y", "fx_w2", "fx_b1", "fx_b2",
    # fy  (edge update):   cat(xj-xi, xj, xi) folded
    "fy_w1j", "fy_w1i", "fy_w2", "fy_b1", "fy_b2",
    # policy head
    "pol_w1", "pol_b1", "pol_w2",
)


# ---------------------------------------------------------------------------
# Fused forward kernel
# ---------------------------------------------------------------------------
def _gnnet_kernel(dst_s, goal_s, *refs, loop, n_nodes, n_edges, embed):
    n_in = len(_IN_NAMES)
    r = dict(zip(_IN_NAMES, refs[:n_in]))
    pol_out_ref = refs[n_in]
    x_scr, y_scr, msg_scr, acc_scr = refs[n_in + 1:]

    f32 = jnp.float32
    bf16 = jnp.bfloat16

    def mm(a, w_name):
        # MXU matmul: bf16 operands, f32 accumulation.
        return jnp.dot(a.astype(bf16), r[w_name][...],
                       preferred_element_type=f32)

    def gather(onehot, x):
        # Exact row gather on the MXU (one non-zero product per output element).
        return jnp.dot(onehot, x, preferred_element_type=f32)

    vcat = r["vcat"][...]                                   # (N, cs1) f32

    # One-hot gather matrices built in-kernel (no dense (N,E) mask DMA).
    col_ids = lax.broadcasted_iota(jnp.int32, (n_edges, n_nodes), 1)
    src_oh = (col_ids == r["src_col"][...]).astype(f32)     # (E, N): row e -> src[e]
    dst_oh = (col_ids == r["dst_col"][...]).astype(f32)     # (E, N): row e -> dst[e]

    # ---- hx: node embedding -------------------------------------------------
    goal = r["vcat"][pl.ds(goal_s[0], 1), :]                # (1, cs1) dynamic row
    diff = vcat - goal
    h = (mm(vcat, "hx_w1v") + mm(goal, "hx_w1g")
         + mm(diff, "hx_w1d") + mm(diff * diff, "hx_w1q")
         + r["hx_b1"][...])
    h = jnp.maximum(h, 0.0)
    x_scr[...] = mm(h, "hx_w2") + r["hx_b2"][...]           # (N, emb)

    # ---- hy: edge embedding ---------------------------------------------------
    vi = gather(src_oh, vcat)                               # v[edge_index[0]]
    vj = gather(dst_oh, vcat)                               # v[edge_index[1]]
    h = mm(vj, "hy_w1j") + mm(vi, "hy_w1i") + r["hy_b1"][...]
    h = jnp.maximum(h, 0.0)
    y_scr[...] = mm(h, "hy_w2") + r["hy_b2"][...]           # (E, emb)

    # TODO(synk): use_obstacles attention path skipped — `Block` is not defined
    # in the reference source (equivalent to use_obstacles=False).

    has_in = r["has_in"][...] > 0.5                          # (N, 1) bool

    # ---- message-passing iterations (x, y resident in VMEM scratch) ----------
    for _it in range(loop):
        x = x_scr[...]
        y = y_scr[...]

        # MPNN message: fx(cat(x_j - x_i, x_j, x_i, y)), x_j = x[src], x_i = x[dst]
        xj = gather(src_oh, x)
        xi = gather(dst_oh, x)
        h = (mm(xj, "fx_w1j") + mm(xi, "fx_w1i") + mm(y, "fx_w1y")
             + r["fx_b1"][...])
        h = jnp.maximum(h, 0.0)
        msg_scr[...] = mm(h, "fx_w2") + r["fx_b2"][...]      # (E, emb)

        # Scatter-max of edge messages onto target (dst) nodes: O(E*D) loop
        # over scalar-prefetched dst indices with a VMEM accumulator.
        acc_scr[...] = jnp.full((n_nodes, embed), -jnp.inf, f32)

        def _scatter_max(e, carry):
            d = dst_s[e]
            row = jnp.maximum(acc_scr[pl.ds(d, 1), :], msg_scr[pl.ds(e, 1), :])
            acc_scr[pl.ds(d, 1), :] = row
            return carry

        lax.fori_loop(0, n_edges, _scatter_max, 0)

        # PyG 'max' aggregation fills nodes without incoming edges with 0.
        agg = jnp.where(has_in, acc_scr[...], 0.0)
        x = jnp.maximum(x, agg)                              # torch.max(x, out)
        x_scr[...] = x

        # Edge update: y = max(y, fy(cat(xj - xi, xj, xi))), xi=x[src], xj=x[dst]
        xi2 = gather(src_oh, x)
        xj2 = gather(dst_oh, x)
        h = mm(xj2, "fy_w1j") + mm(xi2, "fy_w1i") + r["fy_b1"][...]
        h = jnp.maximum(h, 0.0)
        y_scr[...] = jnp.maximum(y, mm(h, "fy_w2") + r["fy_b2"][...])

    # ---- policy head ----------------------------------------------------------
    h = jnp.maximum(mm(y_scr[...], "pol_w1") + r["pol_b1"][...], 0.0)
    pol_out_ref[...] = mm(h, "pol_w2")                       # (E, 1)


# ---------------------------------------------------------------------------
# Host-side preparation: split W1 matrices, fold concats, cast to bf16.
# ---------------------------------------------------------------------------
def _prep_inputs(params, v, labels, edge_index):
    f32, bf16 = jnp.float32, jnp.bfloat16
    N = v.shape[0]
    src = edge_index[0].astype(jnp.int32)
    dst = edge_index[1].astype(jnp.int32)
    E = src.shape[0]

    vcat = jnp.concatenate([v, labels], axis=-1).astype(f32)   # (N, cs1)
    cs1 = vcat.shape[1]
    # goal = v[labels[:,0]==1]   (exactly one goal assumed, as in reference)
    goal_idx = jnp.argmax(labels[:, 0] == 1).astype(jnp.int32).reshape((1,))

    src_col = src.reshape(E, 1)
    dst_col = dst.reshape(E, 1)
    has_in = (jnp.zeros((N,), f32).at[dst].add(1.0) > 0).astype(f32).reshape(N, 1)

    p = params
    emb = p["hx"]["w2"].shape[0]

    def blk(w, i, k):
        return w[i * k:(i + 1) * k]

    hx_w1 = p["hx"]["w1"]          # rows: [v | goal | d | d^2]
    hxV, hxG, hxD, hxQ = (blk(hx_w1, i, cs1) for i in range(4))
    hy_w1 = p["hy"]["w1"]          # rows: [vj - vi | vj | vi]
    hyA, hyB, hyC = (blk(hy_w1, i, cs1) for i in range(3))
    fx_w1 = p["fx"]["w1"]          # rows: [xj - xi | xj | xi | y]
    fxA, fxB, fxC, fxD = (blk(fx_w1, i, emb) for i in range(4))
    fy_w1 = p["fy"]["w1"]          # rows: [xj - xi | xj | xi]
    fyA, fyB, fyC = (blk(fy_w1, i, emb) for i in range(3))

    b = lambda x: x.reshape(1, -1).astype(f32)

    inputs = dict(
        vcat=vcat, src_col=src_col, dst_col=dst_col, has_in=has_in,
        hx_w1v=hxV.astype(bf16), hx_w1g=hxG.astype(bf16),
        hx_w1d=hxD.astype(bf16), hx_w1q=hxQ.astype(bf16),
        hx_w2=p["hx"]["w2"].astype(bf16), hx_b1=b(p["hx"]["b1"]), hx_b2=b(p["hx"]["b2"]),
        hy_w1j=(hyA + hyB).astype(bf16), hy_w1i=(hyC - hyA).astype(bf16),
        hy_w2=p["hy"]["w2"].astype(bf16), hy_b1=b(p["hy"]["b1"]), hy_b2=b(p["hy"]["b2"]),
        fx_w1j=(fxA + fxB).astype(bf16), fx_w1i=(fxC - fxA).astype(bf16),
        fx_w1y=fxD.astype(bf16),
        fx_w2=p["fx"]["w2"].astype(bf16), fx_b1=b(p["fx"]["b1"]), fx_b2=b(p["fx"]["b2"]),
        fy_w1j=(fyA + fyB).astype(bf16), fy_w1i=(fyC - fyA).astype(bf16),
        fy_w2=p["fy"]["w2"].astype(bf16), fy_b1=b(p["fy"]["b1"]), fy_b2=b(p["fy"]["b2"]),
        pol_w1=p["policy"]["w1"].astype(bf16), pol_b1=b(p["policy"]["b1"]),
        pol_w2=p["policy"]["w2"].astype(bf16),
    )
    return src, dst, goal_idx, inputs, N, E, emb


# ---------------------------------------------------------------------------
# Deterministic parameter construction (matches module __init__ shapes)
# ---------------------------------------------------------------------------
def _init_linear(key, din, dout, bias=True):
    k1, k2 = jax.random.split(key)
    scale = 1.0 / jnp.sqrt(jnp.float32(din))
    w = jax.random.normal(k1, (din, dout), jnp.float32) * scale
    b = (jax.random.normal(k2, (dout,), jnp.float32) * 0.01 if bias
         else jnp.zeros((dout,), jnp.float32))
    return w, b


def _init_mlp(key, din, dh, dout, bias2=True):
    k1, k2 = jax.random.split(key)
    w1, b1 = _init_linear(k1, din, dh)
    w2, b2 = _init_linear(k2, dh, dout, bias=bias2)
    return {"w1": w1, "b1": b1, "w2": w2, "b2": b2}


def init_gnnet_params(key, config_size, embed_size):
    ks = jax.random.split(key, 5)
    cs1 = config_size + 1
    return {
        "hx": _init_mlp(ks[0], cs1 * 4, embed_size, embed_size),
        "hy": _init_mlp(ks[1], cs1 * 3, embed_size, embed_size),
        "fx": _init_mlp(ks[2], embed_size * 4, embed_size, embed_size),   # MPNN.fx
        "fy": _init_mlp(ks[3], embed_size * 3, embed_size, embed_size),
        "policy": _init_mlp(ks[4], embed_size, embed_size, 1, bias2=False),
    }


# ---------------------------------------------------------------------------
# GNNet forward: one fused pallas_call + a final XLA scatter into (N, N).
# ---------------------------------------------------------------------------
@functools.partial(jax.jit, static_argnames=("loop",))
def gnnet_forward(params, v, labels, edge_index, loop):
    src, dst, goal_idx, inputs, N, E, emb = _prep_inputs(params, v, labels, edge_index)

    kernel = functools.partial(_gnnet_kernel, loop=loop,
                               n_nodes=N, n_edges=E, embed=emb)

    pol = pl.pallas_call(
        kernel,
        out_shape=jax.ShapeDtypeStruct((E, 1), jnp.float32),
        grid_spec=pltpu.PrefetchScalarGridSpec(
            num_scalar_prefetch=2,                 # dst indices + goal index -> SMEM
            grid=(1,),
            in_specs=[pl.BlockSpec(memory_space=VMEM)] * len(_IN_NAMES),
            out_specs=pl.BlockSpec(memory_space=VMEM),
            scratch_shapes=[
                pltpu.VMEM((N, emb), jnp.float32),   # x (node embeddings)
                pltpu.VMEM((E, emb), jnp.float32),   # y (edge embeddings)
                pltpu.VMEM((E, emb), jnp.float32),   # per-edge messages
                pltpu.VMEM((N, emb), jnp.float32),   # scatter-max accumulator
            ],
        ),
        compiler_params=pltpu.CompilerParams(
            dimension_semantics=("arbitrary",),
            vmem_limit_bytes=32 * 1024 * 1024,
        ),
    )(dst, goal_idx, *[inputs[name] for name in _IN_NAMES])

    # policy_output[edge_index[1], edge_index[0]] = policy.squeeze()
    policy_output = jnp.zeros((N, N), jnp.float32).at[dst, src].set(pol[:, 0])
    return policy_output


# ---------------------------------------------------------------------------
if __name__ == "__main__":
    config_size = 4
    embed_size = 128          # lane-dense: multiple of 128 (TPU lane width)
    N = 12
    loop = 3

    key = jax.random.PRNGKey(0)
    k_v, k_p = jax.random.split(key)

    v = jax.random.normal(k_v, (N, config_size), jnp.float32)
    labels = jnp.zeros((N, 1), jnp.float32).at[0, 0].set(1.0)   # node 0 is the goal

    # deterministic bidirectional ring graph: E = 2N edges, no duplicates
    idx = jnp.arange(N, dtype=jnp.int32)
    src = jnp.concatenate([idx, (idx + 1) % N])
    dst = jnp.concatenate([(idx + 1) % N, idx])
    edge_index = jnp.stack([src, dst]).astype(jnp.int32)        # (2, 2N)

    params = init_gnnet_params(k_p, config_size, embed_size)

    out = gnnet_forward(params, v, labels, edge_index, loop)
    jax.block_until_ready(out)
    assert out.shape == (N, N) and out.dtype == jnp.float32
    print("KERNEL_OK")
</pallas_src>

<mosaic_0001>
module attributes {stable_mosaic.version = 11 : i64} {
  func.func @_gnnet_kernel(%arg0: i32, %arg1: memref<24xi32, #tpu.memory_space<smem>>, %arg2: memref<1xi32, #tpu.memory_space<smem>>, %arg3: memref<12x5xf32, #tpu.memory_space<vmem>>, %arg4: memref<24x1xi32, #tpu.memory_space<vmem>>, %arg5: memref<24x1xi32, #tpu.memory_space<vmem>>, %arg6: memref<12x1xf32, #tpu.memory_space<vmem>>, %arg7: memref<5x128xbf16, #tpu.memory_space<vmem>>, %arg8: memref<5x128xbf16, #tpu.memory_space<vmem>>, %arg9: memref<5x128xbf16, #tpu.memory_space<vmem>>, %arg10: memref<5x128xbf16, #tpu.memory_space<vmem>>, %arg11: memref<128x128xbf16, #tpu.memory_space<vmem>>, %arg12: memref<1x128xf32, #tpu.memory_space<vmem>>, %arg13: memref<1x128xf32, #tpu.memory_space<vmem>>, %arg14: memref<5x128xbf16, #tpu.memory_space<vmem>>, %arg15: memref<5x128xbf16, #tpu.memory_space<vmem>>, %arg16: memref<128x128xbf16, #tpu.memory_space<vmem>>, %arg17: memref<1x128xf32, #tpu.memory_space<vmem>>, %arg18: memref<1x128xf32, #tpu.memory_space<vmem>>, %arg19: memref<128x128xbf16, #tpu.memory_space<vmem>>, %arg20: memref<128x128xbf16, #tpu.memory_space<vmem>>, %arg21: memref<128x128xbf16, #tpu.memory_space<vmem>>, %arg22: memref<128x128xbf16, #tpu.memory_space<vmem>>, %arg23: memref<1x128xf32, #tpu.memory_space<vmem>>, %arg24: memref<1x128xf32, #tpu.memory_space<vmem>>, %arg25: memref<128x128xbf16, #tpu.memory_space<vmem>>, %arg26: memref<128x128xbf16, #tpu.memory_space<vmem>>, %arg27: memref<128x128xbf16, #tpu.memory_space<vmem>>, %arg28: memref<1x128xf32, #tpu.memory_space<vmem>>, %arg29: memref<1x128xf32, #tpu.memory_space<vmem>>, %arg30: memref<128x128xbf16, #tpu.memory_space<vmem>>, %arg31: memref<1x128xf32, #tpu.memory_space<vmem>>, %arg32: memref<128x1xbf16, #tpu.memory_space<vmem>>, %arg33: memref<24x1xf32, #tpu.memory_space<vmem>>, %arg34: memref<12x128xf32, #tpu.memory_space<vmem>>, %arg35: memref<24x128xf32, #tpu.memory_space<vmem>>, %arg36: memref<24x128xf32, #tpu.memory_space<vmem>>, %arg37: memref<12x128xf32, #tpu.memory_space<vmem>>) attributes {dimension_semantics = [#tpu.dimension_semantics<arbitrary>], iteration_bounds = array<i64: 1>, scalar_prefetch = 2 : i64, scratch_operands = 4 : i64, tpu.core_type = #tpu.core_type<tc>, window_params = [{pipeline_mode = #tpu.pipeline_mode<synchronous>, transform_indices = @transform_0, window_bounds = array<i64: 12, 5>}, {pipeline_mode = #tpu.pipeline_mode<synchronous>, transform_indices = @transform_1, window_bounds = array<i64: 24, 1>}, {pipeline_mode = #tpu.pipeline_mode<synchronous>, transform_indices = @transform_2, window_bounds = array<i64: 24, 1>}, {pipeline_mode = #tpu.pipeline_mode<synchronous>, transform_indices = @transform_3, window_bounds = array<i64: 12, 1>}, {pipeline_mode = #tpu.pipeline_mode<synchronous>, transform_indices = @transform_4, window_bounds = array<i64: 5, 128>}, {pipeline_mode = #tpu.pipeline_mode<synchronous>, transform_indices = @transform_5, window_bounds = array<i64: 5, 128>}, {pipeline_mode = #tpu.pipeline_mode<synchronous>, transform_indices = @transform_6, window_bounds = array<i64: 5, 128>}, {pipeline_mode = #tpu.pipeline_mode<synchronous>, transform_indices = @transform_7, window_bounds = array<i64: 5, 128>}, {pipeline_mode = #tpu.pipeline_mode<synchronous>, transform_indices = @transform_8, window_bounds = array<i64: 128, 128>}, {pipeline_mode = #tpu.pipeline_mode<synchronous>, transform_indices = @transform_9, window_bounds = array<i64: 1, 128>}, {pipeline_mode = #tpu.pipeline_mode<synchronous>, transform_indices = @transform_10, window_bounds = array<i64: 1, 128>}, {pipeline_mode = #tpu.pipeline_mode<synchronous>, transform_indices = @transform_11, window_bounds = array<i64: 5, 128>}, {pipeline_mode = #tpu.pipeline_mode<synchronous>, transform_indices = @transform_12, window_bounds = array<i64: 5, 128>}, {pipeline_mode = #tpu.pipeline_mode<synchronous>, transform_indices = @transform_13, window_bounds = array<i64: 128, 128>}, {pipeline_mode = #tpu.pipeline_mode<synchronous>, transform_indices = @transform_14, window_bounds = array<i64: 1, 128>}, {pipeline_mode = #tpu.pipeline_mode<synchronous>, transform_indices = @transform_15, window_bounds = array<i64: 1, 128>}, {pipeline_mode = #tpu.pipeline_mode<synchronous>, transform_indices = @transform_16, window_bounds = array<i64: 128, 128>}, {pipeline_mode = #tpu.pipeline_mode<synchronous>, transform_indices = @transform_17, window_bounds = array<i64: 128, 128>}, {pipeline_mode = #tpu.pipeline_mode<synchronous>, transform_indices = @transform_18, window_bounds = array<i64: 128, 128>}, {pipeline_mode = #tpu.pipeline_mode<synchronous>, transform_indices = @transform_19, window_bounds = array<i64: 128, 128>}, {pipeline_mode = #tpu.pipeline_mode<synchronous>, transform_indices = @transform_20, window_bounds = array<i64: 1, 128>}, {pipeline_mode = #tpu.pipeline_mode<synchronous>, transform_indices = @transform_21, window_bounds = array<i64: 1, 128>}, {pipeline_mode = #tpu.pipeline_mode<synchronous>, transform_indices = @transform_22, window_bounds = array<i64: 128, 128>}, {pipeline_mode = #tpu.pipeline_mode<synchronous>, transform_indices = @transform_23, window_bounds = array<i64: 128, 128>}, {pipeline_mode = #tpu.pipeline_mode<synchronous>, transform_indices = @transform_24, window_bounds = array<i64: 128, 128>}, {pipeline_mode = #tpu.pipeline_mode<synchronous>, transform_indices = @transform_25, window_bounds = array<i64: 1, 128>}, {pipeline_mode = #tpu.pipeline_mode<synchronous>, transform_indices = @transform_26, window_bounds = array<i64: 1, 128>}, {pipeline_mode = #tpu.pipeline_mode<synchronous>, transform_indices = @transform_27, window_bounds = array<i64: 128, 128>}, {pipeline_mode = #tpu.pipeline_mode<synchronous>, transform_indices = @transform_28, window_bounds = array<i64: 1, 128>}, {pipeline_mode = #tpu.pipeline_mode<synchronous>, transform_indices = @transform_29, window_bounds = array<i64: 128, 1>}, {pipeline_mode = #tpu.pipeline_mode<synchronous>, transform_indices = @transform_30, window_bounds = array<i64: 24, 1>}]} {
    %c0 = arith.constant 0 : index
    %c0_0 = arith.constant 0 : index
    %0 = vector.load %arg3[%c0, %c0_0] : memref<12x5xf32, #tpu.memory_space<vmem>>, vector<12x5xf32>
    %1 = tpu.iota {dimensions = array<i32: 1>} : vector<24x12xi32>
    %c0_1 = arith.constant 0 : index
    %c0_2 = arith.constant 0 : index
    %2 = vector.load %arg4[%c0_1, %c0_2] : memref<24x1xi32, #tpu.memory_space<vmem>>, vector<24x1xi32>
    %3 = vector.broadcast %2 : vector<24x1xi32> to vector<24x12xi32>
    %4 = arith.cmpi eq, %1, %3 : vector<24x12xi32>
    %5 = arith.extui %4 : vector<24x12xi1> to vector<24x12xi32>
    %6 = arith.sitofp %5 : vector<24x12xi32> to vector<24x12xf32>
    %c0_3 = arith.constant 0 : index
    %c0_4 = arith.constant 0 : index
    %7 = vector.load %arg5[%c0_3, %c0_4] : memref<24x1xi32, #tpu.memory_space<vmem>>, vector<24x1xi32>
    %8 = vector.broadcast %7 : vector<24x1xi32> to vector<24x12xi32>
    %9 = arith.cmpi eq, %1, %8 : vector<24x12xi32>
    %10 = arith.extui %9 : vector<24x12xi1> to vector<24x12xi32>
    %11 = arith.sitofp %10 : vector<24x12xi32> to vector<24x12xf32>
    %c0_5 = arith.constant 0 : index
    %12 = memref.load %arg2[%c0_5] : memref<1xi32, #tpu.memory_space<smem>>
    %13 = arith.index_cast %12 : i32 to index
    %c0_6 = arith.constant 0 : index
    %14 = vector.load %arg3[%13, %c0_6] : memref<12x5xf32, #tpu.memory_space<vmem>>, vector<1x5xf32>
    %15 = vector.broadcast %14 : vector<1x5xf32> to vector<12x5xf32>
    %16 = arith.subf %0, %15 : vector<12x5xf32>
    %17 = arith.truncf %0 : vector<12x5xf32> to vector<12x5xbf16>
    %c0_7 = arith.constant 0 : index
    %c0_8 = arith.constant 0 : index
    %18 = vector.load %arg7[%c0_7, %c0_8] : memref<5x128xbf16, #tpu.memory_space<vmem>>, vector<5x128xbf16>
    %cst = arith.constant dense<0.000000e+00> : vector<12x128xf32>
    %19 = tpu.matmul %17, %18, %cst {dimension_numbers = #tpu.dot_dimension_numbers<[1], [0], [0], [1], [0, 0, 1, 1], [], []>} : vector<12x5xbf16>, vector<5x128xbf16>, vector<12x128xf32> -> vector<12x128xf32>
    %20 = arith.truncf %14 : vector<1x5xf32> to vector<1x5xbf16>
    %c0_9 = arith.constant 0 : index
    %c0_10 = arith.constant 0 : index
    %21 = vector.load %arg8[%c0_9, %c0_10] : memref<5x128xbf16, #tpu.memory_space<vmem>>, vector<5x128xbf16>
    %cst_11 = arith.constant dense<0.000000e+00> : vector<1x128xf32>
    %22 = tpu.matmul %20, %21, %cst_11 {dimension_numbers = #tpu.dot_dimension_numbers<[1], [0], [0], [1], [0, 0, 1, 1], [], []>} : vector<1x5xbf16>, vector<5x128xbf16>, vector<1x128xf32> -> vector<1x128xf32>
    %23 = vector.broadcast %22 : vector<1x128xf32> to vector<12x128xf32>
    %24 = arith.addf %19, %23 : vector<12x128xf32>
    %25 = arith.truncf %16 : vector<12x5xf32> to vector<12x5xbf16>
    %c0_12 = arith.constant 0 : index
    %c0_13 = arith.constant 0 : index
    %26 = vector.load %arg9[%c0_12, %c0_13] : memref<5x128xbf16, #tpu.memory_space<vmem>>, vector<5x128xbf16>
    %cst_14 = arith.constant dense<0.000000e+00> : vector<12x128xf32>
    %27 = tpu.matmul %25, %26, %cst_14 {dimension_numbers = #tpu.dot_dimension_numbers<[1], [0], [0], [1], [0, 0, 1, 1], [], []>} : vector<12x5xbf16>, vector<5x128xbf16>, vector<12x128xf32> -> vector<12x128xf32>
    %28 = arith.addf %24, %27 : vector<12x128xf32>
    %29 = arith.mulf %16, %16 : vector<12x5xf32>
    %30 = arith.truncf %29 : vector<12x5xf32> to vector<12x5xbf16>
    %c0_15 = arith.constant 0 : index
    %c0_16 = arith.constant 0 : index
    %31 = vector.load %arg10[%c0_15, %c0_16] : memref<5x128xbf16, #tpu.memory_space<vmem>>, vector<5x128xbf16>
    %cst_17 = arith.constant dense<0.000000e+00> : vector<12x128xf32>
    %32 = tpu.matmul %30, %31, %cst_17 {dimension_numbers = #tpu.dot_dimension_numbers<[1], [0], [0], [1], [0, 0, 1, 1], [], []>} : vector<12x5xbf16>, vector<5x128xbf16>, vector<12x128xf32> -> vector<12x128xf32>
    %33 = arith.addf %28, %32 : vector<12x128xf32>
    %c0_18 = arith.constant 0 : index
    %c0_19 = arith.constant 0 : index
    %34 = vector.load %arg12[%c0_18, %c0_19] : memref<1x128xf32, #tpu.memory_space<vmem>>, vector<1x128xf32>
    %35 = vector.broadcast %34 : vector<1x128xf32> to vector<12x128xf32>
    %36 = arith.addf %33, %35 : vector<12x128xf32>
    %cst_20 = arith.constant 0.000000e+00 : f32
    %37 = vector.broadcast %cst_20 : f32 to vector<12x128xf32>
    %38 = arith.maximumf %36, %37 : vector<12x128xf32>
    %39 = arith.truncf %38 : vector<12x128xf32> to vector<12x128xbf16>
    %c0_21 = arith.constant 0 : index
    %c0_22 = arith.constant 0 : index
    %40 = vector.load %arg11[%c0_21, %c0_22] : memref<128x128xbf16, #tpu.memory_space<vmem>>, vector<128x128xbf16>
    %cst_23 = arith.constant dense<0.000000e+00> : vector<12x128xf32>
    %41 = tpu.matmul %39, %40, %cst_23 {dimension_numbers = #tpu.dot_dimension_numbers<[1], [0], [0], [1], [0, 0, 1, 1], [], []>} : vector<12x128xbf16>, vector<128x128xbf16>, vector<12x128xf32> -> vector<12x128xf32>
    %c0_24 = arith.constant 0 : index
    %c0_25 = arith.constant 0 : index
    %42 = vector.load %arg13[%c0_24, %c0_25] : memref<1x128xf32, #tpu.memory_space<vmem>>, vector<1x128xf32>
    %43 = vector.broadcast %42 : vector<1x128xf32> to vector<12x128xf32>
    %44 = arith.addf %41, %43 : vector<12x128xf32>
    %c0_26 = arith.constant 0 : index
    %c0_27 = arith.constant 0 : index
    %45 = vector.load %arg34[%c0_26, %c0_27] : memref<12x128xf32, #tpu.memory_space<vmem>>, vector<12x128xf32>
    tpu.vector_store %arg34[%c0_26, %c0_27], %44 {strides = array<i32>} : memref<12x128xf32, #tpu.memory_space<vmem>>, vector<12x128xf32>,
    %cst_28 = arith.constant dense<0.000000e+00> : vector<24x5xf32>
    %46 = tpu.matmul %6, %0, %cst_28 {dimension_numbers = #tpu.dot_dimension_numbers<[1], [0], [0], [1], [0, 0, 1, 1], [], []>} : vector<24x12xf32>, vector<12x5xf32>, vector<24x5xf32> -> vector<24x5xf32>
    %cst_29 = arith.constant dense<0.000000e+00> : vector<24x5xf32>
    %47 = tpu.matmul %11, %0, %cst_29 {dimension_numbers = #tpu.dot_dimension_numbers<[1], [0], [0], [1], [0, 0, 1, 1], [], []>} : vector<24x12xf32>, vector<12x5xf32>, vector<24x5xf32> -> vector<24x5xf32>
    %48 = arith.truncf %47 : vector<24x5xf32> to vector<24x5xbf16>
    %c0_30 = arith.constant 0 : index
    %c0_31 = arith.constant 0 : index
    %49 = vector.load %arg14[%c0_30, %c0_31] : memref<5x128xbf16, #tpu.memory_space<vmem>>, vector<5x128xbf16>
    %cst_32 = arith.constant dense<0.000000e+00> : vector<24x128xf32>
    %50 = tpu.matmul %48, %49, %cst_32 {dimension_numbers = #tpu.dot_dimension_numbers<[1], [0], [0], [1], [0, 0, 1, 1], [], []>} : vector<24x5xbf16>, vector<5x128xbf16>, vector<24x128xf32> -> vector<24x128xf32>
    %51 = arith.truncf %46 : vector<24x5xf32> to vector<24x5xbf16>
    %c0_33 = arith.constant 0 : index
    %c0_34 = arith.constant 0 : index
    %52 = vector.load %arg15[%c0_33, %c0_34] : memref<5x128xbf16, #tpu.memory_space<vmem>>, vector<5x128xbf16>
    %cst_35 = arith.constant dense<0.000000e+00> : vector<24x128xf32>
    %53 = tpu.matmul %51, %52, %cst_35 {dimension_numbers = #tpu.dot_dimension_numbers<[1], [0], [0], [1], [0, 0, 1, 1], [], []>} : vector<24x5xbf16>, vector<5x128xbf16>, vector<24x128xf32> -> vector<24x128xf32>
    %54 = arith.addf %50, %53 : vector<24x128xf32>
    %c0_36 = arith.constant 0 : index
    %c0_37 = arith.constant 0 : index
    %55 = vector.load %arg17[%c0_36, %c0_37] : memref<1x128xf32, #tpu.memory_space<vmem>>, vector<1x128xf32>
    %56 = vector.broadcast %55 : vector<1x128xf32> to vector<24x128xf32>
    %57 = arith.addf %54, %56 : vector<24x128xf32>
    %cst_38 = arith.constant 0.000000e+00 : f32
    %58 = vector.broadcast %cst_38 : f32 to vector<24x128xf32>
    %59 = arith.maximumf %57, %58 : vector<24x128xf32>
    %60 = arith.truncf %59 : vector<24x128xf32> to vector<24x128xbf16>
    %c0_39 = arith.constant 0 : index
    %c0_40 = arith.constant 0 : index
    %61 = vector.load %arg16[%c0_39, %c0_40] : memref<128x128xbf16, #tpu.memory_space<vmem>>, vector<128x128xbf16>
    %cst_41 = arith.constant dense<0.000000e+00> : vector<24x128xf32>
    %62 = tpu.matmul %60, %61, %cst_41 {dimension_numbers = #tpu.dot_dimension_numbers<[1], [0], [0], [1], [0, 0, 1, 1], [], []>} : vector<24x128xbf16>, vector<128x128xbf16>, vector<24x128xf32> -> vector<24x128xf32>
    %c0_42 = arith.constant 0 : index
    %c0_43 = arith.constant 0 : index
    %63 = vector.load %arg18[%c0_42, %c0_43] : memref<1x128xf32, #tpu.memory_space<vmem>>, vector<1x128xf32>
    %64 = vector.broadcast %63 : vector<1x128xf32> to vector<24x128xf32>
    %65 = arith.addf %62, %64 : vector<24x128xf32>
    %c0_44 = arith.constant 0 : index
    %c0_45 = arith.constant 0 : index
    %66 = vector.load %arg35[%c0_44, %c0_45] : memref<24x128xf32, #tpu.memory_space<vmem>>, vector<24x128xf32>
    tpu.vector_store %arg35[%c0_44, %c0_45], %65 {strides = array<i32>} : memref<24x128xf32, #tpu.memory_space<vmem>>, vector<24x128xf32>,
    %c0_46 = arith.constant 0 : index
    %c0_47 = arith.constant 0 : index
    %67 = vector.load %arg6[%c0_46, %c0_47] : memref<12x1xf32, #tpu.memory_space<vmem>>, vector<12x1xf32>
    %cst_48 = arith.constant 5.000000e-01 : f32
    %68 = vector.broadcast %cst_48 : f32 to vector<12x1xf32>
    %69 = arith.cmpf ogt, %67, %68 : vector<12x1xf32>
    %c0_49 = arith.constant 0 : index
    %c0_50 = arith.constant 0 : index
    %70 = vector.load %arg34[%c0_49, %c0_50] : memref<12x128xf32, #tpu.memory_space<vmem>>, vector<12x128xf32>
    %c0_51 = arith.constant 0 : index
    %c0_52 = arith.constant 0 : index
    %71 = vector.load %arg35[%c0_51, %c0_52] : memref<24x128xf32, #tpu.memory_space<vmem>>, vector<24x128xf32>
    %cst_53 = arith.constant dense<0.000000e+00> : vector<24x128xf32>
    %72 = tpu.matmul %6, %70, %cst_53 {dimension_numbers = #tpu.dot_dimension_numbers<[1], [0], [0], [1], [0, 0, 1, 1], [], []>} : vector<24x12xf32>, vector<12x128xf32>, vector<24x128xf32> -> vector<24x128xf32>
    %cst_54 = arith.constant dense<0.000000e+00> : vector<24x128xf32>
    %73 = tpu.matmul %11, %70, %cst_54 {dimension_numbers = #tpu.dot_dimension_numbers<[1], [0], [0], [1], [0, 0, 1, 1], [], []>} : vector<24x12xf32>, vector<12x128xf32>, vector<24x128xf32> -> vector<24x128xf32>
    %74 = arith.truncf %72 : vector<24x128xf32> to vector<24x128xbf16>
    %c0_55 = arith.constant 0 : index
    %c0_56 = arith.constant 0 : index
    %75 = vector.load %arg19[%c0_55, %c0_56] : memref<128x128xbf16, #tpu.memory_space<vmem>>, vector<128x128xbf16>
    %cst_57 = arith.constant dense<0.000000e+00> : vector<24x128xf32>
    %76 = tpu.matmul %74, %75, %cst_57 {dimension_numbers = #tpu.dot_dimension_numbers<[1], [0], [0], [1], [0, 0, 1, 1], [], []>} : vector<24x128xbf16>, vector<128x128xbf16>, vector<24x128xf32> -> vector<24x128xf32>
    %77 = arith.truncf %73 : vector<24x128xf32> to vector<24x128xbf16>
    %c0_58 = arith.constant 0 : index
    %c0_59 = arith.constant 0 : index
    %78 = vector.load %arg20[%c0_58, %c0_59] : memref<128x128xbf16, #tpu.memory_space<vmem>>, vector<128x128xbf16>
    %cst_60 = arith.constant dense<0.000000e+00> : vector<24x128xf32>
    %79 = tpu.matmul %77, %78, %cst_60 {dimension_numbers = #tpu.dot_dimension_numbers<[1], [0], [0], [1], [0, 0, 1, 1], [], []>} : vector<24x128xbf16>, vector<128x128xbf16>, vector<24x128xf32> -> vector<24x128xf32>
    %80 = arith.addf %76, %79 : vector<24x128xf32>
    %81 = arith.truncf %71 : vector<24x128xf32> to vector<24x128xbf16>
    %c0_61 = arith.constant 0 : index
    %c0_62 = arith.constant 0 : index
    %82 = vector.load %arg21[%c0_61, %c0_62] : memref<128x128xbf16, #tpu.memory_space<vmem>>, vector<128x128xbf16>
    %cst_63 = arith.constant dense<0.000000e+00> : vector<24x128xf32>
    %83 = tpu.matmul %81, %82, %cst_63 {dimension_numbers = #tpu.dot_dimension_numbers<[1], [0], [0], [1], [0, 0, 1, 1], [], []>} : vector<24x128xbf16>, vector<128x128xbf16>, vector<24x128xf32> -> vector<24x128xf32>
    %84 = arith.addf %80, %83 : vector<24x128xf32>
    %c0_64 = arith.constant 0 : index
    %c0_65 = arith.constant 0 : index
    %85 = vector.load %arg23[%c0_64, %c0_65] : memref<1x128xf32, #tpu.memory_space<vmem>>, vector<1x128xf32>
    %86 = vector.broadcast %85 : vector<1x128xf32> to vector<24x128xf32>
    %87 = arith.addf %84, %86 : vector<24x128xf32>
    %cst_66 = arith.constant 0.000000e+00 : f32
    %88 = vector.broadcast %cst_66 : f32 to vector<24x128xf32>
    %89 = arith.maximumf %87, %88 : vector<24x128xf32>
    %90 = arith.truncf %89 : vector<24x128xf32> to vector<24x128xbf16>
    %c0_67 = arith.constant 0 : index
    %c0_68 = arith.constant 0 : index
    %91 = vector.load %arg22[%c0_67, %c0_68] : memref<128x128xbf16, #tpu.memory_space<vmem>>, vector<128x128xbf16>
    %cst_69 = arith.constant dense<0.000000e+00> : vector<24x128xf32>
    %92 = tpu.matmul %90, %91, %cst_69 {dimension_numbers = #tpu.dot_dimension_numbers<[1], [0], [0], [1], [0, 0, 1, 1], [], []>} : vector<24x128xbf16>, vector<128x128xbf16>, vector<24x128xf32> -> vector<24x128xf32>
    %c0_70 = arith.constant 0 : index
    %c0_71 = arith.constant 0 : index
    %93 = vector.load %arg24[%c0_70, %c0_71] : memref<1x128xf32, #tpu.memory_space<vmem>>, vector<1x128xf32>
    %94 = vector.broadcast %93 : vector<1x128xf32> to vector<24x128xf32>
    %95 = arith.addf %92, %94 : vector<24x128xf32>
    %c0_72 = arith.constant 0 : index
    %c0_73 = arith.constant 0 : index
    %96 = vector.load %arg36[%c0_72, %c0_73] : memref<24x128xf32, #tpu.memory_space<vmem>>, vector<24x128xf32>
    tpu.vector_store %arg36[%c0_72, %c0_73], %95 {strides = array<i32>} : memref<24x128xf32, #tpu.memory_space<vmem>>, vector<24x128xf32>,
    %cst_74 = arith.constant 0xFF800000 : f32
    %97 = vector.broadcast %cst_74 : f32 to vector<12x128xf32>
    %c0_75 = arith.constant 0 : index
    %c0_76 = arith.constant 0 : index
    %98 = vector.load %arg37[%c0_75, %c0_76] : memref<12x128xf32, #tpu.memory_space<vmem>>, vector<12x128xf32>
    tpu.vector_store %arg37[%c0_75, %c0_76], %97 {strides = array<i32>} : memref<12x128xf32, #tpu.memory_space<vmem>>, vector<12x128xf32>,
    %c0_i32 = arith.constant 0 : i32
    %c24_i32 = arith.constant 24 : i32
    %99 = arith.addi %c0_i32, %c24_i32 : i32
    %c1_i32 = arith.constant 1 : i32
    scf.for %arg38 = %c0_i32 to %99 step %c1_i32  : i32 {
      %260 = arith.index_cast %arg38 : i32 to index
      %261 = memref.load %arg1[%260] : memref<24xi32, #tpu.memory_space<smem>>
      %262 = arith.index_cast %261 : i32 to index
      %c0_224 = arith.constant 0 : index
      %263 = vector.load %arg37[%262, %c0_224] : memref<12x128xf32, #tpu.memory_space<vmem>>, vector<1x128xf32>
      %264 = arith.index_cast %arg38 : i32 to index
      %c0_225 = arith.constant 0 : index
      %265 = vector.load %arg36[%264, %c0_225] : memref<24x128xf32, #tpu.memory_space<vmem>>, vector<1x128xf32>
      %266 = arith.maximumf %263, %265 : vector<1x128xf32>
      %267 = arith.index_cast %261 : i32 to index
      %c0_226 = arith.constant 0 : index
      %268 = vector.load %arg37[%267, %c0_226] : memref<12x128xf32, #tpu.memory_space<vmem>>, vector<1x128xf32>
      tpu.vector_store %arg37[%267, %c0_226], %266 {strides = array<i32>} : memref<12x128xf32, #tpu.memory_space<vmem>>, vector<1x128xf32>,
    }
    %c24_i32_77 = arith.constant 24 : i32
    %c0_78 = arith.constant 0 : index
    %c0_79 = arith.constant 0 : index
    %100 = vector.load %arg37[%c0_78, %c0_79] : memref<12x128xf32, #tpu.memory_space<vmem>>, vector<12x128xf32>
    %cst_80 = arith.constant 0.000000e+00 : f32
    %101 = vector.shape_cast %69 : vector<12x1xi1> to vector<12x1xi1>
    %102 = vector.broadcast %101 : vector<12x1xi1> to vector<12x128xi1>
    %103 = vector.broadcast %cst_80 : f32 to vector<12x128xf32>
    %104 = arith.select %102, %100, %103 : vector<12x128xi1>, vector<12x128xf32>
    %105 = arith.maximumf %70, %104 : vector<12x128xf32>
    %c0_81 = arith.constant 0 : index
    %c0_82 = arith.constant 0 : index
    %106 = vector.load %arg34[%c0_81, %c0_82] : memref<12x128xf32, #tpu.memory_space<vmem>>, vector<12x128xf32>
    tpu.vector_store %arg34[%c0_81, %c0_82], %105 {strides = array<i32>} : memref<12x128xf32, #tpu.memory_space<vmem>>, vector<12x128xf32>,
    %cst_83 = arith.constant dense<0.000000e+00> : vector<24x128xf32>
    %107 = tpu.matmul %6, %105, %cst_83 {dimension_numbers = #tpu.dot_dimension_numbers<[1], [0], [0], [1], [0, 0, 1, 1], [], []>} : vector<24x12xf32>, vector<12x128xf32>, vector<24x128xf32> -> vector<24x128xf32>
    %cst_84 = arith.constant dense<0.000000e+00> : vector<24x128xf32>
    %108 = tpu.matmul %11, %105, %cst_84 {dimension_numbers = #tpu.dot_dimension_numbers<[1], [0], [0], [1], [0, 0, 1, 1], [], []>} : vector<24x12xf32>, vector<12x128xf32>, vector<24x128xf32> -> vector<24x128xf32>
    %109 = arith.truncf %108 : vector<24x128xf32> to vector<24x128xbf16>
    %c0_85 = arith.constant 0 : index
    %c0_86 = arith.constant 0 : index
    %110 = vector.load %arg25[%c0_85, %c0_86] : memref<128x128xbf16, #tpu.memory_space<vmem>>, vector<128x128xbf16>
    %cst_87 = arith.constant dense<0.000000e+00> : vector<24x128xf32>
    %111 = tpu.matmul %109, %110, %cst_87 {dimension_numbers = #tpu.dot_dimension_numbers<[1], [0], [0], [1], [0, 0, 1, 1], [], []>} : vector<24x128xbf16>, vector<128x128xbf16>, vector<24x128xf32> -> vector<24x128xf32>
    %112 = arith.truncf %107 : vector<24x128xf32> to vector<24x128xbf16>
    %c0_88 = arith.constant 0 : index
    %c0_89 = arith.constant 0 : index
    %113 = vector.load %arg26[%c0_88, %c0_89] : memref<128x128xbf16, #tpu.memory_space<vmem>>, vector<128x128xbf16>
    %cst_90 = arith.constant dense<0.000000e+00> : vector<24x128xf32>
    %114 = tpu.matmul %112, %113, %cst_90 {dimension_numbers = #tpu.dot_dimension_numbers<[1], [0], [0], [1], [0, 0, 1, 1], [], []>} : vector<24x128xbf16>, vector<128x128xbf16>, vector<24x128xf32> -> vector<24x128xf32>
    %115 = arith.addf %111, %114 : vector<24x128xf32>
    %c0_91 = arith.constant 0 : index
    %c0_92 = arith.constant 0 : index
    %116 = vector.load %arg28[%c0_91, %c0_92] : memref<1x128xf32, #tpu.memory_space<vmem>>, vector<1x128xf32>
    %117 = vector.broadcast %116 : vector<1x128xf32> to vector<24x128xf32>
    %118 = arith.addf %115, %117 : vector<24x128xf32>
    %cst_93 = arith.constant 0.000000e+00 : f32
    %119 = vector.broadcast %cst_93 : f32 to vector<24x128xf32>
    %120 = arith.maximumf %118, %119 : vector<24x128xf32>
    %121 = arith.truncf %120 : vector<24x128xf32> to vector<24x128xbf16>
    %c0_94 = arith.constant 0 : index
    %c0_95 = arith.constant 0 : index
    %122 = vector.load %arg27[%c0_94, %c0_95] : memref<128x128xbf16, #tpu.memory_space<vmem>>, vector<128x128xbf16>
    %cst_96 = arith.constant dense<0.000000e+00> : vector<24x128xf32>
    %123 = tpu.matmul %121, %122, %cst_96 {dimension_numbers = #tpu.dot_dimension_numbers<[1], [0], [0], [1], [0, 0, 1, 1], [], []>} : vector<24x128xbf16>, vector<128x128xbf16>, vector<24x128xf32> -> vector<24x128xf32>
    %c0_97 = arith.constant 0 : index
    %c0_98 = arith.constant 0 : index
    %124 = vector.load %arg29[%c0_97, %c0_98] : memref<1x128xf32, #tpu.memory_space<vmem>>, vector<1x128xf32>
    %125 = vector.broadcast %124 : vector<1x128xf32> to vector<24x128xf32>
    %126 = arith.addf %123, %125 : vector<24x128xf32>
    %127 = arith.maximumf %71, %126 : vector<24x128xf32>
    %c0_99 = arith.constant 0 : index
    %c0_100 = arith.constant 0 : index
    %128 = vector.load %arg35[%c0_99, %c0_100] : memref<24x128xf32, #tpu.memory_space<vmem>>, vector<24x128xf32>
    tpu.vector_store %arg35[%c0_99, %c0_100], %127 {strides = array<i32>} : memref<24x128xf32, #tpu.memory_space<vmem>>, vector<24x128xf32>,
    %c0_101 = arith.constant 0 : index
    %c0_102 = arith.constant 0 : index
    %129 = vector.load %arg34[%c0_101, %c0_102] : memref<12x128xf32, #tpu.memory_space<vmem>>, vector<12x128xf32>
    %c0_103 = arith.constant 0 : index
    %c0_104 = arith.constant 0 : index
    %130 = vector.load %arg35[%c0_103, %c0_104] : memref<24x128xf32, #tpu.memory_space<vmem>>, vector<24x128xf32>
    %cst_105 = arith.constant dense<0.000000e+00> : vector<24x128xf32>
    %131 = tpu.matmul %6, %129, %cst_105 {dimension_numbers = #tpu.dot_dimension_numbers<[1], [0], [0], [1], [0, 0, 1, 1], [], []>} : vector<24x12xf32>, vector<12x128xf32>, vector<24x128xf32> -> vector<24x128xf32>
    %cst_106 = arith.constant dense<0.000000e+00> : vector<24x128xf32>
    %132 = tpu.matmul %11, %129, %cst_106 {dimension_numbers = #tpu.dot_dimension_numbers<[1], [0], [0], [1], [0, 0, 1, 1], [], []>} : vector<24x12xf32>, vector<12x128xf32>, vector<24x128xf32> -> vector<24x128xf32>
    %133 = arith.truncf %131 : vector<24x128xf32> to vector<24x128xbf16>
    %c0_107 = arith.constant 0 : index
    %c0_108 = arith.constant 0 : index
    %134 = vector.load %arg19[%c0_107, %c0_108] : memref<128x128xbf16, #tpu.memory_space<vmem>>, vector<128x128xbf16>
    %cst_109 = arith.constant dense<0.000000e+00> : vector<24x128xf32>
    %135 = tpu.matmul %133, %134, %cst_109 {dimension_numbers = #tpu.dot_dimension_numbers<[1], [0], [0], [1], [0, 0, 1, 1], [], []>} : vector<24x128xbf16>, vector<128x128xbf16>, vector<24x128xf32> -> vector<24x128xf32>
    %136 = arith.truncf %132 : vector<24x128xf32> to vector<24x128xbf16>
    %c0_110 = arith.constant 0 : index
    %c0_111 = arith.constant 0 : index
    %137 = vector.load %arg20[%c0_110, %c0_111] : memref<128x128xbf16, #tpu.memory_space<vmem>>, vector<128x128xbf16>
    %cst_112 = arith.constant dense<0.000000e+00> : vector<24x128xf32>
    %138 = tpu.matmul %136, %137, %cst_112 {dimension_numbers = #tpu.dot_dimension_numbers<[1], [0], [0], [1], [0, 0, 1, 1], [], []>} : vector<24x128xbf16>, vector<128x128xbf16>, vector<24x128xf32> -> vector<24x128xf32>
    %139 = arith.addf %135, %138 : vector<24x128xf32>
    %140 = arith.truncf %130 : vector<24x128xf32> to vector<24x128xbf16>
    %c0_113 = arith.constant 0 : index
    %c0_114 = arith.constant 0 : index
    %141 = vector.load %arg21[%c0_113, %c0_114] : memref<128x128xbf16, #tpu.memory_space<vmem>>, vector<128x128xbf16>
    %cst_115 = arith.constant dense<0.000000e+00> : vector<24x128xf32>
    %142 = tpu.matmul %140, %141, %cst_115 {dimension_numbers = #tpu.dot_dimension_numbers<[1], [0], [0], [1], [0, 0, 1, 1], [], []>} : vector<24x128xbf16>, vector<128x128xbf16>, vector<24x128xf32> -> vector<24x128xf32>
    %143 = arith.addf %139, %142 : vector<24x128xf32>
    %c0_116 = arith.constant 0 : index
    %c0_117 = arith.constant 0 : index
    %144 = vector.load %arg23[%c0_116, %c0_117] : memref<1x128xf32, #tpu.memory_space<vmem>>, vector<1x128xf32>
    %145 = vector.broadcast %144 : vector<1x128xf32> to vector<24x128xf32>
    %146 = arith.addf %143, %145 : vector<24x128xf32>
    %cst_118 = arith.constant 0.000000e+00 : f32
    %147 = vector.broadcast %cst_118 : f32 to vector<24x128xf32>
    %148 = arith.maximumf %146, %147 : vector<24x128xf32>
    %149 = arith.truncf %148 : vector<24x128xf32> to vector<24x128xbf16>
    %c0_119 = arith.constant 0 : index
    %c0_120 = arith.constant 0 : index
    %150 = vector.load %arg22[%c0_119, %c0_120] : memref<128x128xbf16, #tpu.memory_space<vmem>>, vector<128x128xbf16>
    %cst_121 = arith.constant dense<0.000000e+00> : vector<24x128xf32>
    %151 = tpu.matmul %149, %150, %cst_121 {dimension_numbers = #tpu.dot_dimension_numbers<[1], [0], [0], [1], [0, 0, 1, 1], [], []>} : vector<24x128xbf16>, vector<128x128xbf16>, vector<24x128xf32> -> vector<24x128xf32>
    %c0_122 = arith.constant 0 : index
    %c0_123 = arith.constant 0 : index
    %152 = vector.load %arg24[%c0_122, %c0_123] : memref<1x128xf32, #tpu.memory_space<vmem>>, vector<1x128xf32>
    %153 = vector.broadcast %152 : vector<1x128xf32> to vector<24x128xf32>
    %154 = arith.addf %151, %153 : vector<24x128xf32>
    %c0_124 = arith.constant 0 : index
    %c0_125 = arith.constant 0 : index
    %155 = vector.load %arg36[%c0_124, %c0_125] : memref<24x128xf32, #tpu.memory_space<vmem>>, vector<24x128xf32>
    tpu.vector_store %arg36[%c0_124, %c0_125], %154 {strides = array<i32>} : memref<24x128xf32, #tpu.memory_space<vmem>>, vector<24x128xf32>,
    %cst_126 = arith.constant 0xFF800000 : f32
    %156 = vector.broadcast %cst_126 : f32 to vector<12x128xf32>
    %c0_127 = arith.constant 0 : index
    %c0_128 = arith.constant 0 : index
    %157 = vector.load %arg37[%c0_127, %c0_128] : memref<12x128xf32, #tpu.memory_space<vmem>>, vector<12x128xf32>
    tpu.vector_store %arg37[%c0_127, %c0_128], %156 {strides = array<i32>} : memref<12x128xf32, #tpu.memory_space<vmem>>, vector<12x128xf32>,
    %c0_i32_129 = arith.constant 0 : i32
    %c24_i32_130 = arith.constant 24 : i32
    %158 = arith.addi %c0_i32_129, %c24_i32_130 : i32
    %c1_i32_131 = arith.constant 1 : i32
    scf.for %arg38 = %c0_i32_129 to %158 step %c1_i32_131  : i32 {
      %260 = arith.index_cast %arg38 : i32 to index
      %261 = memref.load %arg1[%260] : memref<24xi32, #tpu.memory_space<smem>>
      %262 = arith.index_cast %261 : i32 to index
      %c0_224 = arith.constant 0 : index
      %263 = vector.load %arg37[%262, %c0_224] : memref<12x128xf32, #tpu.memory_space<vmem>>, vector<1x128xf32>
      %264 = arith.index_cast %arg38 : i32 to index
      %c0_225 = arith.constant 0 : index
      %265 = vector.load %arg36[%264, %c0_225] : memref<24x128xf32, #tpu.memory_space<vmem>>, vector<1x128xf32>
      %266 = arith.maximumf %263, %265 : vector<1x128xf32>
      %267 = arith.index_cast %261 : i32 to index
      %c0_226 = arith.constant 0 : index
      %268 = vector.load %arg37[%267, %c0_226] : memref<12x128xf32, #tpu.memory_space<vmem>>, vector<1x128xf32>
      tpu.vector_store %arg37[%267, %c0_226], %266 {strides = array<i32>} : memref<12x128xf32, #tpu.memory_space<vmem>>, vector<1x128xf32>,
    }
    %c24_i32_132 = arith.constant 24 : i32
    %c0_133 = arith.constant 0 : index
    %c0_134 = arith.constant 0 : index
    %159 = vector.load %arg37[%c0_133, %c0_134] : memref<12x128xf32, #tpu.memory_space<vmem>>, vector<12x128xf32>
    %cst_135 = arith.constant 0.000000e+00 : f32
    %160 = vector.shape_cast %69 : vector<12x1xi1> to vector<12x1xi1>
    %161 = vector.broadcast %160 : vector<12x1xi1> to vector<12x128xi1>
    %162 = vector.broadcast %cst_135 : f32 to vector<12x128xf32>
    %163 = arith.select %161, %159, %162 : vector<12x128xi1>, vector<12x128xf32>
    %164 = arith.maximumf %129, %163 : vector<12x128xf32>
    %c0_136 = arith.constant 0 : index
    %c0_137 = arith.constant 0 : index
    %165 = vector.load %arg34[%c0_136, %c0_137] : memref<12x128xf32, #tpu.memory_space<vmem>>, vector<12x128xf32>
    tpu.vector_store %arg34[%c0_136, %c0_137], %164 {strides = array<i32>} : memref<12x128xf32, #tpu.memory_space<vmem>>, vector<12x128xf32>,
    %cst_138 = arith.constant dense<0.000000e+00> : vector<24x128xf32>
    %166 = tpu.matmul %6, %164, %cst_138 {dimension_numbers = #tpu.dot_dimension_numbers<[1], [0], [0], [1], [0, 0, 1, 1], [], []>} : vector<24x12xf32>, vector<12x128xf32>, vector<24x128xf32> -> vector<24x128xf32>
    %cst_139 = arith.constant dense<0.000000e+00> : vector<24x128xf32>
    %167 = tpu.matmul %11, %164, %cst_139 {dimension_numbers = #tpu.dot_dimension_numbers<[1], [0], [0], [1], [0, 0, 1, 1], [], []>} : vector<24x12xf32>, vector<12x128xf32>, vector<24x128xf32> -> vector<24x128xf32>
    %168 = arith.truncf %167 : vector<24x128xf32> to vector<24x128xbf16>
    %c0_140 = arith.constant 0 : index
    %c0_141 = arith.constant 0 : index
    %169 = vector.load %arg25[%c0_140, %c0_141] : memref<128x128xbf16, #tpu.memory_space<vmem>>, vector<128x128xbf16>
    %cst_142 = arith.constant dense<0.000000e+00> : vector<24x128xf32>
    %170 = tpu.matmul %168, %169, %cst_142 {dimension_numbers = #tpu.dot_dimension_numbers<[1], [0], [0], [1], [0, 0, 1, 1], [], []>} : vector<24x128xbf16>, vector<128x128xbf16>, vector<24x128xf32> -> vector<24x128xf32>
    %171 = arith.truncf %166 : vector<24x128xf32> to vector<24x128xbf16>
    %c0_143 = arith.constant 0 : index
    %c0_144 = arith.constant 0 : index
    %172 = vector.load %arg26[%c0_143, %c0_144] : memref<128x128xbf16, #tpu.memory_space<vmem>>, vector<128x128xbf16>
    %cst_145 = arith.constant dense<0.000000e+00> : vector<24x128xf32>
    %173 = tpu.matmul %171, %172, %cst_145 {dimension_numbers = #tpu.dot_dimension_numbers<[1], [0], [0], [1], [0, 0, 1, 1], [], []>} : vector<24x128xbf16>, vector<128x128xbf16>, vector<24x128xf32> -> vector<24x128xf32>
    %174 = arith.addf %170, %173 : vector<24x128xf32>
    %c0_146 = arith.constant 0 : index
    %c0_147 = arith.constant 0 : index
    %175 = vector.load %arg28[%c0_146, %c0_147] : memref<1x128xf32, #tpu.memory_space<vmem>>, vector<1x128xf32>
    %176 = vector.broadcast %175 : vector<1x128xf32> to vector<24x128xf32>
    %177 = arith.addf %174, %176 : vector<24x128xf32>
    %cst_148 = arith.constant 0.000000e+00 : f32
    %178 = vector.broadcast %cst_148 : f32 to vector<24x128xf32>
    %179 = arith.maximumf %177, %178 : vector<24x128xf32>
    %180 = arith.truncf %179 : vector<24x128xf32> to vector<24x128xbf16>
    %c0_149 = arith.constant 0 : index
    %c0_150 = arith.constant 0 : index
    %181 = vector.load %arg27[%c0_149, %c0_150] : memref<128x128xbf16, #tpu.memory_space<vmem>>, vector<128x128xbf16>
    %cst_151 = arith.constant dense<0.000000e+00> : vector<24x128xf32>
    %182 = tpu.matmul %180, %181, %cst_151 {dimension_numbers = #tpu.dot_dimension_numbers<[1], [0], [0], [1], [0, 0, 1, 1], [], []>} : vector<24x128xbf16>, vector<128x128xbf16>, vector<24x128xf32> -> vector<24x128xf32>
    %c0_152 = arith.constant 0 : index
    %c0_153 = arith.constant 0 : index
    %183 = vector.load %arg29[%c0_152, %c0_153] : memref<1x128xf32, #tpu.memory_space<vmem>>, vector<1x128xf32>
    %184 = vector.broadcast %183 : vector<1x128xf32> to vector<24x128xf32>
    %185 = arith.addf %182, %184 : vector<24x128xf32>
    %186 = arith.maximumf %130, %185 : vector<24x128xf32>
    %c0_154 = arith.constant 0 : index
    %c0_155 = arith.constant 0 : index
    %187 = vector.load %arg35[%c0_154, %c0_155] : memref<24x128xf32, #tpu.memory_space<vmem>>, vector<24x128xf32>
    tpu.vector_store %arg35[%c0_154, %c0_155], %186 {strides = array<i32>} : memref<24x128xf32, #tpu.memory_space<vmem>>, vector<24x128xf32>,
    %c0_156 = arith.constant 0 : index
    %c0_157 = arith.constant 0 : index
    %188 = vector.load %arg34[%c0_156, %c0_157] : memref<12x128xf32, #tpu.memory_space<vmem>>, vector<12x128xf32>
    %c0_158 = arith.constant 0 : index
    %c0_159 = arith.constant 0 : index
    %189 = vector.load %arg35[%c0_158, %c0_159] : memref<24x128xf32, #tpu.memory_space<vmem>>, vector<24x128xf32>
    %cst_160 = arith.constant dense<0.000000e+00> : vector<24x128xf32>
    %190 = tpu.matmul %6, %188, %cst_160 {dimension_numbers = #tpu.dot_dimension_numbers<[1], [0], [0], [1], [0, 0, 1, 1], [], []>} : vector<24x12xf32>, vector<12x128xf32>, vector<24x128xf32> -> vector<24x128xf32>
    %cst_161 = arith.constant dense<0.000000e+00> : vector<24x128xf32>
    %191 = tpu.matmul %11, %188, %cst_161 {dimension_numbers = #tpu.dot_dimension_numbers<[1], [0], [0], [1], [0, 0, 1, 1], [], []>} : vector<24x12xf32>, vector<12x128xf32>, vector<24x128xf32> -> vector<24x128xf32>
    %192 = arith.truncf %190 : vector<24x128xf32> to vector<24x128xbf16>
    %c0_162 = arith.constant 0 : index
    %c0_163 = arith.constant 0 : index
    %193 = vector.load %arg19[%c0_162, %c0_163] : memref<128x128xbf16, #tpu.memory_space<vmem>>, vector<128x128xbf16>
    %cst_164 = arith.constant dense<0.000000e+00> : vector<24x128xf32>
    %194 = tpu.matmul %192, %193, %cst_164 {dimension_numbers = #tpu.dot_dimension_numbers<[1], [0], [0], [1], [0, 0, 1, 1], [], []>} : vector<24x128xbf16>, vector<128x128xbf16>, vector<24x128xf32> -> vector<24x128xf32>
    %195 = arith.truncf %191 : vector<24x128xf32> to vector<24x128xbf16>
    %c0_165 = arith.constant 0 : index
    %c0_166 = arith.constant 0 : index
    %196 = vector.load %arg20[%c0_165, %c0_166] : memref<128x128xbf16, #tpu.memory_space<vmem>>, vector<128x128xbf16>
    %cst_167 = arith.constant dense<0.000000e+00> : vector<24x128xf32>
    %197 = tpu.matmul %195, %196, %cst_167 {dimension_numbers = #tpu.dot_dimension_numbers<[1], [0], [0], [1], [0, 0, 1, 1], [], []>} : vector<24x128xbf16>, vector<128x128xbf16>, vector<24x128xf32> -> vector<24x128xf32>
    %198 = arith.addf %194, %197 : vector<24x128xf32>
    %199 = arith.truncf %189 : vector<24x128xf32> to vector<24x128xbf16>
    %c0_168 = arith.constant 0 : index
    %c0_169 = arith.constant 0 : index
    %200 = vector.load %arg21[%c0_168, %c0_169] : memref<128x128xbf16, #tpu.memory_space<vmem>>, vector<128x128xbf16>
    %cst_170 = arith.constant dense<0.000000e+00> : vector<24x128xf32>
    %201 = tpu.matmul %199, %200, %cst_170 {dimension_numbers = #tpu.dot_dimension_numbers<[1], [0], [0], [1], [0, 0, 1, 1], [], []>} : vector<24x128xbf16>, vector<128x128xbf16>, vector<24x128xf32> -> vector<24x128xf32>
    %202 = arith.addf %198, %201 : vector<24x128xf32>
    %c0_171 = arith.constant 0 : index
    %c0_172 = arith.constant 0 : index
    %203 = vector.load %arg23[%c0_171, %c0_172] : memref<1x128xf32, #tpu.memory_space<vmem>>, vector<1x128xf32>
    %204 = vector.broadcast %203 : vector<1x128xf32> to vector<24x128xf32>
    %205 = arith.addf %202, %204 : vector<24x128xf32>
    %cst_173 = arith.constant 0.000000e+00 : f32
    %206 = vector.broadcast %cst_173 : f32 to vector<24x128xf32>
    %207 = arith.maximumf %205, %206 : vector<24x128xf32>
    %208 = arith.truncf %207 : vector<24x128xf32> to vector<24x128xbf16>
    %c0_174 = arith.constant 0 : index
    %c0_175 = arith.constant 0 : index
    %209 = vector.load %arg22[%c0_174, %c0_175] : memref<128x128xbf16, #tpu.memory_space<vmem>>, vector<128x128xbf16>
    %cst_176 = arith.constant dense<0.000000e+00> : vector<24x128xf32>
    %210 = tpu.matmul %208, %209, %cst_176 {dimension_numbers = #tpu.dot_dimension_numbers<[1], [0], [0], [1], [0, 0, 1, 1], [], []>} : vector<24x128xbf16>, vector<128x128xbf16>, vector<24x128xf32> -> vector<24x128xf32>
    %c0_177 = arith.constant 0 : index
    %c0_178 = arith.constant 0 : index
    %211 = vector.load %arg24[%c0_177, %c0_178] : memref<1x128xf32, #tpu.memory_space<vmem>>, vector<1x128xf32>
    %212 = vector.broadcast %211 : vector<1x128xf32> to vector<24x128xf32>
    %213 = arith.addf %210, %212 : vector<24x128xf32>
    %c0_179 = arith.constant 0 : index
    %c0_180 = arith.constant 0 : index
    %214 = vector.load %arg36[%c0_179, %c0_180] : memref<24x128xf32, #tpu.memory_space<vmem>>, vector<24x128xf32>
    tpu.vector_store %arg36[%c0_179, %c0_180], %213 {strides = array<i32>} : memref<24x128xf32, #tpu.memory_space<vmem>>, vector<24x128xf32>,
    %cst_181 = arith.constant 0xFF800000 : f32
    %215 = vector.broadcast %cst_181 : f32 to vector<12x128xf32>
    %c0_182 = arith.constant 0 : index
    %c0_183 = arith.constant 0 : index
    %216 = vector.load %arg37[%c0_182, %c0_183] : memref<12x128xf32, #tpu.memory_space<vmem>>, vector<12x128xf32>
    tpu.vector_store %arg37[%c0_182, %c0_183], %215 {strides = array<i32>} : memref<12x128xf32, #tpu.memory_space<vmem>>, vector<12x128xf32>,
    %c0_i32_184 = arith.constant 0 : i32
    %c24_i32_185 = arith.constant 24 : i32
    %217 = arith.addi %c0_i32_184, %c24_i32_185 : i32
    %c1_i32_186 = arith.constant 1 : i32
    scf.for %arg38 = %c0_i32_184 to %217 step %c1_i32_186  : i32 {
      %260 = arith.index_cast %arg38 : i32 to index
      %261 = memref.load %arg1[%260] : memref<24xi32, #tpu.memory_space<smem>>
      %262 = arith.index_cast %261 : i32 to index
      %c0_224 = arith.constant 0 : index
      %263 = vector.load %arg37[%262, %c0_224] : memref<12x128xf32, #tpu.memory_space<vmem>>, vector<1x128xf32>
      %264 = arith.index_cast %arg38 : i32 to index
      %c0_225 = arith.constant 0 : index
      %265 = vector.load %arg36[%264, %c0_225] : memref<24x128xf32, #tpu.memory_space<vmem>>, vector<1x128xf32>
      %266 = arith.maximumf %263, %265 : vector<1x128xf32>
      %267 = arith.index_cast %261 : i32 to index
      %c0_226 = arith.constant 0 : index
      %268 = vector.load %arg37[%267, %c0_226] : memref<12x128xf32, #tpu.memory_space<vmem>>, vector<1x128xf32>
      tpu.vector_store %arg37[%267, %c0_226], %266 {strides = array<i32>} : memref<12x128xf32, #tpu.memory_space<vmem>>, vector<1x128xf32>,
    }
    %c24_i32_187 = arith.constant 24 : i32
    %c0_188 = arith.constant 0 : index
    %c0_189 = arith.constant 0 : index
    %218 = vector.load %arg37[%c0_188, %c0_189] : memref<12x128xf32, #tpu.memory_space<vmem>>, vector<12x128xf32>
    %cst_190 = arith.constant 0.000000e+00 : f32
    %219 = vector.shape_cast %69 : vector<12x1xi1> to vector<12x1xi1>
    %220 = vector.broadcast %219 : vector<12x1xi1> to vector<12x128xi1>
    %221 = vector.broadcast %cst_190 : f32 to vector<12x128xf32>
    %222 = arith.select %220, %218, %221 : vector<12x128xi1>, vector<12x128xf32>
    %223 = arith.maximumf %188, %222 : vector<12x128xf32>
    %c0_191 = arith.constant 0 : index
    %c0_192 = arith.constant 0 : index
    %224 = vector.load %arg34[%c0_191, %c0_192] : memref<12x128xf32, #tpu.memory_space<vmem>>, vector<12x128xf32>
    tpu.vector_store %arg34[%c0_191, %c0_192], %223 {strides = array<i32>} : memref<12x128xf32, #tpu.memory_space<vmem>>, vector<12x128xf32>,
    %cst_193 = arith.constant dense<0.000000e+00> : vector<24x128xf32>
    %225 = tpu.matmul %6, %223, %cst_193 {dimension_numbers = #tpu.dot_dimension_numbers<[1], [0], [0], [1], [0, 0, 1, 1], [], []>} : vector<24x12xf32>, vector<12x128xf32>, vector<24x128xf32> -> vector<24x128xf32>
    %cst_194 = arith.constant dense<0.000000e+00> : vector<24x128xf32>
    %226 = tpu.matmul %11, %223, %cst_194 {dimension_numbers = #tpu.dot_dimension_numbers<[1], [0], [0], [1], [0, 0, 1, 1], [], []>} : vector<24x12xf32>, vector<12x128xf32>, vector<24x128xf32> -> vector<24x128xf32>
    %227 = arith.truncf %226 : vector<24x128xf32> to vector<24x128xbf16>
    %c0_195 = arith.constant 0 : index
    %c0_196 = arith.constant 0 : index
    %228 = vector.load %arg25[%c0_195, %c0_196] : memref<128x128xbf16, #tpu.memory_space<vmem>>, vector<128x128xbf16>
    %cst_197 = arith.constant dense<0.000000e+00> : vector<24x128xf32>
    %229 = tpu.matmul %227, %228, %cst_197 {dimension_numbers = #tpu.dot_dimension_numbers<[1], [0], [0], [1], [0, 0, 1, 1], [], []>} : vector<24x128xbf16>, vector<128x128xbf16>, vector<24x128xf32> -> vector<24x128xf32>
    %230 = arith.truncf %225 : vector<24x128xf32> to vector<24x128xbf16>
    %c0_198 = arith.constant 0 : index
    %c0_199 = arith.constant 0 : index
    %231 = vector.load %arg26[%c0_198, %c0_199] : memref<128x128xbf16, #tpu.memory_space<vmem>>, vector<128x128xbf16>
    %cst_200 = arith.constant dense<0.000000e+00> : vector<24x128xf32>
    %232 = tpu.matmul %230, %231, %cst_200 {dimension_numbers = #tpu.dot_dimension_numbers<[1], [0], [0], [1], [0, 0, 1, 1], [], []>} : vector<24x128xbf16>, vector<128x128xbf16>, vector<24x128xf32> -> vector<24x128xf32>
    %233 = arith.addf %229, %232 : vector<24x128xf32>
    %c0_201 = arith.constant 0 : index
    %c0_202 = arith.constant 0 : index
    %234 = vector.load %arg28[%c0_201, %c0_202] : memref<1x128xf32, #tpu.memory_space<vmem>>, vector<1x128xf32>
    %235 = vector.broadcast %234 : vector<1x128xf32> to vector<24x128xf32>
    %236 = arith.addf %233, %235 : vector<24x128xf32>
    %cst_203 = arith.constant 0.000000e+00 : f32
    %237 = vector.broadcast %cst_203 : f32 to vector<24x128xf32>
    %238 = arith.maximumf %236, %237 : vector<24x128xf32>
    %239 = arith.truncf %238 : vector<24x128xf32> to vector<24x128xbf16>
    %c0_204 = arith.constant 0 : index
    %c0_205 = arith.constant 0 : index
    %240 = vector.load %arg27[%c0_204, %c0_205] : memref<128x128xbf16, #tpu.memory_space<vmem>>, vector<128x128xbf16>
    %cst_206 = arith.constant dense<0.000000e+00> : vector<24x128xf32>
    %241 = tpu.matmul %239, %240, %cst_206 {dimension_numbers = #tpu.dot_dimension_numbers<[1], [0], [0], [1], [0, 0, 1, 1], [], []>} : vector<24x128xbf16>, vector<128x128xbf16>, vector<24x128xf32> -> vector<24x128xf32>
    %c0_207 = arith.constant 0 : index
    %c0_208 = arith.constant 0 : index
    %242 = vector.load %arg29[%c0_207, %c0_208] : memref<1x128xf32, #tpu.memory_space<vmem>>, vector<1x128xf32>
    %243 = vector.broadcast %242 : vector<1x128xf32> to vector<24x128xf32>
    %244 = arith.addf %241, %243 : vector<24x128xf32>
    %245 = arith.maximumf %189, %244 : vector<24x128xf32>
    %c0_209 = arith.constant 0 : index
    %c0_210 = arith.constant 0 : index
    %246 = vector.load %arg35[%c0_209, %c0_210] : memref<24x128xf32, #tpu.memory_space<vmem>>, vector<24x128xf32>
    tpu.vector_store %arg35[%c0_209, %c0_210], %245 {strides = array<i32>} : memref<24x128xf32, #tpu.memory_space<vmem>>, vector<24x128xf32>,
    %c0_211 = arith.constant 0 : index
    %c0_212 = arith.constant 0 : index
    %247 = vector.load %arg35[%c0_211, %c0_212] : memref<24x128xf32, #tpu.memory_space<vmem>>, vector<24x128xf32>
    %248 = arith.truncf %247 : vector<24x128xf32> to vector<24x128xbf16>
    %c0_213 = arith.constant 0 : index
    %c0_214 = arith.constant 0 : index
    %249 = vector.load %arg30[%c0_213, %c0_214] : memref<128x128xbf16, #tpu.memory_space<vmem>>, vector<128x128xbf16>
    %cst_215 = arith.constant dense<0.000000e+00> : vector<24x128xf32>
    %250 = tpu.matmul %248, %249, %cst_215 {dimension_numbers = #tpu.dot_dimension_numbers<[1], [0], [0], [1], [0, 0, 1, 1], [], []>} : vector<24x128xbf16>, vector<128x128xbf16>, vector<24x128xf32> -> vector<24x128xf32>
    %c0_216 = arith.constant 0 : index
    %c0_217 = arith.constant 0 : index
    %251 = vector.load %arg31[%c0_216, %c0_217] : memref<1x128xf32, #tpu.memory_space<vmem>>, vector<1x128xf32>
    %252 = vector.broadcast %251 : vector<1x128xf32> to vector<24x128xf32>
    %253 = arith.addf %250, %252 : vector<24x128xf32>
    %cst_218 = arith.constant 0.000000e+00 : f32
    %254 = vector.broadcast %cst_218 : f32 to vector<24x128xf32>
    %255 = arith.maximumf %253, %254 : vector<24x128xf32>
    %256 = arith.truncf %255 : vector<24x128xf32> to vector<24x128xbf16>
    %c0_219 = arith.constant 0 : index
    %c0_220 = arith.constant 0 : index
    %257 = vector.load %arg32[%c0_219, %c0_220] : memref<128x1xbf16, #tpu.memory_space<vmem>>, vector<128x1xbf16>
    %cst_221 = arith.constant dense<0.000000e+00> : vector<24x1xf32>
    %258 = tpu.matmul %256, %257, %cst_221 {dimension_numbers = #tpu.dot_dimension_numbers<[1], [0], [0], [1], [0, 0, 1, 1], [], []>} : vector<24x128xbf16>, vector<128x1xbf16>, vector<24x1xf32> -> vector<24x1xf32>
    %c0_222 = arith.constant 0 : index
    %c0_223 = arith.constant 0 : index
    %259 = vector.load %arg33[%c0_222, %c0_223] : memref<24x1xf32, #tpu.memory_space<vmem>>, vector<24x1xf32>
    tpu.vector_store %arg33[%c0_222, %c0_223], %258 {strides = array<i32>} : memref<24x1xf32, #tpu.memory_space<vmem>>, vector<24x1xf32>,
    return
  }
  func.func @transform_0(%arg0: i32, %arg1: memref<24xi32, #tpu.memory_space<smem>>, %arg2: memref<1xi32, #tpu.memory_space<smem>>) -> (i32, i32) {
    %c0_i32 = arith.constant 0 : i32
    %c0_i32_0 = arith.constant 0 : i32
    %c0_i32_1 = arith.constant 0 : i32
    return %c0_i32, %c0_i32_0 : i32, i32
  }
  func.func @transform_1(%arg0: i32, %arg1: memref<24xi32, #tpu.memory_space<smem>>, %arg2: memref<1xi32, #tpu.memory_space<smem>>) -> (i32, i32) {
    %c0_i32 = arith.constant 0 : i32
    %c0_i32_0 = arith.constant 0 : i32
    %c0_i32_1 = arith.constant 0 : i32
    return %c0_i32, %c0_i32_0 : i32, i32
  }
  func.func @transform_2(%arg0: i32, %arg1: memref<24xi32, #tpu.memory_space<smem>>, %arg2: memref<1xi32, #tpu.memory_space<smem>>) -> (i32, i32) {
    %c0_i32 = arith.constant 0 : i32
    %c0_i32_0 = arith.constant 0 : i32
    %c0_i32_1 = arith.constant 0 : i32
    return %c0_i32, %c0_i32_0 : i32, i32
  }
  func.func @transform_3(%arg0: i32, %arg1: memref<24xi32, #tpu.memory_space<smem>>, %arg2: memref<1xi32, #tpu.memory_space<smem>>) -> (i32, i32) {
    %c0_i32 = arith.constant 0 : i32
    %c0_i32_0 = arith.constant 0 : i32
    %c0_i32_1 = arith.constant 0 : i32
    return %c0_i32, %c0_i32_0 : i32, i32
  }
  func.func @transform_4(%arg0: i32, %arg1: memref<24xi32, #tpu.memory_space<smem>>, %arg2: memref<1xi32, #tpu.memory_space<smem>>) -> (i32, i32) {
    %c0_i32 = arith.constant 0 : i32
    %c0_i32_0 = arith.constant 0 : i32
    %c0_i32_1 = arith.constant 0 : i32
    return %c0_i32, %c0_i32_0 : i32, i32
  }
  func.func @transform_5(%arg0: i32, %arg1: memref<24xi32, #tpu.memory_space<smem>>, %arg2: memref<1xi32, #tpu.memory_space<smem>>) -> (i32, i32) {
    %c0_i32 = arith.constant 0 : i32
    %c0_i32_0 = arith.constant 0 : i32
    %c0_i32_1 = arith.constant 0 : i32
    return %c0_i32, %c0_i32_0 : i32, i32
  }
  func.func @transform_6(%arg0: i32, %arg1: memref<24xi32, #tpu.memory_space<smem>>, %arg2: memref<1xi32, #tpu.memory_space<smem>>) -> (i32, i32) {
    %c0_i32 = arith.constant 0 : i32
    %c0_i32_0 = arith.constant 0 : i32
    %c0_i32_1 = arith.constant 0 : i32
    return %c0_i32, %c0_i32_0 : i32, i32
  }
  func.func @transform_7(%arg0: i32, %arg1: memref<24xi32, #tpu.memory_space<smem>>, %arg2: memref<1xi32, #tpu.memory_space<smem>>) -> (i32, i32) {
    %c0_i32 = arith.constant 0 : i32
    %c0_i32_0 = arith.constant 0 : i32
    %c0_i32_1 = arith.constant 0 : i32
    return %c0_i32, %c0_i32_0 : i32, i32
  }
  func.func @transform_8(%arg0: i32, %arg1: memref<24xi32, #tpu.memory_space<smem>>, %arg2: memref<1xi32, #tpu.memory_space<smem>>) -> (i32, i32) {
    %c0_i32 = arith.constant 0 : i32
    %c0_i32_0 = arith.constant 0 : i32
    %c0_i32_1 = arith.constant 0 : i32
    return %c0_i32, %c0_i32_0 : i32, i32
  }
  func.func @transform_9(%arg0: i32, %arg1: memref<24xi32, #tpu.memory_space<smem>>, %arg2: memref<1xi32, #tpu.memory_space<smem>>) -> (i32, i32) {
    %c0_i32 = arith.constant 0 : i32
    %c0_i32_0 = arith.constant 0 : i32
    %c0_i32_1 = arith.constant 0 : i32
    return %c0_i32, %c0_i32_0 : i32, i32
  }
  func.func @transform_10(%arg0: i32, %arg1: memref<24xi32, #tpu.memory_space<smem>>, %arg2: memref<1xi32, #tpu.memory_space<smem>>) -> (i32, i32) {
    %c0_i32 = arith.constant 0 : i32
    %c0_i32_0 = arith.constant 0 : i32
    %c0_i32_1 = arith.constant 0 : i32
    return %c0_i32, %c0_i32_0 : i32, i32
  }
  func.func @transform_11(%arg0: i32, %arg1: memref<24xi32, #tpu.memory_space<smem>>, %arg2: memref<1xi32, #tpu.memory_space<smem>>) -> (i32, i32) {
    %c0_i32 = arith.constant 0 : i32
    %c0_i32_0 = arith.constant 0 : i32
    %c0_i32_1 = arith.constant 0 : i32
    return %c0_i32, %c0_i32_0 : i32, i32
  }
  func.func @transform_12(%arg0: i32, %arg1: memref<24xi32, #tpu.memory_space<smem>>, %arg2: memref<1xi32, #tpu.memory_space<smem>>) -> (i32, i32) {
    %c0_i32 = arith.constant 0 : i32
    %c0_i32_0 = arith.constant 0 : i32
    %c0_i32_1 = arith.constant 0 : i32
    return %c0_i32, %c0_i32_0 : i32, i32
  }
  func.func @transform_13(%arg0: i32, %arg1: memref<24xi32, #tpu.memory_space<smem>>, %arg2: memref<1xi32, #tpu.memory_space<smem>>) -> (i32, i32) {
    %c0_i32 = arith.constant 0 : i32
    %c0_i32_0 = arith.constant 0 : i32
    %c0_i32_1 = arith.constant 0 : i32
    return %c0_i32, %c0_i32_0 : i32, i32
  }
  func.func @transform_14(%arg0: i32, %arg1: memref<24xi32, #tpu.memory_space<smem>>, %arg2: memref<1xi32, #tpu.memory_space<smem>>) -> (i32, i32) {
    %c0_i32 = arith.constant 0 : i32
    %c0_i32_0 = arith.constant 0 : i32
    %c0_i32_1 = arith.constant 0 : i32
    return %c0_i32, %c0_i32_0 : i32, i32
  }
  func.func @transform_15(%arg0: i32, %arg1: memref<24xi32, #tpu.memory_space<smem>>, %arg2: memref<1xi32, #tpu.memory_space<smem>>) -> (i32, i32) {
    %c0_i32 = arith.constant 0 : i32
    %c0_i32_0 = arith.constant 0 : i32
    %c0_i32_1 = arith.constant 0 : i32
    return %c0_i32, %c0_i32_0 : i32, i32
  }
  func.func @transform_16(%arg0: i32, %arg1: memref<24xi32, #tpu.memory_space<smem>>, %arg2: memref<1xi32, #tpu.memory_space<smem>>) -> (i32, i32) {
    %c0_i32 = arith.constant 0 : i32
    %c0_i32_0 = arith.constant 0 : i32
    %c0_i32_1 = arith.constant 0 : i32
    return %c0_i32, %c0_i32_0 : i32, i32
  }
  func.func @transform_17(%arg0: i32, %arg1: memref<24xi32, #tpu.memory_space<smem>>, %arg2: memref<1xi32, #tpu.memory_space<smem>>) -> (i32, i32) {
    %c0_i32 = arith.constant 0 : i32
    %c0_i32_0 = arith.constant 0 : i32
    %c0_i32_1 = arith.constant 0 : i32
    return %c0_i32, %c0_i32_0 : i32, i32
  }
  func.func @transform_18(%arg0: i32, %arg1: memref<24xi32, #tpu.memory_space<smem>>, %arg2: memref<1xi32, #tpu.memory_space<smem>>) -> (i32, i32) {
    %c0_i32 = arith.constant 0 : i32
    %c0_i32_0 = arith.constant 0 : i32
    %c0_i32_1 = arith.constant 0 : i32
    return %c0_i32, %c0_i32_0 : i32, i32
  }
  func.func @transform_19(%arg0: i32, %arg1: memref<24xi32, #tpu.memory_space<smem>>, %arg2: memref<1xi32, #tpu.memory_space<smem>>) -> (i32, i32) {
    %c0_i32 = arith.constant 0 : i32
    %c0_i32_0 = arith.constant 0 : i32
    %c0_i32_1 = arith.constant 0 : i32
    return %c0_i32, %c0_i32_0 : i32, i32
  }
  func.func @transform_20(%arg0: i32, %arg1: memref<24xi32, #tpu.memory_space<smem>>, %arg2: memref<1xi32, #tpu.memory_space<smem>>) -> (i32, i32) {
    %c0_i32 = arith.constant 0 : i32
    %c0_i32_0 = arith.constant 0 : i32
    %c0_i32_1 = arith.constant 0 : i32
    return %c0_i32, %c0_i32_0 : i32, i32
  }
  func.func @transform_21(%arg0: i32, %arg1: memref<24xi32, #tpu.memory_space<smem>>, %arg2: memref<1xi32, #tpu.memory_space<smem>>) -> (i32, i32) {
    %c0_i32 = arith.constant 0 : i32
    %c0_i32_0 = arith.constant 0 : i32
    %c0_i32_1 = arith.constant 0 : i32
    return %c0_i32, %c0_i32_0 : i32, i32
  }
  func.func @transform_22(%arg0: i32, %arg1: memref<24xi32, #tpu.memory_space<smem>>, %arg2: memref<1xi32, #tpu.memory_space<smem>>) -> (i32, i32) {
    %c0_i32 = arith.constant 0 : i32
    %c0_i32_0 = arith.constant 0 : i32
    %c0_i32_1 = arith.constant 0 : i32
    return %c0_i32, %c0_i32_0 : i32, i32
  }
  func.func @transform_23(%arg0: i32, %arg1: memref<24xi32, #tpu.memory_space<smem>>, %arg2: memref<1xi32, #tpu.memory_space<smem>>) -> (i32, i32) {
    %c0_i32 = arith.constant 0 : i32
    %c0_i32_0 = arith.constant 0 : i32
    %c0_i32_1 = arith.constant 0 : i32
    return %c0_i32, %c0_i32_0 : i32, i32
  }
  func.func @transform_24(%arg0: i32, %arg1: memref<24xi32, #tpu.memory_space<smem>>, %arg2: memref<1xi32, #tpu.memory_space<smem>>) -> (i32, i32) {
    %c0_i32 = arith.constant 0 : i32
    %c0_i32_0 = arith.constant 0 : i32
    %c0_i32_1 = arith.constant 0 : i32
    return %c0_i32, %c0_i32_0 : i32, i32
  }
  func.func @transform_25(%arg0: i32, %arg1: memref<24xi32, #tpu.memory_space<smem>>, %arg2: memref<1xi32, #tpu.memory_space<smem>>) -> (i32, i32) {
    %c0_i32 = arith.constant 0 : i32
    %c0_i32_0 = arith.constant 0 : i32
    %c0_i32_1 = arith.constant 0 : i32
    return %c0_i32, %c0_i32_0 : i32, i32
  }
  func.func @transform_26(%arg0: i32, %arg1: memref<24xi32, #tpu.memory_space<smem>>, %arg2: memref<1xi32, #tpu.memory_space<smem>>) -> (i32, i32) {
    %c0_i32 = arith.constant 0 : i32
    %c0_i32_0 = arith.constant 0 : i32
    %c0_i32_1 = arith.constant 0 : i32
    return %c0_i32, %c0_i32_0 : i32, i32
  }
  func.func @transform_27(%arg0: i32, %arg1: memref<24xi32, #tpu.memory_space<smem>>, %arg2: memref<1xi32, #tpu.memory_space<smem>>) -> (i32, i32) {
    %c0_i32 = arith.constant 0 : i32
    %c0_i32_0 = arith.constant 0 : i32
    %c0_i32_1 = arith.constant 0 : i32
    return %c0_i32, %c0_i32_0 : i32, i32
  }
  func.func @transform_28(%arg0: i32, %arg1: memref<24xi32, #tpu.memory_space<smem>>, %arg2: memref<1xi32, #tpu.memory_space<smem>>) -> (i32, i32) {
    %c0_i32 = arith.constant 0 : i32
    %c0_i32_0 = arith.constant 0 : i32
    %c0_i32_1 = arith.constant 0 : i32
    return %c0_i32, %c0_i32_0 : i32, i32
  }
  func.func @transform_29(%arg0: i32, %arg1: memref<24xi32, #tpu.memory_space<smem>>, %arg2: memref<1xi32, #tpu.memory_space<smem>>) -> (i32, i32) {
    %c0_i32 = arith.constant 0 : i32
    %c0_i32_0 = arith.constant 0 : i32
    %c0_i32_1 = arith.constant 0 : i32
    return %c0_i32, %c0_i32_0 : i32, i32
  }
  func.func @transform_30(%arg0: i32, %arg1: memref<24xi32, #tpu.memory_space<smem>>, %arg2: memref<1xi32, #tpu.memory_space<smem>>) -> (i32, i32) {
    %c0_i32 = arith.constant 0 : i32
    %c0_i32_0 = arith.constant 0 : i32
    %c0_i32_1 = arith.constant 0 : i32
    return %c0_i32, %c0_i32_0 : i32, i32
  }
}

</mosaic_0001>

<bundles_post_ra>
// kernel: gnnet_forward.1
= control target key start
LH: loop header
LB: loop body
LE: loop exit
PB: predicated region body
PF: predicated region fallthrough
CT: control target
= control target key end

     0   :  { %s6597_s6 = smov 1   ;;  %s6598_s10 = smov 2   ;;  %s7438_s0 = inlined_call_operand.smem [shape: u32[33], index: -1, kind: input, shape index: {}] }
   0x1   :  { %s6645_s5 = sld [smem:[%s7438_s0]]   ;;  %s6599_s14 = smov 3  }
   0x2   :  { %s6650_s9 = sld [smem:[%s7438_s0 + %s6597_s6]]   ;;  %s6600_s18 = smov 4  }
   0x3   :  { %s6655_s13 = sld [smem:[%s7438_s0 + %s6598_s10]]   ;;  %s6601_s22 = smov 5  }
   0x4   :  { %s6660_s17 = sld [smem:[%s7438_s0 + %s6599_s14]]   ;;  %s6602_s26 = smov 6  }
   0x5   :  { %s6665_s21 = sld [smem:[%s7438_s0 + %s6600_s18]]   ;;  %s6603_s30 = smov 7  }
   0x6   :  { %s6670_s25 = sld [smem:[%s7438_s0 + %s6601_s22]]   ;;  %s6604_s4 = smov 8  }
   0x7   :  { %s6675_s29 = sld [smem:[%s7438_s0 + %s6602_s26]]   ;;  %s6605_s10 = smov 9  }
   0x8   :  { %s6680_s3 = sld [smem:[%s7438_s0 + %s6603_s30]]   ;;  %s6606_s15 = smov 10  }
   0x9   :  { %s6685_s8 = sld [smem:[%s7438_s0 + %s6604_s4]]   ;;  %s6607_s20 = smov 11  }
   0xa   :  { %s6690_s14 = sld [smem:[%s7438_s0 + %s6605_s10]]   ;;  %s6608_s26 = smov 12  }
   0xb   :  { %s6695_s19 = sld [smem:[%s7438_s0 + %s6606_s15]]   ;;  %s6609_s1 = smov 13  }
   0xc   :  { %7461 = sst [smem:[#allocation10_spill]] %s6670_s25  ;;  %s6610_s7 = smov 14  }
   0xd   :  { %s6700_s24 = sld [smem:[%s7438_s0 + %s6607_s20]]   ;;  %s6611_s15 = smov 15  }
   0xe   :  { %s6705_s30 = sld [smem:[%s7438_s0 + %s6608_s26]]   ;;  %s6612_s22 = smov 16  }
   0xf   :  { %s6710_s6 = sld [smem:[%s7438_s0 + %s6609_s1]]   ;;  %s6613_s28 = smov 17  }
  0x10   :  { %s6715_s12 = sld [smem:[%s7438_s0 + %s6610_s7]]   ;;  %s6614_s7 = smov 18  }
  0x11   :  { %s6720_s20 = sld [smem:[%s7438_s0 + %s6611_s15]]   ;;  %s6615_s15 = smov 19  }
  0x12   :  { %s6725_s27 = sld [smem:[%s7438_s0 + %s6612_s22]]   ;;  %s6616_s22 = smov 20  }
  0x13   :  { %s6730_s4 = sld [smem:[%s7438_s0 + %s6613_s28]]   ;;  %s6617_s28 = smov 21  }
  0x14   :  { %7462 = sst [smem:[#allocation11_spill]] %s6705_s30 }
  0x15   :  { %s6735_s25 = sld [smem:[%s7438_s0 + %s6614_s7]]   ;;  %s6618_s7 = smov 22  }
  0x16   :  { %s6740_s30 = sld [smem:[%s7438_s0 + %s6615_s15]]   ;;  %s6619_s15 = smov 23  }
  0x18   :  { %7463 = sst [smem:[#allocation12_spill]] %s6725_s27 }
  0x19   :  { %7464 = sst [smem:[#allocation13_spill]] %s6730_s4 }
  0x1a   :  { %s6745_s27 = sld [smem:[%s7438_s0 + %s6616_s22]]   ;;  %s6620_s22 = smov 24  }
  0x1b   :  { %7465 = sst [smem:[#allocation14_spill]] %s6735_s25 }
  0x1c   :  { %7466 = sst [smem:[#allocation15_spill]] %s6740_s30 }
  0x1d   :  { %s6750_s4 = sld [smem:[%s7438_s0 + %s6617_s28]]   ;;  %s6621_s28 = smov 25  }
  0x1e   :  { %s6755_s25 = sld [smem:[%s7438_s0 + %s6618_s7]]   ;;  %s6622_s7 = smov 26  }
  0x1f   :  { %s6760_s30 = sld [smem:[%s7438_s0 + %s6619_s15]]   ;;  %s6623_s15 = smov 27  }
  0x20   :  { %7467 = sst [smem:[#allocation16_spill]] %s6745_s27 }
  0x21   :  { %s6765_s27 = sld [smem:[%s7438_s0 + %s6620_s22]]   ;;  %s6624_s22 = smov 28  }
  0x22   :  { %s6770_s10 = sld [smem:[%s7438_s0 + %s6621_s28]]   ;;  %s6625_s28 = smov 29  }
  0x23   :  { %7468 = sst [smem:[#allocation17_spill]] %s6750_s4 }
  0x24   :  { %7469 = sst [smem:[#allocation18_spill]] %s6755_s25  ;;  %s6626_s25 = smov 30  }
  0x25   :  { %7470 = sst [smem:[#allocation19_spill]] %s6760_s30  ;;  %s6627_s30 = smov 31  }
  0x26   :  { %s6775_s16 = sld [smem:[%s7438_s0 + %s6622_s7]]  }
  0x27   :  { %7471 = sst [smem:[#allocation20_spill]] %s6765_s27  ;;  %s6628_s27 = smov 32  }
  0x28   :  { %7472 = sst [smem:[#allocation21_spill]] %s6770_s10  ;;  %s70_s10 = sshll.u32 %s6645_s5, 4  ;;  %s71_s10 = int_to_ptr.vmem [resolvable:$true] %s70_s10 }
  0x29   :  { %s6780_s23 = sld [smem:[%s7438_s0 + %s6623_s15]]   ;;  %p6564_p1 = scmp.lt.s32.totalorder %s71_s10, %s71_s10 }
  0x2a   :  { %s6785_s1 = sld [smem:[%s7438_s0 + %s6624_s22]]  }
  0x2b   :  { %s6790_s4 = sld [smem:[%s7438_s0 + %s6625_s28]]   ;;  %s6559_s28 = scalar_lea.vmem %s71_s10, 16 }
  0x2c   :  { %7473 = sst [smem:[#allocation22_spill]] %s6775_s16  ;;  %p6560_p0 = scmp.ne.s32.totalorder %s71_s10, %s6559_s28 }
  0x2d   :  { %s6795_s16 = sld [smem:[%s7438_s0 + %s6626_s25]]   ;;  %p6565_p2 = scmp.lt.s32.totalorder %s6559_s28, %s6559_s28 }
  0x2f   :  { %7474 = sst [smem:[#allocation23_spill]] %s6780_s23  ;;  %p6566_p3 = por %p6565_p2, %p6564_p1 }
  0x30   :  { %7475 = sst [smem:[#allocation24_spill]] %s6785_s1 }
  0x31   :  { %s6800_s23 = sld [smem:[%s7438_s0 + %s6627_s30]]   ;;  %p6567_p4 = pnand %p6566_p3, %p6560_p0 }
  0x32   :  { %s6805_s1 = sld [smem:[%s7438_s0 + %s6628_s27]]  }
  0x33   :  { %6570 = shalt.err (!%p6567_p4)  }
  0x34   :  { %s6629_s2 = smov [#allocation7]  }
  0x35   :  { %73 = dma.vmem_to_smem %s71_s10, 16, %s6629_s2, [#allocation6] }
  0x36   :  { %6583 = dma.done.wait [#allocation6], 16 }
  0x37   :  { %6584 = vsyncadd [#allocation6], 4294967280 }
  0x38   :  { %76 = sfence }
  0x39   :  { %v144_v0 = vld [vmem:[%s6660_s17 + $0x10] sm:$0xff]  ;;  %v142_v1 = vld [vmem:[%s6660_s17] sm:$0xff]  ;;  %v140_v2 = vlaneseq  ;;  %s185_s0 = scalar_lea.vmem %s6655_s13, %s6650_s9  ;;  %v6630_v3 = vmov 0   ;;  %vm201_vm0 = vcmask 1041408   ;;  %vm202_vm1 = vcmask 1042432   ;;  %v143_v12 = vld [vmem:[%s6660_s17 + $0x8] sm:$0xff] }
  0x3a   :  { %6357 = vset.pattern.permute.xlu1 %v6630_v3  ;;  %6356 = vset.pattern.permute.xlu0 %v6630_v3  ;;  %v196_v4 = vld [vmem:[%s6680_s3] sm:$0x7]  ;;  %v6631_v5 = vmov 65535   ;;  %v6632_v9 = vmov 0.0   ;;  %vm6633_vm2 = vmmov 0   ;;  %vm197_vm3 = vcmask 39936  }
  0x3b   :  { %152 = vperm.xlu1 %6357, %v144_v0   ;;  %146 = vperm.xlu0 %6356, %v142_v1   ;;  %v203_v6 = vsel %vm201_vm0, 4294967295, %v6631_v5  ;;  %v194_v7 = vld [vmem:[%s6675_s29] sm:$0x7]  ;;  %v6823_v13 = vshrl.u32 %v140_v2, 7  ;;  %v139_v17 = vld [vmem:[%s6655_s13 + $0x8] sm:$0xf] }
  0x3c   :  { %v186_v8 = vld [vmem:[%s185_s0] sm:$0x1]  ;;  %5518 = vmatprep.subr.bf16.mxu0 %v6632_v9  ;;  %v6817_v10 = vsel %vm202_vm1, %v203_v6, 0  ;;  %5524 = vmatprep.subr.bf16.mxu1 %v6632_v9  ;;  %v165_v22 = vld [vmem:[%s6665_s21 + $0x10] sm:$0xff]  ;;  %vm539_vm4 = vcmask 1043456   ;;  %v164_v25 = vld [vmem:[%s6665_s21 + $0x8] sm:$0xff] }
  0x3d   :  { %v163_v11 = vld [vmem:[%s6665_s21] sm:$0xff]  ;;  %v206_v15 = vand.u32 %v6817_v10, %v196_v4  ;;  %5520 = vmatprep.mubr.msk.bf16.mxu0 %vm6633_vm2, %v6632_v9  ;;  %v256_v16 = vand.u32 %v6817_v10, %v194_v7  ;;  %5526 = vmatprep.mubr.msk.bf16.mxu1 %vm6633_vm2, %v6632_v9  ;;  %v189_v20 = vsub.s32 0, %v6823_v13  ;;  %v195_v21 = vpack.c.bf16 %v186_v8, %v186_v8  ;;  %v6359_v37 = vld [vmem:[%s6695_s19 + $0x8] sm:$0xff]   ;;  %v6360_v38 = vld [vmem:[%s6695_s19 + $0x10] sm:$0xff]   ;;  %s7478_s5 = sld [smem:[#allocation11_spill]]  ;;  %s7479_s9 = sld [smem:[#allocation10_spill]] }
  0x3e   :  { %v138_v14 = vld [vmem:[%s6655_s13] sm:$0xff]  ;;  %vm6634_vm5 = vmmov 1   ;;  %v6635_v34 = vmov 0.0|0.0   ;;  %v6361_v39 = vld [vmem:[%s6695_s19 + $0x18] sm:$0xff]   ;;  %v6363_v41 = vld [vmem:[%s6695_s19 + $0x28] sm:$0xff]   ;;  %v141_v44 = vand.u32 127, %v140_v2 }
  0x3f   :  { %v300_v18 = vld [vmem:[%s6685_s8] sm:$0x7]  ;;  %5519 = vmatpush3.bf16.msra.mxu0 %v206_v15  ;;  %167 = vperm.xlu1 %6357, %v163_v11   ;;  %v6837_v23 = vpack.c.bf16 %v139_v17, %v138_v14  ;;  %v190_v24 = vrot.slane %v186_v8, %v189_v20  ;;  %vm6846_vm6 = vmpackc.low %vm539_vm4, %vm6634_vm5  ;;  %v6364_v42 = vld [vmem:[%s6695_s19 + $0x30] sm:$0xff]   ;;  %vm529_vm7 = vcmask 97280   ;;  %s7480_s13 = sld [smem:[#allocation15_spill]]  ;;  %s7481_s17 = sld [smem:[#allocation16_spill]] }
  0x40   :  { %v353_v19 = vld [vmem:[%s6690_s14] sm:$0x7]  ;;  %149 = vperm.xlu0 %6356, %v143_v12   ;;  %5525 = vmatpush3.bf16.msra.mxu1 %v256_v16  ;;  %v305_v26 = vand.u32 %v300_v18, %v6817_v10  ;;  %v6365_v43 = vld [vmem:[%s6695_s19 + $0x38] sm:$0xff]   ;;  %s7482_s21 = sld [smem:[#allocation12_spill]]  ;;  %s7483_s29 = sld [smem:[#allocation14_spill]] }
  0x41   :  { %5530 = vmatprep.subr.bf16.mxu0 %v6632_v9  ;;  %5536 = vmatprep.subr.bf16.mxu1 %v6632_v9  ;;  %v358_v27 = vand.u32 %v353_v19, %v6817_v10  ;;  %v191_v29 = vsub.f32 %v138_v14, %v190_v24  ;;  %v192_v30 = vsub.f32 %v139_v17, %v190_v24  ;;  %v6358_v36 = vld [vmem:[%s6695_s19] sm:$0xff]   ;;  %s7484_s3 = sld [smem:[#allocation17_spill]]  ;;  %s7485_s8 = sld [smem:[#allocation13_spill]] }
  0x42   :  { %5521 = vmatmul.mubr.msk.bf16.vlgmr.msra.gmra.mrb[0].mxu0 %vm197_vm3, %v195_v21  ;;  %v6362_v40 = vld [vmem:[%s6695_s19 + $0x20] sm:$0xff]   ;;  %s7486_s14 = sld [smem:[#allocation18_spill]]  ;;  %s7487_s19 = sld [smem:[#allocation19_spill]] }
  0x43   :  { %173 = vperm.xlu1 %6357, %v165_v22   ;;  %5527 = vmatmul.mubr.msk.bf16.vlgmr.msra.gmra.mrb[0].mxu1 %vm197_vm3, %v6837_v23  ;;  %v350_v31 = vmul.f32 %v191_v29, %v191_v29  ;;  %v351_v32 = vmul.f32 %v192_v30, %v192_v30  ;;  %v299_v33 = vpack.c.bf16 %v192_v30, %v191_v29  ;;  %v717_v58 = vld [vmem:[%s6715_s12] sm:$0x7] }
  0x44   :  { %170 = vperm.xlu0 %6356, %v164_v25   ;;  %5531 = vmatpush3.bf16.msra.mxu0 %v305_v26  ;;  %v725_v62 = vand.u32 %v717_v58, %v6817_v10  ;;  %v714_v13 = vld [vmem:[%s6710_s6] sm:$0x7] }
  0x45   :  { %5532 = vmatprep.mubr.msk.bf16.mxu0 %vm6633_vm2, %v6632_v9  ;;  %5537 = vmatpush3.bf16.msra.mxu1 %v358_v27  ;;  %v352_v35 = vpack.c.bf16 %v351_v32, %v350_v31  ;;  %v4908_v15 = vld [vmem:[%s6700_s24] ss:$0 sm:$0xff]  ;;  %v782_v17 = vand.u32 %v714_v13, %v6817_v10  ;;  %v6377_v13 = vld [vmem:[%s7480_s13 + $0x18] sm:$0xff]   ;;  %s6585_s24 = smov 0  }
  0x46   :  { %5538 = vmatprep.mubr.msk.bf16.mxu1 %vm6633_vm2, %v6632_v9  ;;  %6236 = vmatprep.subr.bf16.mxu1 %v6635_v34  ;;  %v4909_v58 = vld [vmem:[%s7478_s5] ss:$0 sm:$0xff] }
  0x47   :  { %5542 = vmatprep.subr.bf16.mxu0 %v6632_v9 }
  0x4a   :  { %5533 = vmatmul.mubr.msk.bf16.vlgmr.msra.gmra.mrb[4].mxu0 %vm197_vm3, %v299_v33 }
  0x4b   :  { %5539 = vmatmul.mubr.msk.bf16.vlgmr.msra.gmra.mrb[4].mxu1 %vm197_vm3, %v352_v35  ;;  %5558 = vmatprep.mubr.msk.bf16.mxu0 %vm6633_vm2, %v6632_v9  ;;  %v6366_v35 = vld [vmem:[%s6720_s20] sm:$0xff]  }
  0x4c   :  { %6239 = vmatpush3.bf16.msk.msra.mxu1 %vm6846_vm6, %v6837_v23  ;;  %5566 = vmatprep.mubr.msk.f32.mxu1 %vm6633_vm2, %v6632_v9 }
  0x4d   :  { %6240 = vmatprep.subr.bf16.mxu1 %v6635_v34  ;;  %5543 = vmatpush3.bf16.msra.mxu0 %v6358_v36 }
  0x4e   :  { %5544 = vmatprep.subr.bf16.mxu0 %v6632_v9 }
  0x51   :  { %5545 = vmatpush3.bf16.msra.mxu0 %v6359_v37 }
  0x52   :  { %5546 = vmatprep.subr.bf16.mxu0 %v6632_v9 }
  0x55   :  { %5547 = vmatpush3.bf16.msra.mxu0 %v6360_v38 }
  0x56   :  { %5548 = vmatprep.subr.bf16.mxu0 %v6632_v9 }
  0x59   :  { %5549 = vmatpush3.bf16.msra.mxu0 %v6361_v39  ;;  %v6367_v39 = vld [vmem:[%s6720_s20 + $0x8] sm:$0xff]  }
  0x5a   :  { %5550 = vmatprep.subr.bf16.mxu0 %v6632_v9 }
  0x5d   :  { %5551 = vmatpush3.bf16.msra.mxu0 %v6362_v40 }
  0x5e   :  { %5552 = vmatprep.subr.bf16.mxu0 %v6632_v9 }
  0x61   :  { %5553 = vmatpush3.bf16.msra.mxu0 %v6363_v41 }
  0x62   :  { %5554 = vmatprep.subr.bf16.mxu0 %v6632_v9 }
  0x65   :  { %5555 = vmatpush3.bf16.msra.mxu0 %v6364_v42 }
  0x66   :  { %5556 = vmatprep.subr.bf16.mxu0 %v6632_v9 }
  0x69   :  { %5557 = vmatpush3.bf16.msra.mxu0 %v6365_v43 }
  0x6a   :  { %5594 = vmatprep.subr.bf16.mxu0 %v782_v17 }
  0xba   :  { %v147_v45 = vpop.permute.xlu0 %146  ;;  %v153_v47 = vpop.permute.xlu1 %152 }
  0xbb   :  { %vm154_vm8 = vcmp.eq.s32.totalorder %v141_v44, %v147_v45  ;;  %vm156_vm9 = vcmp.eq.s32.totalorder %v141_v44, %v153_v47 }
  0xbc   :  { %v6886_v46 = vsel %vm154_vm8, 1.0, %v6632_v9  ;;  %v6901_v50 = vsel %vm156_vm9, 1.0, %v6632_v9 }
  0xbd   :  { %5567 = vmatmul.mubr.msk.f32.vlgmr.msra.gmra.mrb[8].mxu1 %vm529_vm7, %v6886_v46 }
  0xbe   :  { %6243 = vmatpush3.bf16.msk.msra.mxu1 %vm6846_vm6, %v6837_v23  ;;  %5569 = vmatprep.mubr.msk.f32.mxu1 %vm6633_vm2, %v6632_v9  ;;  %v168_v51 = vpop.permute.xlu1 %167 }
  0xbf   :  { %v150_v48 = vpop.permute.xlu0 %149  ;;  %vm175_vm11 = vcmp.eq.s32.totalorder %v141_v44, %v168_v51  ;;  %5588 = vmatprep.subr.bf16.mxu1 %v725_v62  ;;  %v6368_v51 = vld [vmem:[%s6720_s20 + $0x10] sm:$0xff]  }
  0xc0   :  { %vm155_vm10 = vcmp.eq.s32.totalorder %v141_v44, %v150_v48  ;;  %v6910_v53 = vsel %vm175_vm11, 1.0, %v6632_v9 }
  0xc1   :  { %v6896_v49 = vsel %vm155_vm10, 1.0, %v6632_v9 }
  0xc2   :  { %5570 = vmatmul.mubr.msk.f32.gmra.mrb[10].mxu1 %vm529_vm7, %v6896_v49  ;;  %v174_v54 = vpop.permute.xlu1 %173 }
  0xc3   :  { %5572 = vmatprep.mubr.msk.f32.mxu1 %vm6633_vm2, %v6632_v9  ;;  %v171_v52 = vpop.permute.xlu0 %170  ;;  %vm177_vm13 = vcmp.eq.s32.totalorder %v141_v44, %v174_v54  ;;  %v6370_v54 = vld [vmem:[%s6720_s20 + $0x20] sm:$0xff]  }
  0xc4   :  { %vm176_vm12 = vcmp.eq.s32.totalorder %v141_v44, %v171_v52  ;;  %v6924_v56 = vsel %vm177_vm13, 1.0, %v6632_v9  ;;  %v6369_v52 = vld [vmem:[%s6720_s20 + $0x18] sm:$0xff]  }
  0xc5   :  { %v6917_v55 = vsel %vm176_vm12, 1.0, %v6632_v9 }
  0xc6   :  { %5573 = vmatmul.mubr.msk.f32.gmra.mrb[12].mxu1 %vm529_vm7, %v6901_v50 }
  0xc7   :  { %5579 = vmatprep.mubr.msk.f32.mxu1 %vm6633_vm2, %v6632_v9 }
  0xca   :  { %5580 = vmatmul.mubr.msk.f32.vlgmr.msra.gmra.mrb[14].mxu1 %vm529_vm7, %v6910_v53 }
  0xcb   :  { %5582 = vmatprep.mubr.msk.f32.mxu1 %vm6633_vm2, %v6632_v9  ;;  %5589 = vmatpush3.bf16.msra.mxu1 %v725_v62 }
  0xcc   :  { %5600 = vmatprep.subr.bf16.mxu1 %v6366_v35 }
  0xce   :  { %5583 = vmatmul.mubr.msk.f32.gmra.mrb[16].mxu1 %vm529_vm7, %v6917_v55 }
  0xcf   :  { %5585 = vmatprep.mubr.msk.f32.mxu1 %vm6633_vm2, %v6632_v9 }
  0xd2   :  { %5586 = vmatmul.mubr.msk.f32.gmra.mrb[18].mxu1 %vm529_vm7, %v6924_v56 }
 0x115   :  { %v242_v57 = vpop.f32.mrb[0].mxu0 }
 0x116   :  { %v251_v59 = vrot.slane %v242_v57, %v189_v20  ;;  %v5522_v60 = vpop.f32.mrb[1].mxu0  ;;  %v292_v61 = vpop.f32.mrb[0].mxu1  ;;  %v6371_v57 = vld [vmem:[%s6720_s20 + $0x28] sm:$0xff]  }
 0x117   :  { %v245_v63 = vpop.f32.mrb[2].mxu0  ;;  %v5528_v0 = vpop.f32.mrb[1].mxu1  ;;  %v6372_v60 = vld [vmem:[%s6720_s20 + $0x30] sm:$0xff]  }
 0x118   :  { %v293_v1 = vadd.f32 %v292_v61, %v251_v59  ;;  %v5523_v2 = vpop.f32.mrb[3].mxu0  ;;  %v295_v4 = vpop.f32.mrb[2].mxu1 }
 0x119   :  { %v296_v5 = vadd.f32 %v295_v4, %v251_v59  ;;  %v5529_v6 = vpop.f32.mrb[3].mxu1  ;;  %v6373_v2 = vld [vmem:[%s6720_s20 + $0x38] sm:$0xff]   ;;  %v6955_v4 = vld [vmem:[%s7479_s9] sm:$0xff] }
 0x11a   :  { %vm971_vm14 = vcmp.gt.f32.partialorder %v6955_v4, 0.5 }
 0x11d   :  { %v341_v7 = vpop.f32.mrb[4].mxu0 }
 0x11e   :  { %v348_v8 = vadd.f32 %v341_v7, %v293_v1  ;;  %v5534_v11 = vpop.f32.mrb[5].mxu0  ;;  %v394_v12 = vpop.f32.mrb[4].mxu1 }
 0x11f   :  { %v344_v14 = vpop.f32.mrb[6].mxu0  ;;  %v5540_v16 = vpop.f32.mrb[5].mxu1  ;;  %v6375_v11 = vld [vmem:[%s7480_s13 + $0x8] sm:$0xff]  }
 0x120   :  { %v349_v18 = vadd.f32 %v344_v14, %v296_v5  ;;  %v401_v19 = vadd.f32 %v394_v12, %v348_v8  ;;  %v397_v20 = vpop.f32.mrb[6].mxu1  ;;  %v5535_v21 = vpop.f32.mrb[7].mxu0  ;;  %v6958_v5 = vld [vmem:[%s7479_s9 + $0x8] sm:$0xf]  ;;  %v6374_v8 = vld [vmem:[%s7480_s13] sm:$0xff]   ;;  %v6376_v12 = vld [vmem:[%s7480_s13 + $0x10] sm:$0xff]  }
 0x121   :  { %v5541_v22 = vpop.f32.mrb[7].mxu1  ;;  %vm972_vm15 = vcmp.gt.f32.partialorder %v6958_v5, 0.5  ;;  %v6378_v14 = vld [vmem:[%s7480_s13 + $0x20] sm:$0xff]   ;;  %v6380_v16 = vld [vmem:[%s7480_s13 + $0x30] sm:$0xff]  }
 0x122   :  { %v410_v23 = vadd.f32 %v4908_v15, %v401_v19  ;;  %v402_v24 = vadd.f32 %v397_v20, %v349_v18  ;;  %v6987_v18 = vld [vmem:[%s7481_s17] sm:$0xff]  }
 0x124   :  { %v412_v25 = vmax.f32 %v410_v23, 0.0  ;;  %v411_v26 = vadd.f32 %v4908_v15, %v402_v24  ;;  %v6379_v15 = vld [vmem:[%s7480_s13 + $0x28] sm:$0xff]   ;;  %v4930_v24 = vld [vmem:[%s7482_s21] ss:$0 sm:$0xff] }
 0x126   :  { %v413_v27 = vmax.f32 %v411_v26, 0.0 }
 0x128   :  { %v414_v29 = vpack.c.bf16 %v413_v27, %v412_v25 }
 0x12a   :  { %5559 = vmatmul.mubr.bf16.vlgmr.msra.gmra.mrb[8].mxu0 %v414_v29 }
 0x12b   :  { %5595 = vmatpush3.bf16.msra.mxu0 %v782_v17  ;;  %v6381_v17 = vld [vmem:[%s7480_s13 + $0x38] sm:$0xff]  }
 0x12c   :  { %6248 = vmatprep.subr.bf16.mxu0 %v6635_v34 }
 0x190   :  { %v609_v30 = vpop.f32.mrb[8].mxu1 }
 0x191   :  { %v5568_v10 = vpop.f32.mrb[9].mxu1 }
 0x195   :  { %v614_v31 = vpop.f32.mrb[10].mxu1 }
 0x196   :  { %v715_v32 = vpack.c.bf16 %v614_v31, %v609_v30  ;;  %v5571_v33 = vpop.f32.mrb[11].mxu1 }
 0x198   :  { %5590 = vmatprep.mubr.msk.bf16.mxu1 %vm197_vm3, %v715_v32 }
 0x199   :  { %v619_v36 = vpop.f32.mrb[12].mxu1 }
 0x19a   :  { %v716_v37 = vpack.c.bf16 %v619_v36, %v619_v36  ;;  %v5574_v38 = vpop.f32.mrb[13].mxu1 }
 0x19c   :  { %5591 = vmatmul.mubr.msk.bf16.vlgmr.msra.gmra.mrb[20].mxu1 %vm197_vm3, %v716_v37 }
 0x19d   :  { %v698_v40 = vpop.f32.mrb[14].mxu1  ;;  %5601 = vmatpush3.bf16.msra.mxu1 %v6366_v35 }
 0x19e   :  { %v5581_v41 = vpop.f32.mrb[15].mxu1  ;;  %5602 = vmatprep.subr.bf16.mxu1 %v6367_v39 }
 0x19f   :  { %v6385_v41 = vld [vmem:[%s7483_s29 + $0x8] sm:$0xff]  }
 0x1a1   :  { %v703_v42 = vpop.f32.mrb[16].mxu1  ;;  %5603 = vmatpush3.bf16.msra.mxu1 %v6367_v39 }
 0x1a2   :  { %v712_v43 = vpack.c.bf16 %v703_v42, %v698_v40  ;;  %v5584_v44 = vpop.f32.mrb[17].mxu1  ;;  %5604 = vmatprep.subr.bf16.mxu1 %v6368_v51  ;;  %v6383_v40 = vld [vmem:[%s7483_s29] sm:$0xff]   ;;  %v6387_v42 = vld [vmem:[%s7483_s29 + $0x10] sm:$0xff]  }
 0x1a3   :  { %v6391_v44 = vld [vmem:[%s7483_s29 + $0x20] sm:$0xff]  }
 0x1a4   :  { %5596 = vmatprep.mubr.msk.bf16.mxu0 %vm197_vm3, %v712_v43  ;;  %v6389_v43 = vld [vmem:[%s7483_s29 + $0x18] sm:$0xff]  }
 0x1a5   :  { %v708_v45 = vpop.f32.mrb[18].mxu1  ;;  %5605 = vmatpush3.bf16.msra.mxu1 %v6368_v51  ;;  %v6395_v51 = vld [vmem:[%s7483_s29 + $0x30] sm:$0xff]  }
 0x1a6   :  { %v713_v47 = vpack.c.bf16 %v708_v45, %v708_v45  ;;  %v5587_v48 = vpop.f32.mrb[19].mxu1  ;;  %5606 = vmatprep.subr.bf16.mxu1 %v6369_v52  ;;  %v6393_v45 = vld [vmem:[%s7483_s29 + $0x28] sm:$0xff]  }
 0x1a8   :  { %5597 = vmatmul.mubr.msk.bf16.vlgmr.msra.gmra.mrb[12].mxu0 %vm197_vm3, %v713_v47 }
 0x1a9   :  { %5637 = vmatprep.mubr.msk.f32.mxu0 %vm6633_vm2, %v6632_v9  ;;  %5607 = vmatpush3.bf16.msra.mxu1 %v6369_v52 }
 0x1aa   :  { %5608 = vmatprep.subr.bf16.mxu1 %v6370_v54 }
 0x1ad   :  { %5609 = vmatpush3.bf16.msra.mxu1 %v6370_v54 }
 0x1ae   :  { %5610 = vmatprep.subr.bf16.mxu1 %v6371_v57 }
 0x1b1   :  { %5611 = vmatpush3.bf16.msra.mxu1 %v6371_v57 }
 0x1b2   :  { %5612 = vmatprep.subr.bf16.mxu1 %v6372_v60 }
 0x1b5   :  { %5613 = vmatpush3.bf16.msra.mxu1 %v6372_v60 }
 0x1b6   :  { %5614 = vmatprep.subr.bf16.mxu1 %v6373_v2 }
 0x1b9   :  { %5615 = vmatpush3.bf16.msra.mxu1 %v6373_v2  ;;  %v6390_v2 = vld [vmem:[%s7481_s17 + $0x20] sm:$0xff]  }
 0x1ba   :  { %6244 = vmatprep.subr.bf16.mxu1 %v6635_v34 }
 0x1fd   :  { %v520_v59 = vpop.f32.mrb[8].mxu0 }
 0x1fe   :  { %v6950_v61 = vadd.f32 %v4909_v58, %v520_v59  ;;  %v5560_v62 = vpop.f32.mrb[9].mxu0 }
 0x1ff   :  { %v523_v63 = vpop.f32.mrb[10].mxu0 }
 0x200   :  { %v524_v0 = vadd.f32 %v4909_v58, %v523_v63  ;;  %v5561_v1 = vpop.f32.mrb[11].mxu0  ;;  %v6397_v58 = vld [vmem:[%s7483_s29 + $0x38] sm:$0xff]   ;;  %v6384_v63 = vld [vmem:[%s7481_s17 + $0x8] sm:$0xff]  }
 0x201   :  { %v6388_v1 = vld [vmem:[%s7481_s17 + $0x18] sm:$0xff]  }
 0x202   :  { %528 = vst [vmem:[#allocation2 + $0x8] sm:$0xf] %v524_v0  ;;  %v6386_v0 = vld [vmem:[%s7481_s17 + $0x10] sm:$0xff]  }
 0x209   :  { %v6962_v6 = vld [vmem:[#allocation2 + $0x8] sm:$0xf] }
 0x20a   :  { %v6245_v7 = vpack.c.bf16 %v6962_v6, %v6950_v61 }
 0x20c   :  { %6251 = vmatpush3.bf16.msk.msra.mxu0 %vm6846_vm6, %v6245_v7 }
 0x20d   :  { %5646 = vmatprep.subr.bf16.mxu0 %v6374_v8 }
 0x20f   :  { %5638 = vmatmul.mubr.msk.f32.vlgmr.msra.gmra.mrb[16].mxu0 %vm529_vm7, %v6910_v53 }
 0x210   :  { %5640 = vmatprep.mubr.msk.f32.mxu0 %vm6633_vm2, %v6632_v9  ;;  %5647 = vmatpush3.bf16.msra.mxu0 %v6374_v8  ;;  %v6394_v8 = vld [vmem:[%s7481_s17 + $0x30] sm:$0xff]  }
 0x211   :  { %5648 = vmatprep.subr.bf16.mxu0 %v6375_v11 }
 0x213   :  { %5641 = vmatmul.mubr.msk.f32.gmra.mrb[18].mxu0 %vm529_vm7, %v6917_v55 }
 0x214   :  { %5643 = vmatprep.mubr.msk.f32.mxu0 %vm6633_vm2, %v6632_v9  ;;  %5649 = vmatpush3.bf16.msra.mxu0 %v6375_v11  ;;  %v6396_v11 = vld [vmem:[%s7481_s17 + $0x38] sm:$0xff]  }
 0x215   :  { %5650 = vmatprep.subr.bf16.mxu0 %v6376_v12 }
 0x217   :  { %5644 = vmatmul.mubr.msk.f32.gmra.mrb[20].mxu0 %vm529_vm7, %v6924_v56 }
 0x218   :  { %5651 = vmatpush3.bf16.msra.mxu0 %v6376_v12  ;;  %v6398_v12 = vld [vmem:[%s7484_s3] sm:$0xff]  }
 0x219   :  { %5652 = vmatprep.subr.bf16.mxu0 %v6377_v13 }
 0x21c   :  { %5653 = vmatpush3.bf16.msra.mxu0 %v6377_v13  ;;  %v4931_v13 = vld [vmem:[%s7485_s8] ss:$0 sm:$0xff] }
 0x21d   :  { %5654 = vmatprep.subr.bf16.mxu0 %v6378_v14 }
 0x220   :  { %5655 = vmatpush3.bf16.msra.mxu0 %v6378_v14 }
 0x221   :  { %5656 = vmatprep.subr.bf16.mxu0 %v6379_v15 }
 0x224   :  { %5657 = vmatpush3.bf16.msra.mxu0 %v6379_v15 }
 0x225   :  { %5658 = vmatprep.subr.bf16.mxu0 %v6380_v16 }
 0x228   :  { %5659 = vmatpush3.bf16.msra.mxu0 %v6380_v16 }
 0x229   :  { %5660 = vmatprep.subr.bf16.mxu0 %v6381_v17 }
 0x22c   :  { %5661 = vmatpush3.bf16.msra.mxu0 %v6381_v17 }
 0x22d   :  { %5686 = vmatprep.subr.bf16.mxu0 %v6987_v18 }
 0x26f   :  { %v5592_v19 = vpop.f32.mrb[20].mxu1 }
 0x270   :  { %v761_v20 = vpop.f32.mrb[21].mxu1 }
 0x271   :  { %v5593_v21 = vpop.f32.mrb[22].mxu1 }
 0x272   :  { %v764_v22 = vpop.f32.mrb[23].mxu1 }
 0x27b   :  { %v5598_v23 = vpop.f32.mrb[12].mxu0 }
 0x27c   :  { %v827_v25 = vadd.f32 %v5598_v23, %v5592_v19  ;;  %v818_v26 = vpop.f32.mrb[13].mxu0 }
 0x27d   :  { %v819_v27 = vadd.f32 %v818_v26, %v761_v20  ;;  %v5599_v29 = vpop.f32.mrb[14].mxu0 }
 0x27e   :  { %v841_v30 = vadd.f32 %v4930_v24, %v827_v25  ;;  %v821_v10 = vpop.f32.mrb[15].mxu0 }
 0x27f   :  { %v839_v31 = vadd.f32 %v4930_v24, %v819_v27  ;;  %v822_v32 = vadd.f32 %v821_v10, %v764_v22 }
 0x280   :  { %v844_v35 = vmax.f32 %v841_v30, 0.0 }
 0x281   :  { %v840_v33 = vadd.f32 %v4930_v24, %v822_v32  ;;  %v842_v36 = vmax.f32 %v839_v31, 0.0  ;;  %v6399_v31 = vld [vmem:[%s7484_s3 + $0x8] sm:$0xff]   ;;  %v6400_v32 = vld [vmem:[%s7484_s3 + $0x10] sm:$0xff]  }
 0x282   :  { %v846_v39 = vpack.c.bf16 %v844_v35, %v844_v35  ;;  %v6402_v35 = vld [vmem:[%s7484_s3 + $0x20] sm:$0xff]  }
 0x283   :  { %v843_v37 = vmax.f32 %v840_v33, 0.0  ;;  %v6401_v33 = vld [vmem:[%s7484_s3 + $0x18] sm:$0xff]  }
 0x285   :  { %v845_v38 = vpack.c.bf16 %v843_v37, %v842_v36 }
 0x287   :  { %5616 = vmatprep.mubr.bf16.mxu1 %v845_v38 }
 0x288   :  { %5617 = vmatmul.mubr.bf16.vlgmr.msra.gmra.mrb[24].mxu1 %v846_v39 }
 0x289   :  { %6247 = vmatpush3.bf16.msk.msra.mxu1 %vm6846_vm6, %v6245_v7  ;;  %5624 = vmatprep.mubr.msk.f32.mxu1 %vm6633_vm2, %v6632_v9  ;;  %v6392_v7 = vld [vmem:[%s7481_s17 + $0x28] sm:$0xff]  }
 0x28a   :  { %5666 = vmatprep.subr.bf16.mxu1 %v6383_v40 }
 0x290   :  { %5625 = vmatmul.mubr.msk.f32.vlgmr.msra.gmra.mrb[28].mxu1 %vm529_vm7, %v6886_v46 }
 0x291   :  { %5627 = vmatprep.mubr.msk.f32.mxu1 %vm6633_vm2, %v6632_v9  ;;  %5667 = vmatpush3.bf16.msra.mxu1 %v6383_v40  ;;  %v6403_v40 = vld [vmem:[%s7484_s3 + $0x28] sm:$0xff]  }
 0x292   :  { %5668 = vmatprep.subr.bf16.mxu1 %v6385_v41 }
 0x294   :  { %5628 = vmatmul.mubr.msk.f32.gmra.mrb[30].mxu1 %vm529_vm7, %v6896_v49 }
 0x295   :  { %5630 = vmatprep.mubr.msk.f32.mxu1 %vm6633_vm2, %v6632_v9  ;;  %5669 = vmatpush3.bf16.msra.mxu1 %v6385_v41  ;;  %v6404_v41 = vld [vmem:[%s7484_s3 + $0x30] sm:$0xff]  }
 0x296   :  { %5670 = vmatprep.subr.bf16.mxu1 %v6387_v42 }
 0x298   :  { %5631 = vmatmul.mubr.msk.f32.gmra.mrb[32].mxu1 %vm529_vm7, %v6901_v50 }
 0x299   :  { %5671 = vmatpush3.bf16.msra.mxu1 %v6387_v42  ;;  %v6405_v42 = vld [vmem:[%s7484_s3 + $0x38] sm:$0xff]  }
 0x29a   :  { %5672 = vmatprep.subr.bf16.mxu1 %v6389_v43 }
 0x29d   :  { %5673 = vmatpush3.bf16.msra.mxu1 %v6389_v43 }
 0x29e   :  { %5674 = vmatprep.subr.bf16.mxu1 %v6391_v44 }
 0x2a1   :  { %5675 = vmatpush3.bf16.msra.mxu1 %v6391_v44 }
 0x2a2   :  { %5676 = vmatprep.subr.bf16.mxu1 %v6393_v45 }
 0x2a5   :  { %5677 = vmatpush3.bf16.msra.mxu1 %v6393_v45 }
 0x2a6   :  { %5678 = vmatprep.subr.bf16.mxu1 %v6395_v51 }
 0x2a9   :  { %5679 = vmatpush3.bf16.msra.mxu1 %v6395_v51 }
 0x2aa   :  { %5680 = vmatprep.subr.bf16.mxu1 %v6397_v58 }
 0x2ad   :  { %5681 = vmatpush3.bf16.msra.mxu1 %v6397_v58 }
 0x2ae   :  { %5706 = vmatprep.subr.bf16.mxu1 %v6398_v12 }
 0x2e2   :  { %v1127_v47 = vpop.f32.mrb[16].mxu0 }
 0x2e3   :  { %v5639_v48 = vpop.f32.mrb[17].mxu0 }
 0x2e6   :  { %v1132_v52 = vpop.f32.mrb[18].mxu0 }
 0x2e7   :  { %v1159_v54 = vpack.c.bf16 %v1132_v52, %v1127_v47  ;;  %v5642_v57 = vpop.f32.mrb[19].mxu0 }
 0x2e9   :  { %5662 = vmatprep.mubr.bf16.mxu0 %v1159_v54  ;;  %v4972_v54 = vld [vmem:[%s7486_s14] ss:$0 sm:$0xff] }
 0x2ea   :  { %v1137_v59 = vpop.f32.mrb[20].mxu0 }
 0x2eb   :  { %v1160_v60 = vpack.c.bf16 %v1137_v59, %v1137_v59  ;;  %v5645_v62 = vpop.f32.mrb[21].mxu0 }
 0x2ed   :  { %5663 = vmatmul.mubr.bf16.vlgmr.msra.gmra.mrb[24].mxu0 %v1160_v60 }
 0x2ee   :  { %5687 = vmatpush3.bf16.msra.mxu0 %v6987_v18 }
 0x2ef   :  { %5688 = vmatprep.subr.bf16.mxu0 %v6384_v63 }
 0x2f2   :  { %5689 = vmatpush3.bf16.msra.mxu0 %v6384_v63 }
 0x2f3   :  { %5690 = vmatprep.subr.bf16.mxu0 %v6386_v0 }
 0x2f6   :  { %5691 = vmatpush3.bf16.msra.mxu0 %v6386_v0 }
 0x2f7   :  { %5692 = vmatprep.subr.bf16.mxu0 %v6388_v1 }
 0x2fa   :  { %5693 = vmatpush3.bf16.msra.mxu0 %v6388_v1 }
 0x2fb   :  { %5694 = vmatprep.subr.bf16.mxu0 %v6390_v2 }
 0x2fe   :  { %5695 = vmatpush3.bf16.msra.mxu0 %v6390_v2 }
 0x2ff   :  { %5696 = vmatprep.subr.bf16.mxu0 %v6392_v7 }
 0x302   :  { %5697 = vmatpush3.bf16.msra.mxu0 %v6392_v7 }
 0x303   :  { %5698 = vmatprep.subr.bf16.mxu0 %v6394_v8 }
 0x306   :  { %5699 = vmatpush3.bf16.msra.mxu0 %v6394_v8 }
 0x307   :  { %5700 = vmatprep.subr.bf16.mxu0 %v6396_v11 }
 0x30a   :  { %5701 = vmatpush3.bf16.msra.mxu0 %v6396_v11 }
 0x35b   :  { %v5618_v14 = vpop.f32.mrb[24].mxu1 }
 0x35c   :  { %v7023_v15 = vadd.f32 %v5618_v14, %v4931_v13  ;;  %v952_v16 = vpop.f32.mrb[25].mxu1 }
 0x35d   :  { %v7025_v17 = vadd.f32 %v4931_v13, %v952_v16  ;;  %v5619_v18 = vpop.f32.mrb[26].mxu1  ;;  %v6636_v16 = vmov -inf  }
 0x35e   :  { %v955_v19 = vpop.f32.mrb[27].mxu1  ;;  %v1370_v22 = vpack.c.bf16 %v7023_v15, %v7023_v15  ;;  %1623 = vst [vmem:[#allocation5] sm:$0xff] %v6636_v16  ;;  %1624 = vst [vmem:[#allocation5 + $0x8] sm:$0xf] %v6636_v16  ;;  %v4973_v18 = vld [vmem:[%s7487_s19] ss:$0 sm:$0xff] }
 0x35f   :  { %v7027_v20 = vadd.f32 %v4931_v13, %v955_v19 }
 0x361   :  { %v1369_v21 = vpack.c.bf16 %v7027_v20, %v7025_v17 }
 0x363   :  { %v1047_v23 = vpop.f32.mrb[28].mxu1  ;;  %5702 = vmatprep.mubr.bf16.mxu0 %v1369_v21 }
 0x364   :  { %v5626_v24 = vpop.f32.mrb[29].mxu1  ;;  %5703 = vmatmul.mubr.bf16.vlgmr.msra.gmra.mrb[28].mxu0 %v1370_v22 }
 0x367   :  { %v1052_v25 = vpop.f32.mrb[30].mxu1 }
 0x368   :  { %v1141_v26 = vpack.c.bf16 %v1052_v25, %v1047_v23  ;;  %v5629_v27 = vpop.f32.mrb[31].mxu1 }
 0x36a   :  { %5682 = vmatprep.mubr.bf16.mxu1 %v1141_v26 }
 0x36b   :  { %v1057_v29 = vpop.f32.mrb[32].mxu1 }
 0x36c   :  { %v1142_v30 = vpack.c.bf16 %v1057_v29, %v1057_v29  ;;  %v5632_v10 = vpop.f32.mrb[33].mxu1 }
 0x36e   :  { %5683 = vmatmul.mubr.bf16.vlgmr.msra.gmra.mrb[36].mxu1 %v1142_v30 }
 0x36f   :  { %5707 = vmatpush3.bf16.msra.mxu1 %v6398_v12 }
 0x370   :  { %5708 = vmatprep.subr.bf16.mxu1 %v6399_v31 }
 0x373   :  { %5709 = vmatpush3.bf16.msra.mxu1 %v6399_v31 }
 0x374   :  { %5710 = vmatprep.subr.bf16.mxu1 %v6400_v32 }
 0x377   :  { %5711 = vmatpush3.bf16.msra.mxu1 %v6400_v32 }
 0x378   :  { %5712 = vmatprep.subr.bf16.mxu1 %v6401_v33 }
 0x37b   :  { %5713 = vmatpush3.bf16.msra.mxu1 %v6401_v33 }
 0x37c   :  { %5714 = vmatprep.subr.bf16.mxu1 %v6402_v35 }
 0x37f   :  { %5715 = vmatpush3.bf16.msra.mxu1 %v6402_v35 }
 0x380   :  { %5716 = vmatprep.subr.bf16.mxu1 %v6403_v40 }
 0x383   :  { %5717 = vmatpush3.bf16.msra.mxu1 %v6403_v40 }
 0x384   :  { %5718 = vmatprep.subr.bf16.mxu1 %v6404_v41 }
 0x387   :  { %5719 = vmatpush3.bf16.msra.mxu1 %v6404_v41 }
 0x388   :  { %5720 = vmatprep.subr.bf16.mxu1 %v6405_v42 }
 0x38b   :  { %5721 = vmatpush3.bf16.msra.mxu1 %v6405_v42 }
 0x3c0   :  { %v5664_v36 = vpop.f32.mrb[24].mxu0 }
 0x3c1   :  { %v1259_v37 = vpop.f32.mrb[25].mxu0 }
 0x3c2   :  { %v5665_v38 = vpop.f32.mrb[26].mxu0 }
 0x3c3   :  { %v1262_v39 = vpop.f32.mrb[27].mxu0 }
 0x437   :  { %v5704_v43 = vpop.f32.mrb[28].mxu0 }
 0x438   :  { %v1469_v44 = vpop.f32.mrb[29].mxu0 }
 0x439   :  { %v5705_v45 = vpop.f32.mrb[30].mxu0 }
 0x43a   :  { %v1472_v47 = vpop.f32.mrb[31].mxu0 }
 0x441   :  { %v5684_v48 = vpop.f32.mrb[36].mxu1 }
 0x442   :  { %v1364_v51 = vadd.f32 %v5684_v48, %v5664_v36  ;;  %v1355_v52 = vpop.f32.mrb[37].mxu1 }
 0x443   :  { %v1356_v57 = vadd.f32 %v1355_v52, %v1259_v37  ;;  %v5685_v58 = vpop.f32.mrb[38].mxu1 }
 0x444   :  { %v1485_v59 = vadd.f32 %v5704_v43, %v1364_v51  ;;  %v1358_v60 = vpop.f32.mrb[39].mxu1 }
 0x445   :  { %v1483_v62 = vadd.f32 %v1469_v44, %v1356_v57  ;;  %v1359_v63 = vadd.f32 %v1358_v60, %v1262_v39 }
 0x446   :  { %v1495_v0 = vadd.f32 %v4972_v54, %v1485_v59 }
 0x447   :  { %v1493_v1 = vadd.f32 %v4972_v54, %v1483_v62  ;;  %v1484_v2 = vadd.f32 %v1472_v47, %v1359_v63 }
 0x448   :  { %v1498_v8 = vmax.f32 %v1495_v0, 0.0 }
 0x449   :  { %v1494_v7 = vadd.f32 %v4972_v54, %v1484_v2  ;;  %v1496_v11 = vmax.f32 %v1493_v1, 0.0 }
 0x44a   :  { %v1500_v14 = vpack.c.bf16 %v1498_v8, %v1498_v8 }
 0x44b   :  { %v1497_v12 = vmax.f32 %v1494_v7, 0.0 }
 0x44d   :  { %v1499_v13 = vpack.c.bf16 %v1497_v12, %v1496_v11 }
 0x44f   :  { %5722 = vmatprep.mubr.bf16.mxu1 %v1499_v13 }
 0x450   :  { %5723 = vmatmul.mubr.bf16.vlgmr.msra.gmra.mrb[40].mxu1 %v1500_v14 }
 0x523   :  { %v5724_v19 = vpop.f32.mrb[40].mxu1 }
 0x524   :  { %v1615_v21 = vadd.f32 %v5724_v19, %v4973_v18  ;;  %v1606_v22 = vpop.f32.mrb[41].mxu1 }
 0x525   :  { %v1607_v23 = vadd.f32 %v4973_v18, %v1606_v22  ;;  %v5725_v24 = vpop.f32.mrb[42].mxu1 }
 0x526   :  { %1622 = vst [vmem:[#allocation4 + $0x10] sm:$0xff] %v1615_v21  ;;  %v1609_v25 = vpop.f32.mrb[43].mxu1 }
 0x527   :  { %1620 = vst [vmem:[#allocation4] sm:$0xff] %v1607_v23  ;;  %v1610_v26 = vadd.f32 %v4973_v18, %v1609_v25 }
 0x529   :  { %1621 = vst [vmem:[#allocation4 + $0x8] sm:$0xff] %v1610_v26 }
 0x52a LB: > { %s1631_s6 = sld [smem:[#allocation7 + %s6587_s24]]  ;;  %s1634_s12 = scalar_lea.vmem [#allocation4], %s6587_s24  ;;  %s6587_s24 = sphi %s6585_s24, %s1630_s24  }
 0x52b   : > { %s1630_s24 = sadd.s32 1, %s6587_s24  }
 0x52c   : > { %p1627_p5 = scmp.ge.s32.totalorder %s1630_s24, 24  }
 0x52d   :  { %6406 = vset.pattern.permute.xlu0 (%p1627_p5), %v6630_v3  ;;  %v1640_v10 = vsel (%p1627_p5), %vm971_vm14, 1, %v6630_v3  ;;  %v1641_v31 = vsel (%p1627_p5), %vm972_vm15, 1, %v6630_v3  ;;  %6252 = vmatprep.subr.bf16.mxu0 (%p1627_p5), %v6635_v34  ;;  %s7488_s25 = sld [smem:[#allocation20_spill]] (%p1627_p5)  ;;  %s7489_s7 = sld [smem:[#allocation21_spill]] (%p1627_p5) }
 0x52e   :  { %1629 = sbr.rel (!%p1627_p5) target bundleno = 1322 (0x52a), region = 200  ;;  %1643 = vperm.xlu0 (%p1627_p5), %6406, %v1640_v10   ;;  %6256 = vmatprep.subr.bf16.mxu1 (%p1627_p5), %v6635_v34  ;;  %s7490_s11 = sld [smem:[#allocation22_spill]] (%p1627_p5) }
 0x52f   :  { %5730 = vmatprep.mubr.msk.f32.mxu0 (%p1627_p5), %vm6633_vm2, %v6632_v9  ;;  %5743 = vmatprep.mubr.msk.f32.mxu1 (%p1627_p5), %vm6633_vm2, %v6632_v9  ;;  %s7491_s30 = sld [smem:[#allocation15_spill]] (%p1627_p5)  ;;  %s7492_s15 = sld [smem:[#allocation14_spill]] (%p1627_p5) }
 0x530   : > { %v1635_v27 = vld [vmem:[%s1634_s12] sm:$0x1]  ;;  %s1632_s20 = scalar_lea.vmem [#allocation5], %s1631_s6  ;;  %s7493_s18 = sld [smem:[#allocation16_spill]] (%p1627_p5) }
 0x531   : > { %v1633_v29 = vld [vmem:[%s1632_s20] sm:$0x1]  ;;  %s7494_s27 = sld [smem:[#allocation23_spill]] (%p1627_p5)  ;;  %s7495_s22 = sld [smem:[#allocation17_spill]] (%p1627_p5) }
 0x532   : > { %v1636_v30 = vmax.f32 %v1633_v29, %v1635_v27  ;;  %1646 = vperm.xlu0 (%p1627_p5), %6406, %v1641_v31   ;;  %s7496_s26 = sld [smem:[#allocation24_spill]] (%p1627_p5)  ;;  %s7497_s10 = sld [smem:[#allocation18_spill]] (%p1627_p5) }
 0x533   :  { %v6407_v38 = vld [vmem:[%s7488_s25] sm:$0xff] (%p1627_p5)   ;;  %v6410_v41 = vld [vmem:[%s7489_s7 + $0x8] sm:$0xff] (%p1627_p5)   ;;  %v6412_v42 = vld [vmem:[%s7489_s7 + $0x10] sm:$0xff] (%p1627_p5)   ;;  %s7498_s28 = sld [smem:[#allocation19_spill]] (%p1627_p5)  ;;  %s6589_s2 = smov (%p1627_p5), 0  }
 0x534   : > { %1637 = vst [vmem:[%s1632_s20] sm:$0x1] %v1636_v30  ;;  %v6408_v39 = vld [vmem:[%s7489_s7] sm:$0xff] (%p1627_p5)   ;;  %v6413_v43 = vld [vmem:[%s7488_s25 + $0x18] sm:$0xff] (%p1627_p5)   ;;  %v6417_v48 = vld [vmem:[%s7488_s25 + $0x28] sm:$0xff] (%p1627_p5)  }
 0x535   :  { %v6414_v44 = vld [vmem:[%s7489_s7 + $0x18] sm:$0xff]   ;;  %v6415_v45 = vld [vmem:[%s7488_s25 + $0x20] sm:$0xff]   ;;  %v6418_v51 = vld [vmem:[%s7489_s7 + $0x28] sm:$0xff]  }
 0x536   :  { %v6416_v47 = vld [vmem:[%s7489_s7 + $0x20] sm:$0xff]   ;;  %v6419_v52 = vld [vmem:[%s7488_s25 + $0x30] sm:$0xff]   ;;  %v6421_v57 = vld [vmem:[%s7488_s25 + $0x38] sm:$0xff]  }
 0x537   :  { %v6420_v54 = vld [vmem:[%s7489_s7 + $0x30] sm:$0xff]   ;;  %v6422_v58 = vld [vmem:[%s7489_s7 + $0x38] sm:$0xff]   ;;  %v6423_v59 = vld [vmem:[%s7490_s11] sm:$0xff]  }
 0x538   :  { %v6424_v25 = vld [vmem:[%s7490_s11 + $0x8] sm:$0xff]   ;;  %v6425_v26 = vld [vmem:[%s7490_s11 + $0x10] sm:$0xff]   ;;  %v6426_v27 = vld [vmem:[%s7490_s11 + $0x18] sm:$0xff]  }
 0x539   :  { %v6427_v29 = vld [vmem:[%s7490_s11 + $0x20] sm:$0xff]   ;;  %v6428_v30 = vld [vmem:[%s7490_s11 + $0x28] sm:$0xff]   ;;  %v6429_v10 = vld [vmem:[%s7490_s11 + $0x30] sm:$0xff]  }
 0x53a   :  { %v6430_v31 = vld [vmem:[%s7490_s11 + $0x38] sm:$0xff]  }
 0x53b   :  { %v1638_v32 = vld [vmem:[#allocation5] sm:$0xff]  ;;  %v1639_v4 = vld [vmem:[#allocation5 + $0x8] sm:$0xf] }
 0x53c   :  { %2837 = vst [vmem:[#allocation5] sm:$0xff] %v6636_v16  ;;  %2838 = vst [vmem:[#allocation5 + $0x8] sm:$0xf] %v6636_v16 }
 0x5ad   :  { %v7059_v3 = vpop.permute.xlu0 %1643 }
 0x5ae   :  { %vm1648_vm0 = vcmp.eq.s32.totalorder %v7059_v3, 1 }
 0x5af   :  { %v1650_v5 = vsel %vm1648_vm0, %v1638_v32, 0.0  ;;  %v6431_v32 = vld [vmem:[%s7491_s30] sm:$0xff]  }
 0x5b0   :  { %v7065_v33 = vmax.f32 %v6950_v61, %v1650_v5  ;;  %v6409_v61 = vld [vmem:[%s7488_s25 + $0x8] sm:$0xff]  }
 0x5b1   :  { %v7067_v35 = vpop.permute.xlu0 %1646  ;;  %v6433_v5 = vld [vmem:[%s7491_s30 + $0x8] sm:$0xff]  }
 0x5b2   :  { %vm1649_vm1 = vcmp.eq.s32.totalorder %v7067_v35, 1 }
 0x5b3   :  { %v1651_v36 = vsel %vm1649_vm1, %v1639_v4, 0.0  ;;  %v6432_v4 = vld [vmem:[%s7492_s15] sm:$0xff]  }
 0x5b4   :  { %v1653_v37 = vmax.f32 %v6962_v6, %v1651_v36  ;;  %v6411_v6 = vld [vmem:[%s7488_s25 + $0x10] sm:$0xff]  }
 0x5b5   :  { %v6435_v36 = vld [vmem:[%s7491_s30 + $0x10] sm:$0xff]  }
 0x5b6   :  { %1655 = vst [vmem:[#allocation2 + $0x8] sm:$0xf] %v1653_v37  ;;  %v6253_v40 = vpack.c.bf16 %v1653_v37, %v7065_v33  ;;  %v6437_v37 = vld [vmem:[%s7491_s30 + $0x18] sm:$0xff]  }
 0x5b8   :  { %6255 = vmatpush3.bf16.msk.msra.mxu0 %vm6846_vm6, %v6253_v40  ;;  %6259 = vmatpush3.bf16.msk.msra.mxu1 %vm6846_vm6, %v6253_v40  ;;  %v6443_v40 = vld [vmem:[%s7491_s30 + $0x30] sm:$0xff]  }
 0x5b9   :  { %5772 = vmatprep.subr.bf16.mxu1 %v6407_v38  ;;  %5752 = vmatprep.subr.bf16.mxu0 %v6408_v39 }
 0x5bb   :  { %5731 = vmatmul.mubr.msk.f32.vlgmr.msra.gmra.mrb[22].mxu0 %vm529_vm7, %v6886_v46  ;;  %5744 = vmatmul.mubr.msk.f32.vlgmr.msra.gmra.mrb[34].mxu1 %vm529_vm7, %v6910_v53 }
 0x5bc   :  { %5733 = vmatprep.mubr.msk.f32.mxu0 %vm6633_vm2, %v6632_v9  ;;  %5746 = vmatprep.mubr.msk.f32.mxu1 %vm6633_vm2, %v6632_v9 }
 0x5bd   :  { %5773 = vmatpush3.bf16.msra.mxu1 %v6407_v38  ;;  %5753 = vmatpush3.bf16.msra.mxu0 %v6408_v39  ;;  %v7116_v13 = vld [vmem:[#allocation2 + $0x8] sm:$0xf]  ;;  %v6439_v38 = vld [vmem:[%s7491_s30 + $0x20] sm:$0xff]  }
 0x5be   :  { %5774 = vmatprep.subr.bf16.mxu1 %v6409_v61  ;;  %5754 = vmatprep.subr.bf16.mxu0 %v6410_v41  ;;  %v6261_v24 = vpack.c.bf16 %v7116_v13, %v7065_v33  ;;  %v6441_v39 = vld [vmem:[%s7491_s30 + $0x28] sm:$0xff]  }
 0x5bf   :  { %5734 = vmatmul.mubr.msk.f32.gmra.mrb[32].mxu0 %vm529_vm7, %v6896_v49  ;;  %5747 = vmatmul.mubr.msk.f32.gmra.mrb[44].mxu1 %vm529_vm7, %v6917_v55 }
 0x5c0   :  { %5736 = vmatprep.mubr.msk.f32.mxu0 %vm6633_vm2, %v6632_v9  ;;  %5749 = vmatprep.mubr.msk.f32.mxu1 %vm6633_vm2, %v6632_v9 }
 0x5c1   :  { %5775 = vmatpush3.bf16.msra.mxu1 %v6409_v61  ;;  %5755 = vmatpush3.bf16.msra.mxu0 %v6410_v41  ;;  %v6445_v61 = vld [vmem:[%s7491_s30 + $0x38] sm:$0xff]   ;;  %v6447_v41 = vld [vmem:[%s7493_s18] sm:$0xff]  }
 0x5c2   :  { %5776 = vmatprep.subr.bf16.mxu1 %v6411_v6  ;;  %5756 = vmatprep.subr.bf16.mxu0 %v6412_v42 }
 0x5c3   :  { %5737 = vmatmul.mubr.msk.f32.gmra.mrb[34].mxu0 %vm529_vm7, %v6901_v50  ;;  %5750 = vmatmul.mubr.msk.f32.gmra.mrb[46].mxu1 %vm529_vm7, %v6924_v56 }
 0x5c5   :  { %5777 = vmatpush3.bf16.msra.mxu1 %v6411_v6  ;;  %5757 = vmatpush3.bf16.msra.mxu0 %v6412_v42 }
 0x5c6   :  { %5778 = vmatprep.subr.bf16.mxu1 %v6413_v43  ;;  %5758 = vmatprep.subr.bf16.mxu0 %v6414_v44 }
 0x5c9   :  { %5779 = vmatpush3.bf16.msra.mxu1 %v6413_v43  ;;  %5759 = vmatpush3.bf16.msra.mxu0 %v6414_v44  ;;  %v5006_v43 = vld [vmem:[%s7494_s27] ss:$0 sm:$0xff] }
 0x5ca   :  { %5780 = vmatprep.subr.bf16.mxu1 %v6415_v45  ;;  %5760 = vmatprep.subr.bf16.mxu0 %v6416_v47 }
 0x5cd   :  { %5781 = vmatpush3.bf16.msra.mxu1 %v6415_v45  ;;  %5761 = vmatpush3.bf16.msra.mxu0 %v6416_v47 }
 0x5ce   :  { %5782 = vmatprep.subr.bf16.mxu1 %v6417_v48  ;;  %5762 = vmatprep.subr.bf16.mxu0 %v6418_v51 }
 0x5d1   :  { %5783 = vmatpush3.bf16.msra.mxu1 %v6417_v48  ;;  %5763 = vmatpush3.bf16.msra.mxu0 %v6418_v51 }
 0x5d2   :  { %5784 = vmatprep.subr.bf16.mxu1 %v6419_v52  ;;  %5764 = vmatprep.subr.bf16.mxu0 %v6420_v54 }
 0x5d5   :  { %5785 = vmatpush3.bf16.msra.mxu1 %v6419_v52  ;;  %5765 = vmatpush3.bf16.msra.mxu0 %v6420_v54 }
 0x5d6   :  { %5786 = vmatprep.subr.bf16.mxu1 %v6421_v57  ;;  %5766 = vmatprep.subr.bf16.mxu0 %v6422_v58 }
 0x5d9   :  { %5787 = vmatpush3.bf16.msra.mxu1 %v6421_v57  ;;  %5767 = vmatpush3.bf16.msra.mxu0 %v6422_v58 }
 0x5da   :  { %6260 = vmatprep.subr.bf16.mxu1 %v6635_v34  ;;  %5792 = vmatprep.subr.bf16.mxu0 %v6423_v59 }
 0x68e   :  { %v1725_v60 = vpop.f32.mrb[22].mxu0  ;;  %v1805_v62 = vpop.f32.mrb[34].mxu1 }
 0x68f   :  { %v5732_v63 = vpop.f32.mrb[23].mxu0  ;;  %v5745_v0 = vpop.f32.mrb[35].mxu1 }
 0x692   :  { %v1730_v1 = vpop.f32.mrb[32].mxu0  ;;  %v1810_v2 = vpop.f32.mrb[44].mxu1 }
 0x693   :  { %v1837_v7 = vpack.c.bf16 %v1730_v1, %v1725_v60  ;;  %v1819_v8 = vpack.c.bf16 %v1810_v2, %v1805_v62  ;;  %v5735_v11 = vpop.f32.mrb[33].mxu0  ;;  %v5748_v12 = vpop.f32.mrb[45].mxu1 }
 0x694   :  { %v6434_v12 = vld [vmem:[%s7492_s15 + $0x8] sm:$0xff]  }
 0x695   :  { %5768 = vmatprep.mubr.bf16.mxu0 %v1837_v7  ;;  %5788 = vmatprep.mubr.bf16.mxu1 %v1819_v8 }
 0x696   :  { %v1735_v14 = vpop.f32.mrb[34].mxu0  ;;  %v1815_v18 = vpop.f32.mrb[46].mxu1 }
 0x697   :  { %v1838_v19 = vpack.c.bf16 %v1735_v14, %v1735_v14  ;;  %v1820_v21 = vpack.c.bf16 %v1815_v18, %v1815_v18  ;;  %v5738_v22 = vpop.f32.mrb[35].mxu0  ;;  %v5751_v23 = vpop.f32.mrb[47].mxu1 }
 0x699   :  { %5769 = vmatmul.mubr.bf16.vlgmr.msra.gmra.mrb[36].mxu0 %v1838_v19  ;;  %5789 = vmatmul.mubr.bf16.vlgmr.msra.gmra.mrb[48].mxu1 %v1820_v21  ;;  %v6436_v21 = vld [vmem:[%s7492_s15 + $0x10] sm:$0xff]  }
 0x69a   :  { %6263 = vmatpush3.bf16.msk.msra.mxu1 %vm6846_vm6, %v6261_v24  ;;  %5816 = vmatprep.mubr.msk.f32.mxu1 %vm6633_vm2, %v6632_v9 }
 0x69b   :  { %6264 = vmatprep.subr.bf16.mxu1 %v6635_v34  ;;  %5793 = vmatpush3.bf16.msra.mxu0 %v6423_v59 }
 0x69c   :  { %5794 = vmatprep.subr.bf16.mxu0 %v6424_v25 }
 0x69f   :  { %5795 = vmatpush3.bf16.msra.mxu0 %v6424_v25 }
 0x6a0   :  { %5796 = vmatprep.subr.bf16.mxu0 %v6425_v26 }
 0x6a1   :  { %5817 = vmatmul.mubr.msk.f32.vlgmr.msra.gmra.mrb[52].mxu1 %vm529_vm7, %v6886_v46 }
 0x6a2   :  { %6267 = vmatpush3.bf16.msk.msra.mxu1 %vm6846_vm6, %v6261_v24  ;;  %5819 = vmatprep.mubr.msk.f32.mxu1 %vm6633_vm2, %v6632_v9  ;;  %v6438_v24 = vld [vmem:[%s7492_s15 + $0x18] sm:$0xff]  }
 0x6a3   :  { %5797 = vmatpush3.bf16.msra.mxu0 %v6425_v26  ;;  %5838 = vmatprep.subr.bf16.mxu1 %v6431_v32 }
 0x6a4   :  { %5798 = vmatprep.subr.bf16.mxu0 %v6426_v27 }
 0x6a5   :  { %5820 = vmatmul.mubr.msk.f32.gmra.mrb[54].mxu1 %vm529_vm7, %v6896_v49 }
 0x6a6   :  { %5822 = vmatprep.mubr.msk.f32.mxu1 %vm6633_vm2, %v6632_v9 }
 0x6a7   :  { %5799 = vmatpush3.bf16.msra.mxu0 %v6426_v27  ;;  %v6440_v27 = vld [vmem:[%s7492_s15 + $0x20] sm:$0xff]  }
 0x6a8   :  { %5800 = vmatprep.subr.bf16.mxu0 %v6427_v29 }
 0x6a9   :  { %5823 = vmatmul.mubr.msk.f32.gmra.mrb[56].mxu1 %vm529_vm7, %v6901_v50 }
 0x6aa   :  { %5829 = vmatprep.mubr.msk.f32.mxu1 %vm6633_vm2, %v6632_v9 }
 0x6ab   :  { %5801 = vmatpush3.bf16.msra.mxu0 %v6427_v29 }
 0x6ac   :  { %5802 = vmatprep.subr.bf16.mxu0 %v6428_v30 }
 0x6ad   :  { %5830 = vmatmul.mubr.msk.f32.vlgmr.msra.gmra.mrb[58].mxu1 %vm529_vm7, %v6910_v53 }
 0x6ae   :  { %5832 = vmatprep.mubr.msk.f32.mxu1 %vm6633_vm2, %v6632_v9  ;;  %5839 = vmatpush3.bf16.msra.mxu1 %v6431_v32 }
 0x6af   :  { %5803 = vmatpush3.bf16.msra.mxu0 %v6428_v30  ;;  %5840 = vmatprep.subr.bf16.mxu1 %v6433_v5 }
 0x6b0   :  { %5804 = vmatprep.subr.bf16.mxu0 %v6429_v10 }
 0x6b1   :  { %5833 = vmatmul.mubr.msk.f32.gmra.mrb[60].mxu1 %vm529_vm7, %v6917_v55 }
 0x6b2   :  { %5835 = vmatprep.mubr.msk.f32.mxu1 %vm6633_vm2, %v6632_v9  ;;  %5841 = vmatpush3.bf16.msra.mxu1 %v6433_v5 }
 0x6b3   :  { %5805 = vmatpush3.bf16.msra.mxu0 %v6429_v10  ;;  %5842 = vmatprep.subr.bf16.mxu1 %v6435_v36 }
 0x6b4   :  { %5806 = vmatprep.subr.bf16.mxu0 %v6430_v31 }
 0x6b5   :  { %5836 = vmatmul.mubr.msk.f32.gmra.mrb[62].mxu1 %vm529_vm7, %v6924_v56 }
 0x6b6   :  { %5843 = vmatpush3.bf16.msra.mxu1 %v6435_v36  ;;  %v6448_v36 = vld [vmem:[%s7493_s18 + $0x8] sm:$0xff]  }
 0x6b7   :  { %5807 = vmatpush3.bf16.msra.mxu0 %v6430_v31  ;;  %5844 = vmatprep.subr.bf16.mxu1 %v6437_v37  ;;  %v6442_v31 = vld [vmem:[%s7492_s15 + $0x28] sm:$0xff]  }
 0x6b8   :  { %5858 = vmatprep.subr.bf16.mxu0 %v6432_v4 }
 0x6ba   :  { %5845 = vmatpush3.bf16.msra.mxu1 %v6437_v37  ;;  %v6444_v37 = vld [vmem:[%s7492_s15 + $0x30] sm:$0xff]  }
 0x6bb   :  { %5846 = vmatprep.subr.bf16.mxu1 %v6439_v38 }
 0x6be   :  { %5847 = vmatpush3.bf16.msra.mxu1 %v6439_v38  ;;  %v6449_v38 = vld [vmem:[%s7493_s18 + $0x10] sm:$0xff]  }
 0x6bf   :  { %5848 = vmatprep.subr.bf16.mxu1 %v6441_v39 }
 0x6c2   :  { %5849 = vmatpush3.bf16.msra.mxu1 %v6441_v39  ;;  %v6446_v39 = vld [vmem:[%s7492_s15 + $0x38] sm:$0xff]  }
 0x6c3   :  { %5850 = vmatprep.subr.bf16.mxu1 %v6443_v40 }
 0x6c6   :  { %5851 = vmatpush3.bf16.msra.mxu1 %v6443_v40  ;;  %v6450_v40 = vld [vmem:[%s7493_s18 + $0x18] sm:$0xff]  }
 0x6c7   :  { %5852 = vmatprep.subr.bf16.mxu1 %v6445_v61 }
 0x6ca   :  { %5853 = vmatpush3.bf16.msra.mxu1 %v6445_v61 }
 0x6cb   :  { %5878 = vmatprep.subr.bf16.mxu1 %v6447_v41 }
 0x76c   :  { %v5770_v6 = vpop.f32.mrb[36].mxu0  ;;  %v5790_v42 = vpop.f32.mrb[48].mxu1 }
 0x76d   :  { %v2042_v44 = vadd.f32 %v5790_v42, %v5770_v6  ;;  %v1937_v45 = vpop.f32.mrb[37].mxu0  ;;  %v2033_v47 = vpop.f32.mrb[49].mxu1  ;;  %v6452_v6 = vld [vmem:[%s7493_s18 + $0x28] sm:$0xff]   ;;  %v6453_v42 = vld [vmem:[%s7493_s18 + $0x30] sm:$0xff]  }
 0x76e   :  { %v2034_v48 = vadd.f32 %v2033_v47, %v1937_v45  ;;  %v5771_v51 = vpop.f32.mrb[38].mxu0  ;;  %v5791_v52 = vpop.f32.mrb[50].mxu1  ;;  %v6456_v45 = vld [vmem:[%s7495_s22 + $0x8] sm:$0xff]   ;;  %v6457_v47 = vld [vmem:[%s7495_s22 + $0x10] sm:$0xff]  }
 0x76f   :  { %v2056_v54 = vadd.f32 %v5006_v43, %v2042_v44  ;;  %v1940_v57 = vpop.f32.mrb[39].mxu0  ;;  %v2036_v58 = vpop.f32.mrb[51].mxu1  ;;  %v6455_v44 = vld [vmem:[%s7495_s22] sm:$0xff]  }
 0x770   :  { %v2054_v59 = vadd.f32 %v5006_v43, %v2034_v48  ;;  %v2037_v60 = vadd.f32 %v2036_v58, %v1940_v57  ;;  %v6458_v48 = vld [vmem:[%s7495_s22 + $0x18] sm:$0xff]   ;;  %v6459_v51 = vld [vmem:[%s7495_s22 + $0x20] sm:$0xff]  }
 0x771   :  { %v2059_v63 = vmax.f32 %v2056_v54, 0.0  ;;  %v5007_v52 = vld [vmem:[%s7496_s26] ss:$0 sm:$0xff] }
 0x772   :  { %v2055_v62 = vadd.f32 %v5006_v43, %v2037_v60  ;;  %v2057_v0 = vmax.f32 %v2054_v59, 0.0  ;;  %v6454_v43 = vld [vmem:[%s7493_s18 + $0x38] sm:$0xff]  }
 0x773   :  { %v2061_v11 = vpack.c.bf16 %v2059_v63, %v2059_v63 }
 0x774   :  { %v2058_v1 = vmax.f32 %v2055_v62, 0.0  ;;  %v2261_v2 = vpop.f32.mrb[52].mxu1 }
 0x775   :  { %v5818_v7 = vpop.f32.mrb[53].mxu1 }
 0x776   :  { %v2060_v8 = vpack.c.bf16 %v2058_v1, %v2057_v0 }
 0x778   :  { %5808 = vmatprep.mubr.bf16.mxu0 %v2060_v8  ;;  %v2266_v14 = vpop.f32.mrb[54].mxu1 }
 0x779   :  { %5809 = vmatmul.mubr.bf16.vlgmr.msra.gmra.mrb[40].mxu0 %v2061_v11  ;;  %v2355_v18 = vpack.c.bf16 %v2266_v14, %v2261_v2  ;;  %v5821_v19 = vpop.f32.mrb[55].mxu1 }
 0x77a   :  { %5859 = vmatpush3.bf16.msra.mxu0 %v6432_v4 }
 0x77b   :  { %5860 = vmatprep.subr.bf16.mxu0 %v6434_v12  ;;  %5874 = vmatprep.mubr.bf16.mxu0 %v2355_v18 }
 0x77c   :  { %v2271_v22 = vpop.f32.mrb[56].mxu1 }
 0x77d   :  { %v5824_v23 = vpop.f32.mrb[57].mxu1  ;;  %v2356_v61 = vpack.c.bf16 %v2271_v22, %v2271_v22 }
 0x77e   :  { %5861 = vmatpush3.bf16.msra.mxu0 %v6434_v12 }
 0x77f   :  { %5862 = vmatprep.subr.bf16.mxu0 %v6436_v21 }
 0x780   :  { %v2341_v25 = vpop.f32.mrb[58].mxu1 }
 0x781   :  { %v5831_v26 = vpop.f32.mrb[59].mxu1 }
 0x782   :  { %5863 = vmatpush3.bf16.msra.mxu0 %v6436_v21  ;;  %v6462_v26 = vld [vmem:[%s7495_s22 + $0x38] sm:$0xff]  }
 0x783   :  { %5864 = vmatprep.subr.bf16.mxu0 %v6438_v24 }
 0x784   :  { %v2346_v29 = vpop.f32.mrb[60].mxu1 }
 0x785   :  { %v2373_v30 = vpack.c.bf16 %v2346_v29, %v2341_v25  ;;  %v5834_v10 = vpop.f32.mrb[61].mxu1  ;;  %v6461_v25 = vld [vmem:[%s7495_s22 + $0x30] sm:$0xff]   ;;  %v5048_v29 = vld [vmem:[%s7497_s10] ss:$0 sm:$0xff] }
 0x786   :  { %5865 = vmatpush3.bf16.msra.mxu0 %v6438_v24  ;;  %v6460_v24 = vld [vmem:[%s7495_s22 + $0x28] sm:$0xff]  }
 0x787   :  { %5866 = vmatprep.subr.bf16.mxu0 %v6440_v27  ;;  %5854 = vmatprep.mubr.bf16.mxu1 %v2373_v30 }
 0x788   :  { %v2351_v32 = vpop.f32.mrb[62].mxu1 }
 0x789   :  { %v2374_v4 = vpack.c.bf16 %v2351_v32, %v2351_v32  ;;  %v5837_v5 = vpop.f32.mrb[63].mxu1 }
 0x78a   :  { %5867 = vmatpush3.bf16.msra.mxu0 %v6440_v27 }
 0x78b   :  { %5868 = vmatprep.subr.bf16.mxu0 %v6442_v31  ;;  %5855 = vmatmul.mubr.bf16.vlgmr.msra.gmra.mrb[64].mxu1 %v2374_v4 }
 0x78c   :  { %5879 = vmatpush3.bf16.msra.mxu1 %v6447_v41  ;;  %v6451_v41 = vld [vmem:[%s7493_s18 + $0x20] sm:$0xff]  }
 0x78d   :  { %5880 = vmatprep.subr.bf16.mxu1 %v6448_v36 }
 0x78e   :  { %5869 = vmatpush3.bf16.msra.mxu0 %v6442_v31 }
 0x78f   :  { %5870 = vmatprep.subr.bf16.mxu0 %v6444_v37 }
 0x790   :  { %5881 = vmatpush3.bf16.msra.mxu1 %v6448_v36 }
 0x791   :  { %5882 = vmatprep.subr.bf16.mxu1 %v6449_v38 }
 0x792   :  { %5871 = vmatpush3.bf16.msra.mxu0 %v6444_v37 }
 0x793   :  { %5872 = vmatprep.subr.bf16.mxu0 %v6446_v39 }
 0x794   :  { %5883 = vmatpush3.bf16.msra.mxu1 %v6449_v38 }
 0x795   :  { %5884 = vmatprep.subr.bf16.mxu1 %v6450_v40 }
 0x796   :  { %5873 = vmatpush3.bf16.msra.mxu0 %v6446_v39 }
 0x797   :  { %5898 = vmatprep.subr.bf16.mxu0 %v6455_v44 }
 0x798   :  { %5885 = vmatpush3.bf16.msra.mxu1 %v6450_v40 }
 0x799   :  { %5875 = vmatmul.mubr.bf16.vlgmr.msra.gmra.mrb[44].mxu0 %v2356_v61  ;;  %5886 = vmatprep.subr.bf16.mxu1 %v6451_v41 }
 0x79a   :  { %5899 = vmatpush3.bf16.msra.mxu0 %v6455_v44 }
 0x79b   :  { %5900 = vmatprep.subr.bf16.mxu0 %v6456_v45 }
 0x79c   :  { %5887 = vmatpush3.bf16.msra.mxu1 %v6451_v41 }
 0x79d   :  { %5888 = vmatprep.subr.bf16.mxu1 %v6452_v6 }
 0x79e   :  { %5901 = vmatpush3.bf16.msra.mxu0 %v6456_v45 }
 0x79f   :  { %5902 = vmatprep.subr.bf16.mxu0 %v6457_v47 }
 0x7a0   :  { %5889 = vmatpush3.bf16.msra.mxu1 %v6452_v6 }
 0x7a1   :  { %5890 = vmatprep.subr.bf16.mxu1 %v6453_v42 }
 0x7a2   :  { %5903 = vmatpush3.bf16.msra.mxu0 %v6457_v47 }
 0x7a3   :  { %5904 = vmatprep.subr.bf16.mxu0 %v6458_v48 }
 0x7a4   :  { %5891 = vmatpush3.bf16.msra.mxu1 %v6453_v42  ;;  %v5049_v42 = vld [vmem:[%s7498_s28] ss:$0 sm:$0xff] }
 0x7a5   :  { %5892 = vmatprep.subr.bf16.mxu1 %v6454_v43 }
 0x7a6   :  { %5905 = vmatpush3.bf16.msra.mxu0 %v6458_v48 }
 0x7a7   :  { %5906 = vmatprep.subr.bf16.mxu0 %v6459_v51 }
 0x7a8   :  { %5893 = vmatpush3.bf16.msra.mxu1 %v6454_v43 }
 0x7aa   :  { %5907 = vmatpush3.bf16.msra.mxu0 %v6459_v51 }
 0x7ab   :  { %5908 = vmatprep.subr.bf16.mxu0 %v6460_v24 }
 0x7ae   :  { %5909 = vmatpush3.bf16.msra.mxu0 %v6460_v24 }
 0x7af   :  { %5910 = vmatprep.subr.bf16.mxu0 %v6461_v25 }
 0x7b2   :  { %5911 = vmatpush3.bf16.msra.mxu0 %v6461_v25 }
 0x7b3   :  { %5912 = vmatprep.subr.bf16.mxu0 %v6462_v26 }
 0x7b6   :  { %5913 = vmatpush3.bf16.msra.mxu0 %v6462_v26 }
 0x84c   :  { %v5810_v54 = vpop.f32.mrb[40].mxu0 }
 0x84d   :  { %v2176_v57 = vadd.f32 %v5810_v54, %v5007_v52  ;;  %v2167_v58 = vpop.f32.mrb[41].mxu0 }
 0x84e   :  { %v2168_v59 = vadd.f32 %v5007_v52, %v2167_v58  ;;  %v5811_v60 = vpop.f32.mrb[42].mxu0 }
 0x84f   :  { %v7188_v62 = vmax.f32 %v7023_v15, %v2176_v57  ;;  %v2170_v63 = vpop.f32.mrb[43].mxu0 }
 0x850   :  { %v7191_v0 = vmax.f32 %v7025_v17, %v2168_v59  ;;  %v2171_v1 = vadd.f32 %v5007_v52, %v2170_v63 }
 0x851   :  { %v2584_v8 = vpack.c.bf16 %v7188_v62, %v7188_v62 }
 0x852   :  { %v7194_v2 = vmax.f32 %v7027_v20, %v2171_v1 }
 0x854   :  { %v2583_v7 = vpack.c.bf16 %v7194_v2, %v7191_v0 }
 0x856   :  { %5894 = vmatprep.mubr.bf16.mxu1 %v2583_v7 }
 0x857   :  { %5895 = vmatmul.mubr.bf16.vlgmr.msra.gmra.mrb[68].mxu1 %v2584_v8 }
 0x85e   :  { %v5856_v15 = vpop.f32.mrb[64].mxu1 }
 0x85f   :  { %v2473_v11 = vpop.f32.mrb[65].mxu1 }
 0x860   :  { %v5857_v12 = vpop.f32.mrb[66].mxu1 }
 0x861   :  { %v2476_v17 = vpop.f32.mrb[67].mxu1 }
 0x86c   :  { %v5876_v14 = vpop.f32.mrb[44].mxu0 }
 0x86d   :  { %v2578_v18 = vadd.f32 %v5876_v14, %v5856_v15  ;;  %v2569_v20 = vpop.f32.mrb[45].mxu0 }
 0x86e   :  { %v2570_v19 = vadd.f32 %v2569_v20, %v2473_v11  ;;  %v5877_v21 = vpop.f32.mrb[46].mxu0 }
 0x86f   :  { %v2572_v22 = vpop.f32.mrb[47].mxu0 }
 0x870   :  { %v2573_v23 = vadd.f32 %v2572_v22, %v2476_v17 }
 0x92a   :  { %v5896_v27 = vpop.f32.mrb[68].mxu1 }
 0x92b   :  { %v2699_v30 = vadd.f32 %v5896_v27, %v2578_v18  ;;  %v2683_v10 = vpop.f32.mrb[69].mxu1 }
 0x92c   :  { %v2697_v31 = vadd.f32 %v2683_v10, %v2570_v19  ;;  %v5897_v32 = vpop.f32.mrb[70].mxu1 }
 0x92d   :  { %v2709_v4 = vadd.f32 %v5048_v29, %v2699_v30  ;;  %v2686_v5 = vpop.f32.mrb[71].mxu1 }
 0x92e   :  { %v2707_v36 = vadd.f32 %v5048_v29, %v2697_v31  ;;  %v2698_v37 = vadd.f32 %v2686_v5, %v2573_v23 }
 0x92f   :  { %v2712_v39 = vmax.f32 %v2709_v4, 0.0 }
 0x930   :  { %v2708_v38 = vadd.f32 %v5048_v29, %v2698_v37  ;;  %v2710_v40 = vmax.f32 %v2707_v36, 0.0 }
 0x931   :  { %v2714_v6 = vpack.c.bf16 %v2712_v39, %v2712_v39 }
 0x932   :  { %v2711_v61 = vmax.f32 %v2708_v38, 0.0 }
 0x934   :  { %v2713_v41 = vpack.c.bf16 %v2711_v61, %v2710_v40 }
 0x936   :  { %5914 = vmatprep.mubr.bf16.mxu0 %v2713_v41 }
 0x937   :  { %5915 = vmatmul.mubr.bf16.vlgmr.msra.gmra.mrb[48].mxu0 %v2714_v6 }
 0xa0a   :  { %v5916_v43 = vpop.f32.mrb[48].mxu0 }
 0xa0b   :  { %v2829_v44 = vadd.f32 %v5916_v43, %v5049_v42  ;;  %v2820_v45 = vpop.f32.mrb[49].mxu0 }
 0xa0c   :  { %v2821_v47 = vadd.f32 %v5049_v42, %v2820_v45  ;;  %v5917_v48 = vpop.f32.mrb[50].mxu0 }
 0xa0d   :  { %2836 = vst [vmem:[#allocation4 + $0x10] sm:$0xff] %v2829_v44  ;;  %v2823_v51 = vpop.f32.mrb[51].mxu0 }
 0xa0e   :  { %2834 = vst [vmem:[#allocation4] sm:$0xff] %v2821_v47  ;;  %v2824_v52 = vadd.f32 %v5049_v42, %v2823_v51 }
 0xa10   :  { %2835 = vst [vmem:[#allocation4 + $0x8] sm:$0xff] %v2824_v52 }
 0xa11 LB: > { %s2845_s0 = sld [smem:[#allocation7 + %s6591_s2]]  ;;  %s2848_s5 = scalar_lea.vmem [#allocation4], %s6591_s2  ;;  %s6591_s2 = sphi %s6589_s2, %s2844_s2  }
 0xa12   : > { %s2844_s2 = sadd.s32 1, %s6591_s2  }
 0xa13   : > { %p2841_p6 = scmp.ge.s32.totalorder %s2844_s2, 24  }
 0xa14   :  { %s7499_s13 = sld [smem:[#allocation21_spill]] (%p2841_p6)  ;;  %s7500_s17 = sld [smem:[#allocation20_spill]] (%p2841_p6)  ;;  %6268 = vmatprep.subr.bf16.mxu1 (%p2841_p6), %v6635_v34  ;;  %6272 = vmatprep.subr.bf16.mxu0 (%p2841_p6), %v6635_v34 }
 0xa15   :  { %2843 = sbr.rel (!%p2841_p6) target bundleno = 2577 (0xa11), region = 211  ;;  %5922 = vmatprep.mubr.msk.f32.mxu1 (%p2841_p6), %vm6633_vm2, %v6632_v9  ;;  %5935 = vmatprep.mubr.msk.f32.mxu0 (%p2841_p6), %vm6633_vm2, %v6632_v9  ;;  %s7501_s21 = sld [smem:[#allocation22_spill]] (%p2841_p6) }
 0xa16   :  { %s7502_s29 = sld [smem:[#allocation15_spill]] (%p2841_p6)  ;;  %s7503_s3 = sld [smem:[#allocation14_spill]] (%p2841_p6) }
 0xa17   : > { %v2849_v54 = vld [vmem:[%s2848_s5] sm:$0x1]  ;;  %s2846_s9 = scalar_lea.vmem [#allocation5], %s2845_s0  ;;  %s7504_s8 = sld [smem:[#allocation16_spill]] (%p2841_p6) }
 0xa18   : > { %v2847_v57 = vld [vmem:[%s2846_s9] sm:$0x1]  ;;  %s7505_s14 = sld [smem:[#allocation23_spill]] (%p2841_p6)  ;;  %s7506_s19 = sld [smem:[#allocation17_spill]] (%p2841_p6) }
 0xa19   : > { %v2850_v58 = vmax.f32 %v2847_v57, %v2849_v54  ;;  %s7507_s24 = sld [smem:[#allocation24_spill]] (%p2841_p6)  ;;  %s7508_s6 = sld [smem:[#allocation18_spill]] (%p2841_p6) }
 0xa1a   :  { %v6463_v7 = vld [vmem:[%s7499_s13] sm:$0xff] (%p2841_p6)   ;;  %v6468_v17 = vld [vmem:[%s7500_s17 + $0x10] sm:$0xff] (%p2841_p6)   ;;  %v6469_v14 = vld [vmem:[%s7499_s13 + $0x18] sm:$0xff] (%p2841_p6)   ;;  %s7509_s12 = sld [smem:[#allocation19_spill]] (%p2841_p6)  ;;  %s6593_s20 = smov (%p2841_p6), 0  }
 0xa1b   : > { %2851 = vst [vmem:[%s2846_s9] sm:$0x1] %v2850_v58  ;;  %v6464_v11 = vld [vmem:[%s7500_s17] sm:$0xff] (%p2841_p6)   ;;  %v6470_v18 = vld [vmem:[%s7500_s17 + $0x18] sm:$0xff] (%p2841_p6)   ;;  %v6473_v21 = vld [vmem:[%s7499_s13 + $0x28] sm:$0xff] (%p2841_p6)  }
 0xa1c   :  { %v6471_v20 = vld [vmem:[%s7499_s13 + $0x20] sm:$0xff]   ;;  %v6474_v22 = vld [vmem:[%s7500_s17 + $0x28] sm:$0xff]   ;;  %v6475_v23 = vld [vmem:[%s7499_s13 + $0x30] sm:$0xff]  }
 0xa1d   :  { %v6472_v19 = vld [vmem:[%s7500_s17 + $0x20] sm:$0xff]   ;;  %v6476_v24 = vld [vmem:[%s7500_s17 + $0x30] sm:$0xff]   ;;  %v6477_v25 = vld [vmem:[%s7499_s13 + $0x38] sm:$0xff]  }
 0xa1e   :  { %v6478_v26 = vld [vmem:[%s7500_s17 + $0x38] sm:$0xff]   ;;  %v6479_v27 = vld [vmem:[%s7501_s21] sm:$0xff]   ;;  %v6480_v45 = vld [vmem:[%s7501_s21 + $0x8] sm:$0xff]  }
 0xa1f   :  { %v6481_v47 = vld [vmem:[%s7501_s21 + $0x10] sm:$0xff]   ;;  %v6482_v48 = vld [vmem:[%s7501_s21 + $0x18] sm:$0xff]   ;;  %v6483_v51 = vld [vmem:[%s7501_s21 + $0x20] sm:$0xff]  }
 0xa20   :  { %v6484_v52 = vld [vmem:[%s7501_s21 + $0x28] sm:$0xff]   ;;  %v6485_v54 = vld [vmem:[%s7501_s21 + $0x30] sm:$0xff]   ;;  %v6486_v57 = vld [vmem:[%s7501_s21 + $0x38] sm:$0xff]  }
 0xa21   :  { %v6487_v58 = vld [vmem:[%s7502_s29] sm:$0xff]  }
 0xa22   :  { %v2852_v59 = vld [vmem:[#allocation5] sm:$0xff]  ;;  %v2853_v60 = vld [vmem:[#allocation5 + $0x8] sm:$0xf] }
 0xa23   :  { %v2854_v63 = vsel %vm1648_vm0, %v2852_v59, 0.0  ;;  %v2855_v1 = vsel %vm1649_vm1, %v2853_v60, 0.0  ;;  %4041 = vst [vmem:[#allocation5] sm:$0xff] %v6636_v16  ;;  %4042 = vst [vmem:[#allocation5 + $0x8] sm:$0xf] %v6636_v16  ;;  %v6465_v16 = vld [vmem:[%s7499_s13 + $0x8] sm:$0xff]  }
 0xa24   :  { %v7219_v8 = vmax.f32 %v7065_v33, %v2854_v63  ;;  %v2857_v15 = vmax.f32 %v7116_v13, %v2855_v1  ;;  %v6466_v33 = vld [vmem:[%s7500_s17 + $0x8] sm:$0xff]   ;;  %v6467_v13 = vld [vmem:[%s7499_s13 + $0x10] sm:$0xff]   ;;  %v6488_v59 = vld [vmem:[%s7503_s3] sm:$0xff]  }
 0xa25   :  { %v6489_v60 = vld [vmem:[%s7502_s29 + $0x8] sm:$0xff]   ;;  %v6491_v63 = vld [vmem:[%s7502_s29 + $0x10] sm:$0xff]   ;;  %v6493_v1 = vld [vmem:[%s7502_s29 + $0x18] sm:$0xff]  }
 0xa26   :  { %2859 = vst [vmem:[#allocation2 + $0x8] sm:$0xf] %v2857_v15  ;;  %v6269_v12 = vpack.c.bf16 %v2857_v15, %v7219_v8  ;;  %v6497_v15 = vld [vmem:[%s7502_s29 + $0x28] sm:$0xff]  }
 0xa28   :  { %6271 = vmatpush3.bf16.msk.msra.mxu1 %vm6846_vm6, %v6269_v12  ;;  %6275 = vmatpush3.bf16.msk.msra.mxu0 %vm6846_vm6, %v6269_v12  ;;  %v6501_v12 = vld [vmem:[%s7502_s29 + $0x38] sm:$0xff]  }
 0xa29   :  { %5944 = vmatprep.subr.bf16.mxu1 %v6463_v7  ;;  %5964 = vmatprep.subr.bf16.mxu0 %v6464_v11 }
 0xa2b   :  { %5923 = vmatmul.mubr.msk.f32.vlgmr.msra.gmra.mrb[72].mxu1 %vm529_vm7, %v6886_v46  ;;  %5936 = vmatmul.mubr.msk.f32.vlgmr.msra.gmra.mrb[52].mxu0 %vm529_vm7, %v6910_v53 }
 0xa2c   :  { %5925 = vmatprep.mubr.msk.f32.mxu1 %vm6633_vm2, %v6632_v9  ;;  %5938 = vmatprep.mubr.msk.f32.mxu0 %vm6633_vm2, %v6632_v9 }
 0xa2d   :  { %5945 = vmatpush3.bf16.msra.mxu1 %v6463_v7  ;;  %5965 = vmatpush3.bf16.msra.mxu0 %v6464_v11  ;;  %v7264_v39 = vld [vmem:[#allocation2 + $0x8] sm:$0xf]  ;;  %v6495_v7 = vld [vmem:[%s7502_s29 + $0x20] sm:$0xff]   ;;  %v6499_v11 = vld [vmem:[%s7502_s29 + $0x30] sm:$0xff]  }
 0xa2e   :  { %5946 = vmatprep.subr.bf16.mxu1 %v6465_v16  ;;  %5966 = vmatprep.subr.bf16.mxu0 %v6466_v33  ;;  %v6277_v41 = vpack.c.bf16 %v7264_v39, %v7219_v8 }
 0xa2f   :  { %5926 = vmatmul.mubr.msk.f32.gmra.mrb[74].mxu1 %vm529_vm7, %v6896_v49  ;;  %5939 = vmatmul.mubr.msk.f32.gmra.mrb[54].mxu0 %vm529_vm7, %v6917_v55 }
 0xa30   :  { %5928 = vmatprep.mubr.msk.f32.mxu1 %vm6633_vm2, %v6632_v9  ;;  %5941 = vmatprep.mubr.msk.f32.mxu0 %vm6633_vm2, %v6632_v9 }
 0xa31   :  { %5947 = vmatpush3.bf16.msra.mxu1 %v6465_v16  ;;  %5967 = vmatpush3.bf16.msra.mxu0 %v6466_v33  ;;  %v6503_v16 = vld [vmem:[%s7504_s8] sm:$0xff]  }
 0xa32   :  { %5948 = vmatprep.subr.bf16.mxu1 %v6467_v13  ;;  %5968 = vmatprep.subr.bf16.mxu0 %v6468_v17 }
 0xa33   :  { %5929 = vmatmul.mubr.msk.f32.gmra.mrb[76].mxu1 %vm529_vm7, %v6901_v50  ;;  %5942 = vmatmul.mubr.msk.f32.gmra.mrb[56].mxu0 %vm529_vm7, %v6924_v56 }
 0xa35   :  { %5949 = vmatpush3.bf16.msra.mxu1 %v6467_v13  ;;  %5969 = vmatpush3.bf16.msra.mxu0 %v6468_v17  ;;  %v5082_v17 = vld [vmem:[%s7505_s14] ss:$0 sm:$0xff] }
 0xa36   :  { %5950 = vmatprep.subr.bf16.mxu1 %v6469_v14  ;;  %5970 = vmatprep.subr.bf16.mxu0 %v6470_v18 }
 0xa39   :  { %5951 = vmatpush3.bf16.msra.mxu1 %v6469_v14  ;;  %5971 = vmatpush3.bf16.msra.mxu0 %v6470_v18 }
 0xa3a   :  { %5952 = vmatprep.subr.bf16.mxu1 %v6471_v20  ;;  %5972 = vmatprep.subr.bf16.mxu0 %v6472_v19 }
 0xa3d   :  { %5953 = vmatpush3.bf16.msra.mxu1 %v6471_v20  ;;  %5973 = vmatpush3.bf16.msra.mxu0 %v6472_v19 }
 0xa3e   :  { %5954 = vmatprep.subr.bf16.mxu1 %v6473_v21  ;;  %5974 = vmatprep.subr.bf16.mxu0 %v6474_v22 }
 0xa41   :  { %5955 = vmatpush3.bf16.msra.mxu1 %v6473_v21  ;;  %5975 = vmatpush3.bf16.msra.mxu0 %v6474_v22 }
 0xa42   :  { %5956 = vmatprep.subr.bf16.mxu1 %v6475_v23  ;;  %5976 = vmatprep.subr.bf16.mxu0 %v6476_v24 }
 0xa45   :  { %5957 = vmatpush3.bf16.msra.mxu1 %v6475_v23  ;;  %5977 = vmatpush3.bf16.msra.mxu0 %v6476_v24 }
 0xa46   :  { %5958 = vmatprep.subr.bf16.mxu1 %v6477_v25  ;;  %5978 = vmatprep.subr.bf16.mxu0 %v6478_v26 }
 0xa49   :  { %5959 = vmatpush3.bf16.msra.mxu1 %v6477_v25  ;;  %5979 = vmatpush3.bf16.msra.mxu0 %v6478_v26 }
 0xa4a   :  { %6276 = vmatprep.subr.bf16.mxu0 %v6635_v34  ;;  %5984 = vmatprep.subr.bf16.mxu1 %v6479_v27 }
 0xafe   :  { %v2929_v29 = vpop.f32.mrb[72].mxu1  ;;  %v3009_v30 = vpop.f32.mrb[52].mxu0 }
 0xaff   :  { %v5924_v10 = vpop.f32.mrb[73].mxu1  ;;  %v5937_v31 = vpop.f32.mrb[53].mxu0 }
 0xb02   :  { %v2934_v32 = vpop.f32.mrb[74].mxu1  ;;  %v3014_v4 = vpop.f32.mrb[54].mxu0 }
 0xb03   :  { %v3041_v5 = vpack.c.bf16 %v2934_v32, %v2929_v29  ;;  %v3023_v36 = vpack.c.bf16 %v3014_v4, %v3009_v30  ;;  %v5927_v37 = vpop.f32.mrb[75].mxu1  ;;  %v5940_v38 = vpop.f32.mrb[55].mxu0 }
 0xb04   :  { %v6490_v37 = vld [vmem:[%s7503_s3 + $0x8] sm:$0xff]  }
 0xb05   :  { %5960 = vmatprep.mubr.bf16.mxu1 %v3041_v5  ;;  %5980 = vmatprep.mubr.bf16.mxu0 %v3023_v36 }
 0xb06   :  { %v2939_v40 = vpop.f32.mrb[76].mxu1  ;;  %v3019_v61 = vpop.f32.mrb[56].mxu0 }
 0xb07   :  { %v3042_v6 = vpack.c.bf16 %v2939_v40, %v2939_v40  ;;  %v3024_v42 = vpack.c.bf16 %v3019_v61, %v3019_v61  ;;  %v5930_v43 = vpop.f32.mrb[77].mxu1  ;;  %v5943_v44 = vpop.f32.mrb[57].mxu0 }
 0xb08   :  { %v6494_v43 = vld [vmem:[%s7503_s3 + $0x18] sm:$0xff]  }
 0xb09   :  { %5961 = vmatmul.mubr.bf16.vlgmr.msra.gmra.mrb[80].mxu1 %v3042_v6  ;;  %5981 = vmatmul.mubr.bf16.vlgmr.msra.gmra.mrb[60].mxu0 %v3024_v42 }
 0xb0a   :  { %6279 = vmatpush3.bf16.msk.msra.mxu0 %vm6846_vm6, %v6277_v41  ;;  %6008 = vmatprep.mubr.msk.f32.mxu0 %vm6633_vm2, %v6632_v9 }
 0xb0b   :  { %6280 = vmatprep.subr.bf16.mxu0 %v6635_v34  ;;  %5985 = vmatpush3.bf16.msra.mxu1 %v6479_v27 }
 0xb0c   :  { %5986 = vmatprep.subr.bf16.mxu1 %v6480_v45 }
 0xb0f   :  { %5987 = vmatpush3.bf16.msra.mxu1 %v6480_v45 }
 0xb10   :  { %5988 = vmatprep.subr.bf16.mxu1 %v6481_v47 }
 0xb11   :  { %6009 = vmatmul.mubr.msk.f32.vlgmr.msra.gmra.mrb[58].mxu0 %vm529_vm7, %v6886_v46 }
 0xb12   :  { %6011 = vmatprep.mubr.msk.f32.mxu0 %vm6633_vm2, %v6632_v9  ;;  %6283 = vmatpush3.bf16.msk.msra.mxu0 %vm6846_vm6, %v6277_v41  ;;  %v6492_v41 = vld [vmem:[%s7503_s3 + $0x10] sm:$0xff]  }
 0xb13   :  { %5989 = vmatpush3.bf16.msra.mxu1 %v6481_v47  ;;  %6030 = vmatprep.subr.bf16.mxu0 %v6487_v58  ;;  %v6496_v47 = vld [vmem:[%s7503_s3 + $0x20] sm:$0xff]  }
 0xb14   :  { %5990 = vmatprep.subr.bf16.mxu1 %v6482_v48 }
 0xb15   :  { %6012 = vmatmul.mubr.msk.f32.gmra.mrb[64].mxu0 %vm529_vm7, %v6896_v49 }
 0xb16   :  { %6014 = vmatprep.mubr.msk.f32.mxu0 %vm6633_vm2, %v6632_v9 }
 0xb17   :  { %5991 = vmatpush3.bf16.msra.mxu1 %v6482_v48 }
 0xb18   :  { %5992 = vmatprep.subr.bf16.mxu1 %v6483_v51 }
 0xb19   :  { %6015 = vmatmul.mubr.msk.f32.gmra.mrb[66].mxu0 %vm529_vm7, %v6901_v50 }
 0xb1a   :  { %6021 = vmatprep.mubr.msk.f32.mxu0 %vm6633_vm2, %v6632_v9 }
 0xb1b   :  { %5993 = vmatpush3.bf16.msra.mxu1 %v6483_v51 }
 0xb1c   :  { %5994 = vmatprep.subr.bf16.mxu1 %v6484_v52 }
 0xb1d   :  { %6022 = vmatmul.mubr.msk.f32.vlgmr.msra.gmra.mrb[68].mxu0 %vm529_vm7, %v6910_v53 }
 0xb1e   :  { %6024 = vmatprep.mubr.msk.f32.mxu0 %vm6633_vm2, %v6632_v9  ;;  %6031 = vmatpush3.bf16.msra.mxu0 %v6487_v58 }
 0xb1f   :  { %5995 = vmatpush3.bf16.msra.mxu1 %v6484_v52  ;;  %6032 = vmatprep.subr.bf16.mxu0 %v6489_v60 }
 0xb20   :  { %5996 = vmatprep.subr.bf16.mxu1 %v6485_v54 }
 0xb21   :  { %6025 = vmatmul.mubr.msk.f32.gmra.mrb[70].mxu0 %vm529_vm7, %v6917_v55 }
 0xb22   :  { %6027 = vmatprep.mubr.msk.f32.mxu0 %vm6633_vm2, %v6632_v9  ;;  %6033 = vmatpush3.bf16.msra.mxu0 %v6489_v60  ;;  %v6504_v60 = vld [vmem:[%s7504_s8 + $0x8] sm:$0xff]  }
 0xb23   :  { %5997 = vmatpush3.bf16.msra.mxu1 %v6485_v54  ;;  %6034 = vmatprep.subr.bf16.mxu0 %v6491_v63  ;;  %v6498_v54 = vld [vmem:[%s7503_s3 + $0x28] sm:$0xff]  }
 0xb24   :  { %5998 = vmatprep.subr.bf16.mxu1 %v6486_v57 }
 0xb25   :  { %6028 = vmatmul.mubr.msk.f32.gmra.mrb[72].mxu0 %vm529_vm7, %v6924_v56 }
 0xb26   :  { %6035 = vmatpush3.bf16.msra.mxu0 %v6491_v63  ;;  %v6500_v63 = vld [vmem:[%s7503_s3 + $0x30] sm:$0xff]  }
 0xb27   :  { %5999 = vmatpush3.bf16.msra.mxu1 %v6486_v57  ;;  %6036 = vmatprep.subr.bf16.mxu0 %v6493_v1 }
 0xb28   :  { %6050 = vmatprep.subr.bf16.mxu1 %v6488_v59 }
 0xb2a   :  { %6037 = vmatpush3.bf16.msra.mxu0 %v6493_v1  ;;  %v6505_v1 = vld [vmem:[%s7504_s8 + $0x10] sm:$0xff]  }
 0xb2b   :  { %6038 = vmatprep.subr.bf16.mxu0 %v6495_v7 }
 0xb2e   :  { %6039 = vmatpush3.bf16.msra.mxu0 %v6495_v7  ;;  %v6502_v7 = vld [vmem:[%s7503_s3 + $0x38] sm:$0xff]  }
 0xb2f   :  { %6040 = vmatprep.subr.bf16.mxu0 %v6497_v15 }
 0xb32   :  { %6041 = vmatpush3.bf16.msra.mxu0 %v6497_v15  ;;  %v6506_v15 = vld [vmem:[%s7504_s8 + $0x18] sm:$0xff]  }
 0xb33   :  { %6042 = vmatprep.subr.bf16.mxu0 %v6499_v11 }
 0xb36   :  { %6043 = vmatpush3.bf16.msra.mxu0 %v6499_v11 }
 0xb37   :  { %6044 = vmatprep.subr.bf16.mxu0 %v6501_v12 }
 0xb3a   :  { %6045 = vmatpush3.bf16.msra.mxu0 %v6501_v12  ;;  %v6507_v12 = vld [vmem:[%s7504_s8 + $0x20] sm:$0xff]  }
 0xb3b   :  { %6070 = vmatprep.subr.bf16.mxu0 %v6503_v16 }
 0xbdc   :  { %v5962_v33 = vpop.f32.mrb[80].mxu1  ;;  %v5982_v13 = vpop.f32.mrb[60].mxu0 }
 0xbdd   :  { %v3246_v14 = vadd.f32 %v5982_v13, %v5962_v33  ;;  %v3141_v18 = vpop.f32.mrb[81].mxu1  ;;  %v3237_v20 = vpop.f32.mrb[61].mxu0  ;;  %v6509_v33 = vld [vmem:[%s7504_s8 + $0x30] sm:$0xff]   ;;  %v6510_v13 = vld [vmem:[%s7504_s8 + $0x38] sm:$0xff]  }
 0xbde   :  { %v3238_v19 = vadd.f32 %v3237_v20, %v3141_v18  ;;  %v5963_v21 = vpop.f32.mrb[82].mxu1  ;;  %v5983_v22 = vpop.f32.mrb[62].mxu0  ;;  %v6513_v18 = vld [vmem:[%s7506_s19 + $0x10] sm:$0xff]   ;;  %v6514_v20 = vld [vmem:[%s7506_s19 + $0x18] sm:$0xff]  }
 0xbdf   :  { %v3260_v23 = vadd.f32 %v5082_v17, %v3246_v14  ;;  %v3144_v24 = vpop.f32.mrb[83].mxu1  ;;  %v3240_v25 = vpop.f32.mrb[63].mxu0  ;;  %v6512_v14 = vld [vmem:[%s7506_s19 + $0x8] sm:$0xff]   ;;  %v5083_v21 = vld [vmem:[%s7507_s24] ss:$0 sm:$0xff] }
 0xbe0   :  { %v3258_v26 = vadd.f32 %v5082_v17, %v3238_v19  ;;  %v3241_v27 = vadd.f32 %v3240_v25, %v3144_v24  ;;  %v6515_v19 = vld [vmem:[%s7506_s19 + $0x20] sm:$0xff]  }
 0xbe1   :  { %v3263_v30 = vmax.f32 %v3260_v23, 0.0 }
 0xbe2   :  { %v3259_v29 = vadd.f32 %v5082_v17, %v3241_v27  ;;  %v3261_v10 = vmax.f32 %v3258_v26, 0.0  ;;  %v6511_v17 = vld [vmem:[%s7506_s19] sm:$0xff]  }
 0xbe3   :  { %v3265_v36 = vpack.c.bf16 %v3263_v30, %v3263_v30 }
 0xbe4   :  { %v3262_v31 = vmax.f32 %v3259_v29, 0.0  ;;  %v3465_v32 = vpop.f32.mrb[58].mxu0 }
 0xbe5   :  { %v6010_v4 = vpop.f32.mrb[59].mxu0 }
 0xbe6   :  { %v3264_v5 = vpack.c.bf16 %v3262_v31, %v3261_v10 }
 0xbe8   :  { %6000 = vmatprep.mubr.bf16.mxu1 %v3264_v5  ;;  %v3470_v38 = vpop.f32.mrb[64].mxu0 }
 0xbe9   :  { %6001 = vmatmul.mubr.bf16.vlgmr.msra.gmra.mrb[84].mxu1 %v3265_v36  ;;  %v3559_v40 = vpack.c.bf16 %v3470_v38, %v3465_v32  ;;  %v6013_v61 = vpop.f32.mrb[65].mxu0 }
 0xbea   :  { %6051 = vmatpush3.bf16.msra.mxu1 %v6488_v59 }
 0xbeb   :  { %6052 = vmatprep.subr.bf16.mxu1 %v6490_v37  ;;  %6066 = vmatprep.mubr.bf16.mxu1 %v3559_v40 }
 0xbec   :  { %v3475_v6 = vpop.f32.mrb[66].mxu0 }
 0xbed   :  { %v6016_v42 = vpop.f32.mrb[67].mxu0  ;;  %v3560_v11 = vpack.c.bf16 %v3475_v6, %v3475_v6 }
 0xbee   :  { %6053 = vmatpush3.bf16.msra.mxu1 %v6490_v37  ;;  %v6516_v42 = vld [vmem:[%s7506_s19 + $0x28] sm:$0xff]  }
 0xbef   :  { %6054 = vmatprep.subr.bf16.mxu1 %v6492_v41 }
 0xbf0   :  { %v3545_v44 = vpop.f32.mrb[68].mxu0 }
 0xbf1   :  { %v6023_v45 = vpop.f32.mrb[69].mxu0 }
 0xbf2   :  { %6055 = vmatpush3.bf16.msra.mxu1 %v6492_v41 }
 0xbf3   :  { %6056 = vmatprep.subr.bf16.mxu1 %v6494_v43 }
 0xbf4   :  { %v3550_v48 = vpop.f32.mrb[70].mxu0 }
 0xbf5   :  { %v3577_v51 = vpack.c.bf16 %v3550_v48, %v3545_v44  ;;  %v6026_v52 = vpop.f32.mrb[71].mxu0  ;;  %v6518_v44 = vld [vmem:[%s7506_s19 + $0x38] sm:$0xff]  }
 0xbf6   :  { %6057 = vmatpush3.bf16.msra.mxu1 %v6494_v43  ;;  %v6517_v43 = vld [vmem:[%s7506_s19 + $0x30] sm:$0xff]  }
 0xbf7   :  { %6058 = vmatprep.subr.bf16.mxu1 %v6496_v47  ;;  %6046 = vmatprep.mubr.bf16.mxu0 %v3577_v51 }
 0xbf8   :  { %v3555_v57 = vpop.f32.mrb[72].mxu0 }
 0xbf9   :  { %v3578_v58 = vpack.c.bf16 %v3555_v57, %v3555_v57  ;;  %v6029_v59 = vpop.f32.mrb[73].mxu0 }
 0xbfa   :  { %6059 = vmatpush3.bf16.msra.mxu1 %v6496_v47  ;;  %v5124_v47 = vld [vmem:[%s7508_s6] ss:$0 sm:$0xff] }
 0xbfb   :  { %6060 = vmatprep.subr.bf16.mxu1 %v6498_v54  ;;  %6047 = vmatmul.mubr.bf16.vlgmr.msra.gmra.mrb[76].mxu0 %v3578_v58 }
 0xbfc   :  { %6071 = vmatpush3.bf16.msra.mxu0 %v6503_v16  ;;  %v6508_v16 = vld [vmem:[%s7504_s8 + $0x28] sm:$0xff]  }
 0xbfd   :  { %6072 = vmatprep.subr.bf16.mxu0 %v6504_v60 }
 0xbfe   :  { %6061 = vmatpush3.bf16.msra.mxu1 %v6498_v54 }
 0xbff   :  { %6062 = vmatprep.subr.bf16.mxu1 %v6500_v63 }
 0xc00   :  { %6073 = vmatpush3.bf16.msra.mxu0 %v6504_v60 }
 0xc01   :  { %6074 = vmatprep.subr.bf16.mxu0 %v6505_v1 }
 0xc02   :  { %6063 = vmatpush3.bf16.msra.mxu1 %v6500_v63 }
 0xc03   :  { %6064 = vmatprep.subr.bf16.mxu1 %v6502_v7 }
 0xc04   :  { %6075 = vmatpush3.bf16.msra.mxu0 %v6505_v1 }
 0xc05   :  { %6076 = vmatprep.subr.bf16.mxu0 %v6506_v15 }
 0xc06   :  { %6065 = vmatpush3.bf16.msra.mxu1 %v6502_v7 }
 0xc07   :  { %6090 = vmatprep.subr.bf16.mxu1 %v6511_v17 }
 0xc08   :  { %6077 = vmatpush3.bf16.msra.mxu0 %v6506_v15 }
 0xc09   :  { %6067 = vmatmul.mubr.bf16.vlgmr.msra.gmra.mrb[88].mxu1 %v3560_v11  ;;  %6078 = vmatprep.subr.bf16.mxu0 %v6507_v12 }
 0xc0a   :  { %6091 = vmatpush3.bf16.msra.mxu1 %v6511_v17 }
 0xc0b   :  { %6092 = vmatprep.subr.bf16.mxu1 %v6512_v14 }
 0xc0c   :  { %6079 = vmatpush3.bf16.msra.mxu0 %v6507_v12 }
 0xc0d   :  { %6080 = vmatprep.subr.bf16.mxu0 %v6508_v16 }
 0xc0e   :  { %6093 = vmatpush3.bf16.msra.mxu1 %v6512_v14 }
 0xc0f   :  { %6094 = vmatprep.subr.bf16.mxu1 %v6513_v18 }
 0xc10   :  { %6081 = vmatpush3.bf16.msra.mxu0 %v6508_v16  ;;  %v5125_v16 = vld [vmem:[%s7509_s12] ss:$0 sm:$0xff] }
 0xc11   :  { %6082 = vmatprep.subr.bf16.mxu0 %v6509_v33 }
 0xc12   :  { %6095 = vmatpush3.bf16.msra.mxu1 %v6513_v18 }
 0xc13   :  { %6096 = vmatprep.subr.bf16.mxu1 %v6514_v20 }
 0xc14   :  { %6083 = vmatpush3.bf16.msra.mxu0 %v6509_v33 }
 0xc15   :  { %6084 = vmatprep.subr.bf16.mxu0 %v6510_v13 }
 0xc16   :  { %6097 = vmatpush3.bf16.msra.mxu1 %v6514_v20 }
 0xc17   :  { %6098 = vmatprep.subr.bf16.mxu1 %v6515_v19 }
 0xc18   :  { %6085 = vmatpush3.bf16.msra.mxu0 %v6510_v13 }
 0xc1a   :  { %6099 = vmatpush3.bf16.msra.mxu1 %v6515_v19 }
 0xc1b   :  { %6100 = vmatprep.subr.bf16.mxu1 %v6516_v42 }
 0xc1e   :  { %6101 = vmatpush3.bf16.msra.mxu1 %v6516_v42 }
 0xc1f   :  { %6102 = vmatprep.subr.bf16.mxu1 %v6517_v43 }
 0xc22   :  { %6103 = vmatpush3.bf16.msra.mxu1 %v6517_v43 }
 0xc23   :  { %6104 = vmatprep.subr.bf16.mxu1 %v6518_v44 }
 0xc26   :  { %6105 = vmatpush3.bf16.msra.mxu1 %v6518_v44 }
 0xcbc   :  { %v6002_v22 = vpop.f32.mrb[84].mxu1 }
 0xcbd   :  { %v3380_v23 = vadd.f32 %v6002_v22, %v5083_v21  ;;  %v3371_v24 = vpop.f32.mrb[85].mxu1 }
 0xcbe   :  { %v3372_v25 = vadd.f32 %v5083_v21, %v3371_v24  ;;  %v6003_v26 = vpop.f32.mrb[86].mxu1 }
 0xcbf   :  { %v7336_v27 = vmax.f32 %v7188_v62, %v3380_v23  ;;  %v3374_v29 = vpop.f32.mrb[87].mxu1 }
 0xcc0   :  { %v7339_v30 = vmax.f32 %v7191_v0, %v3372_v25  ;;  %v3375_v10 = vadd.f32 %v5083_v21, %v3374_v29 }
 0xcc1   :  { %v3788_v4 = vpack.c.bf16 %v7336_v27, %v7336_v27 }
 0xcc2   :  { %v7342_v31 = vmax.f32 %v7194_v2, %v3375_v10 }
 0xcc4   :  { %v3787_v32 = vpack.c.bf16 %v7342_v31, %v7339_v30 }
 0xcc6   :  { %6086 = vmatprep.mubr.bf16.mxu0 %v3787_v32 }
 0xcc7   :  { %6087 = vmatmul.mubr.bf16.vlgmr.msra.gmra.mrb[80].mxu0 %v3788_v4 }
 0xcce   :  { %v6048_v62 = vpop.f32.mrb[76].mxu0 }
 0xccf   :  { %v3677_v5 = vpop.f32.mrb[77].mxu0 }
 0xcd0   :  { %v6049_v36 = vpop.f32.mrb[78].mxu0 }
 0xcd1   :  { %v3680_v0 = vpop.f32.mrb[79].mxu0 }
 0xcdc   :  { %v6068_v37 = vpop.f32.mrb[88].mxu1 }
 0xcdd   :  { %v3782_v38 = vadd.f32 %v6068_v37, %v6048_v62  ;;  %v3773_v2 = vpop.f32.mrb[89].mxu1 }
 0xcde   :  { %v3774_v40 = vadd.f32 %v3773_v2, %v3677_v5  ;;  %v6069_v61 = vpop.f32.mrb[90].mxu1 }
 0xcdf   :  { %v3776_v41 = vpop.f32.mrb[91].mxu1 }
 0xce0   :  { %v3777_v6 = vadd.f32 %v3776_v41, %v3680_v0 }
 0xd9a   :  { %v6088_v45 = vpop.f32.mrb[80].mxu0 }
 0xd9b   :  { %v3903_v48 = vadd.f32 %v6088_v45, %v3782_v38  ;;  %v3887_v51 = vpop.f32.mrb[81].mxu0 }
 0xd9c   :  { %v3901_v52 = vadd.f32 %v3887_v51, %v3774_v40  ;;  %v6089_v54 = vpop.f32.mrb[82].mxu0 }
 0xd9d   :  { %v3913_v57 = vadd.f32 %v5124_v47, %v3903_v48  ;;  %v3890_v58 = vpop.f32.mrb[83].mxu0 }
 0xd9e   :  { %v3911_v59 = vadd.f32 %v5124_v47, %v3901_v52  ;;  %v3902_v60 = vadd.f32 %v3890_v58, %v3777_v6 }
 0xd9f   :  { %v3916_v1 = vmax.f32 %v3913_v57, 0.0 }
 0xda0   :  { %v3912_v63 = vadd.f32 %v5124_v47, %v3902_v60  ;;  %v3914_v7 = vmax.f32 %v3911_v59, 0.0 }
 0xda1   :  { %v3918_v12 = vpack.c.bf16 %v3916_v1, %v3916_v1 }
 0xda2   :  { %v3915_v15 = vmax.f32 %v3912_v63, 0.0 }
 0xda4   :  { %v3917_v11 = vpack.c.bf16 %v3915_v15, %v3914_v7 }
 0xda6   :  { %6106 = vmatprep.mubr.bf16.mxu1 %v3917_v11 }
 0xda7   :  { %6107 = vmatmul.mubr.bf16.vlgmr.msra.gmra.mrb[92].mxu1 %v3918_v12 }
 0xe7a   :  { %v6108_v33 = vpop.f32.mrb[92].mxu1 }
 0xe7b   :  { %v4033_v13 = vadd.f32 %v6108_v33, %v5125_v16  ;;  %v4024_v17 = vpop.f32.mrb[93].mxu1 }
 0xe7c   :  { %v4025_v14 = vadd.f32 %v5125_v16, %v4024_v17  ;;  %v6109_v18 = vpop.f32.mrb[94].mxu1 }
 0xe7d   :  { %4040 = vst [vmem:[#allocation4 + $0x10] sm:$0xff] %v4033_v13  ;;  %v4027_v20 = vpop.f32.mrb[95].mxu1 }
 0xe7e   :  { %4038 = vst [vmem:[#allocation4] sm:$0xff] %v4025_v14  ;;  %v4028_v19 = vadd.f32 %v5125_v16, %v4027_v20 }
 0xe80   :  { %4039 = vst [vmem:[#allocation4 + $0x8] sm:$0xff] %v4028_v19 }
 0xe81 LB: > { %s4049_s25 = sld [smem:[#allocation7 + %s6595_s20]]  ;;  %s4052_s7 = scalar_lea.vmem [#allocation4], %s6595_s20  ;;  %s6595_s20 = sphi %s6593_s20, %s4048_s20  }
 0xe82   : > { %s4048_s20 = sadd.s32 1, %s6595_s20  }
 0xe83   : > { %p4045_p7 = scmp.ge.s32.totalorder %s4048_s20, 24  }
 0xe84   :  { %s7510_s30 = sld [smem:[#allocation21_spill]] (%p4045_p7)  ;;  %s7511_s15 = sld [smem:[#allocation20_spill]] (%p4045_p7)  ;;  %6284 = vmatprep.subr.bf16.mxu0 (%p4045_p7), %v6635_v34  ;;  %6288 = vmatprep.subr.bf16.mxu1 (%p4045_p7), %v6635_v34  ;;  %v6543_v15 = vld [vmem:[%s6790_s4] sm:$0xff] (%p4045_p7)   ;;  %v6544_v11 = vld [vmem:[%s6790_s4 + $0x8] sm:$0xff] (%p4045_p7)   ;;  %v6545_v12 = vld [vmem:[%s6790_s4 + $0x10] sm:$0xff] (%p4045_p7)  }
 0xe85   :  { %4047 = sbr.rel (!%p4045_p7) target bundleno = 3713 (0xe81), region = 222  ;;  %6114 = vmatprep.mubr.msk.f32.mxu0 (%p4045_p7), %vm6633_vm2, %v6632_v9  ;;  %6127 = vmatprep.mubr.msk.f32.mxu1 (%p4045_p7), %vm6633_vm2, %v6632_v9  ;;  %s7512_s18 = sld [smem:[#allocation22_spill]] (%p4045_p7)  ;;  %v6546_v16 = vld [vmem:[%s6790_s4 + $0x18] sm:$0xff] (%p4045_p7)  }
 0xe86   :  { %s7513_s27 = sld [smem:[#allocation23_spill]] (%p4045_p7)  ;;  %s7514_s22 = sld [smem:[#allocation24_spill]] (%p4045_p7) }
 0xe87   : > { %v4053_v21 = vld [vmem:[%s4052_s7] sm:$0x1]  ;;  %s4050_s11 = scalar_lea.vmem [#allocation5], %s4049_s25 }
 0xe88   : > { %v4051_v22 = vld [vmem:[%s4050_s11] sm:$0x1] }
 0xe89   : > { %v4054_v23 = vmax.f32 %v4051_v22, %v4053_v21 }
 0xe8a   :  { %v6519_v10 = vld [vmem:[%s7510_s30] sm:$0xff] (%p4045_p7)   ;;  %v6521_v35 = vld [vmem:[%s7510_s30 + $0x8] sm:$0xff] (%p4045_p7)   ;;  %v6523_v28 = vld [vmem:[%s7510_s30 + $0x10] sm:$0xff] (%p4045_p7)  }
 0xe8b   : > { %4055 = vst [vmem:[%s4050_s11] sm:$0x1] %v4054_v23  ;;  %v6520_v4 = vld [vmem:[%s7511_s15] sm:$0xff] (%p4045_p7)   ;;  %v6522_v62 = vld [vmem:[%s7511_s15 + $0x8] sm:$0xff] (%p4045_p7)   ;;  %v6533_v5 = vld [vmem:[%s7510_s30 + $0x38] sm:$0xff] (%p4045_p7)  }
 0xe8c   :  { %v6534_v36 = vld [vmem:[%s7511_s15 + $0x38] sm:$0xff]   ;;  %v6535_v0 = vld [vmem:[%s7512_s18] sm:$0xff]   ;;  %v6536_v57 = vld [vmem:[%s7512_s18 + $0x8] sm:$0xff]  }
 0xe8d   :  { %v6537_v58 = vld [vmem:[%s7512_s18 + $0x10] sm:$0xff]   ;;  %v6538_v59 = vld [vmem:[%s7512_s18 + $0x18] sm:$0xff]   ;;  %v6539_v60 = vld [vmem:[%s7512_s18 + $0x20] sm:$0xff]  }
 0xe8e   :  { %v6540_v63 = vld [vmem:[%s7512_s18 + $0x28] sm:$0xff]   ;;  %v6541_v1 = vld [vmem:[%s7512_s18 + $0x30] sm:$0xff]   ;;  %v6542_v7 = vld [vmem:[%s7512_s18 + $0x38] sm:$0xff]  }
 0xe8f   :  { %v5158_v17 = vld [vmem:[%s7513_s27] ss:$0 sm:$0xff] }
 0xe92   :  { %v4056_v24 = vld [vmem:[#allocation5] sm:$0xff]  ;;  %v4057_v25 = vld [vmem:[#allocation5 + $0x8] sm:$0xf] }
 0xe93   :  { %v4058_v26 = vsel %vm1648_vm0, %v4056_v24, 0.0  ;;  %v4059_v29 = vsel %vm1649_vm1, %v4057_v25, 0.0 }
 0xe94   :  { %v4060_v32 = vmax.f32 %v7219_v8, %v4058_v26  ;;  %v4061_v34 = vmax.f32 %v7264_v39, %v4059_v29  ;;  %v6524_v8 = vld [vmem:[%s7511_s15 + $0x10] sm:$0xff]   ;;  %v6530_v39 = vld [vmem:[%s7511_s15 + $0x28] sm:$0xff]  }
 0xe96   :  { %4063 = vst [vmem:[#allocation2 + $0x8] sm:$0xf] %v4061_v34  ;;  %v6285_v3 = vpack.c.bf16 %v4061_v34, %v4060_v32 }
 0xe98   :  { %6287 = vmatpush3.bf16.msk.msra.mxu0 %vm6846_vm6, %v6285_v3  ;;  %6291 = vmatpush3.bf16.msk.msra.mxu1 %vm6846_vm6, %v6285_v3 }
 0xe99   :  { %6136 = vmatprep.subr.bf16.mxu0 %v6519_v10  ;;  %6156 = vmatprep.subr.bf16.mxu1 %v6520_v4 }
 0xe9b   :  { %6115 = vmatmul.mubr.msk.f32.vlgmr.msra.gmra.mrb[74].mxu0 %vm529_vm7, %v6886_v46  ;;  %6128 = vmatmul.mubr.msk.f32.vlgmr.msra.gmra.mrb[78].mxu1 %vm529_vm7, %v6910_v53  ;;  %v6525_v46 = vld [vmem:[%s7510_s30 + $0x18] sm:$0xff]  }
 0xe9c   :  { %6117 = vmatprep.mubr.msk.f32.mxu0 %vm6633_vm2, %v6632_v9  ;;  %6130 = vmatprep.mubr.msk.f32.mxu1 %vm6633_vm2, %v6632_v9  ;;  %v6526_v53 = vld [vmem:[%s7511_s15 + $0x18] sm:$0xff]  }
 0xe9d   :  { %6137 = vmatpush3.bf16.msra.mxu0 %v6519_v10  ;;  %6157 = vmatpush3.bf16.msra.mxu1 %v6520_v4 }
 0xe9e   :  { %6138 = vmatprep.subr.bf16.mxu0 %v6521_v35  ;;  %6158 = vmatprep.subr.bf16.mxu1 %v6522_v62 }
 0xe9f   :  { %6118 = vmatmul.mubr.msk.f32.gmra.mrb[84].mxu0 %vm529_vm7, %v6896_v49  ;;  %6131 = vmatmul.mubr.msk.f32.gmra.mrb[96].mxu1 %vm529_vm7, %v6917_v55  ;;  %v6527_v49 = vld [vmem:[%s7510_s30 + $0x20] sm:$0xff]  }
 0xea0   :  { %6120 = vmatprep.mubr.msk.f32.mxu0 %vm6633_vm2, %v6632_v9  ;;  %6133 = vmatprep.mubr.msk.f32.mxu1 %vm6633_vm2, %v6632_v9  ;;  %v6528_v55 = vld [vmem:[%s7511_s15 + $0x20] sm:$0xff]   ;;  %v6529_v9 = vld [vmem:[%s7510_s30 + $0x28] sm:$0xff]   ;;  %vm4836_vm2 = vcmask 7168  }
 0xea1   :  { %6139 = vmatpush3.bf16.msra.mxu0 %v6521_v35  ;;  %6159 = vmatpush3.bf16.msra.mxu1 %v6522_v62  ;;  %v6547_v62 = vld [vmem:[%s6790_s4 + $0x20] sm:$0xff]  }
 0xea2   :  { %6140 = vmatprep.subr.bf16.mxu0 %v6523_v28  ;;  %6160 = vmatprep.subr.bf16.mxu1 %v6524_v8 }
 0xea3   :  { %6121 = vmatmul.mubr.msk.f32.gmra.mrb[86].mxu0 %vm529_vm7, %v6901_v50  ;;  %6134 = vmatmul.mubr.msk.f32.gmra.mrb[98].mxu1 %vm529_vm7, %v6924_v56  ;;  %v6531_v50 = vld [vmem:[%s7510_s30 + $0x30] sm:$0xff]  }
 0xea4   :  { %v6532_v56 = vld [vmem:[%s7511_s15 + $0x30] sm:$0xff]  }
 0xea5   :  { %6141 = vmatpush3.bf16.msra.mxu0 %v6523_v28  ;;  %6161 = vmatpush3.bf16.msra.mxu1 %v6524_v8  ;;  %v6548_v28 = vld [vmem:[%s6790_s4 + $0x28] sm:$0xff]   ;;  %v6549_v8 = vld [vmem:[%s6790_s4 + $0x30] sm:$0xff]  }
 0xea6   :  { %6142 = vmatprep.subr.bf16.mxu0 %v6525_v46  ;;  %6162 = vmatprep.subr.bf16.mxu1 %v6526_v53 }
 0xea9   :  { %6143 = vmatpush3.bf16.msra.mxu0 %v6525_v46  ;;  %6163 = vmatpush3.bf16.msra.mxu1 %v6526_v53  ;;  %v6550_v46 = vld [vmem:[%s6790_s4 + $0x38] sm:$0xff]   ;;  %v6551_v53 = vld [vmem:[%s6800_s23] sm:$0xff]  }
 0xeaa   :  { %6144 = vmatprep.subr.bf16.mxu0 %v6527_v49  ;;  %6164 = vmatprep.subr.bf16.mxu1 %v6528_v55 }
 0xead   :  { %6145 = vmatpush3.bf16.msra.mxu0 %v6527_v49  ;;  %6165 = vmatpush3.bf16.msra.mxu1 %v6528_v55  ;;  %v6552_v49 = vld [vmem:[%s6800_s23 + $0x8] sm:$0xff]   ;;  %v6553_v55 = vld [vmem:[%s6800_s23 + $0x10] sm:$0xff]  }
 0xeae   :  { %6146 = vmatprep.subr.bf16.mxu0 %v6529_v9  ;;  %6166 = vmatprep.subr.bf16.mxu1 %v6530_v39 }
 0xeb1   :  { %6147 = vmatpush3.bf16.msra.mxu0 %v6529_v9  ;;  %6167 = vmatpush3.bf16.msra.mxu1 %v6530_v39  ;;  %v6554_v9 = vld [vmem:[%s6800_s23 + $0x18] sm:$0xff]   ;;  %v6555_v39 = vld [vmem:[%s6800_s23 + $0x20] sm:$0xff]  }
 0xeb2   :  { %6148 = vmatprep.subr.bf16.mxu0 %v6531_v50  ;;  %6168 = vmatprep.subr.bf16.mxu1 %v6532_v56 }
 0xeb5   :  { %6149 = vmatpush3.bf16.msra.mxu0 %v6531_v50  ;;  %6169 = vmatpush3.bf16.msra.mxu1 %v6532_v56  ;;  %v6556_v50 = vld [vmem:[%s6800_s23 + $0x28] sm:$0xff]   ;;  %v5159_v56 = vld [vmem:[%s7514_s22] ss:$0 sm:$0xff] }
 0xeb6   :  { %6150 = vmatprep.subr.bf16.mxu0 %v6533_v5  ;;  %6170 = vmatprep.subr.bf16.mxu1 %v6534_v36 }
 0xeb9   :  { %6151 = vmatpush3.bf16.msra.mxu0 %v6533_v5  ;;  %6171 = vmatpush3.bf16.msra.mxu1 %v6534_v36 }
 0xeba   :  { %6176 = vmatprep.subr.bf16.mxu0 %v6535_v0  ;;  %6196 = vmatprep.subr.bf16.mxu1 %v6543_v15 }
 0xf6e   :  { %v4133_v37 = vpop.f32.mrb[74].mxu0  ;;  %v4213_v38 = vpop.f32.mrb[78].mxu1 }
 0xf6f   :  { %v6116_v2 = vpop.f32.mrb[75].mxu0  ;;  %v6129_v40 = vpop.f32.mrb[79].mxu1 }
 0xf72   :  { %v4138_v61 = vpop.f32.mrb[84].mxu0  ;;  %v4218_v41 = vpop.f32.mrb[96].mxu1 }
 0xf73   :  { %v4245_v6 = vpack.c.bf16 %v4138_v61, %v4133_v37  ;;  %v4227_v42 = vpack.c.bf16 %v4218_v41, %v4213_v38  ;;  %v6119_v43 = vpop.f32.mrb[85].mxu0  ;;  %v6132_v44 = vpop.f32.mrb[97].mxu1 }
 0xf74   :  { %v6557_v44 = vld [vmem:[%s6800_s23 + $0x30] sm:$0xff]  }
 0xf75   :  { %6152 = vmatprep.mubr.bf16.mxu0 %v4245_v6  ;;  %6172 = vmatprep.mubr.bf16.mxu1 %v4227_v42 }
 0xf76   :  { %v4143_v45 = vpop.f32.mrb[86].mxu0  ;;  %v4223_v47 = vpop.f32.mrb[98].mxu1 }
 0xf77   :  { %v4246_v48 = vpack.c.bf16 %v4143_v45, %v4143_v45  ;;  %v4228_v51 = vpack.c.bf16 %v4223_v47, %v4223_v47  ;;  %v6122_v52 = vpop.f32.mrb[87].mxu0  ;;  %v6135_v54 = vpop.f32.mrb[99].mxu1  ;;  %v6558_v45 = vld [vmem:[%s6800_s23 + $0x38] sm:$0xff]   ;;  %v5168_v47 = vld [vmem:[%s6795_s16] ss:$0 sm:$0xff] }
 0xf79   :  { %6153 = vmatmul.mubr.bf16.vlgmr.msra.gmra.mrb[88].mxu0 %v4246_v48  ;;  %6173 = vmatmul.mubr.bf16.vlgmr.msra.gmra.mrb[100].mxu1 %v4228_v51 }
 0xf7a   :  { %6177 = vmatpush3.bf16.msra.mxu0 %v6535_v0  ;;  %6197 = vmatpush3.bf16.msra.mxu1 %v6543_v15 }
 0xf7b   :  { %6178 = vmatprep.subr.bf16.mxu0 %v6536_v57  ;;  %6198 = vmatprep.subr.bf16.mxu1 %v6544_v11 }
 0xf7e   :  { %6179 = vmatpush3.bf16.msra.mxu0 %v6536_v57  ;;  %6199 = vmatpush3.bf16.msra.mxu1 %v6544_v11 }
 0xf7f   :  { %6180 = vmatprep.subr.bf16.mxu0 %v6537_v58  ;;  %6200 = vmatprep.subr.bf16.mxu1 %v6545_v12 }
 0xf82   :  { %6181 = vmatpush3.bf16.msra.mxu0 %v6537_v58  ;;  %6201 = vmatpush3.bf16.msra.mxu1 %v6545_v12 }
 0xf83   :  { %6182 = vmatprep.subr.bf16.mxu0 %v6538_v59  ;;  %6202 = vmatprep.subr.bf16.mxu1 %v6546_v16 }
 0xf86   :  { %6183 = vmatpush3.bf16.msra.mxu0 %v6538_v59  ;;  %6203 = vmatpush3.bf16.msra.mxu1 %v6546_v16 }
 0xf87   :  { %6184 = vmatprep.subr.bf16.mxu0 %v6539_v60  ;;  %6204 = vmatprep.subr.bf16.mxu1 %v6547_v62 }
 0xf8a   :  { %6185 = vmatpush3.bf16.msra.mxu0 %v6539_v60  ;;  %6205 = vmatpush3.bf16.msra.mxu1 %v6547_v62 }
 0xf8b   :  { %6186 = vmatprep.subr.bf16.mxu0 %v6540_v63  ;;  %6206 = vmatprep.subr.bf16.mxu1 %v6548_v28 }
 0xf8e   :  { %6187 = vmatpush3.bf16.msra.mxu0 %v6540_v63  ;;  %6207 = vmatpush3.bf16.msra.mxu1 %v6548_v28 }
 0xf8f   :  { %6188 = vmatprep.subr.bf16.mxu0 %v6541_v1  ;;  %6208 = vmatprep.subr.bf16.mxu1 %v6549_v8 }
 0xf92   :  { %6189 = vmatpush3.bf16.msra.mxu0 %v6541_v1  ;;  %6209 = vmatpush3.bf16.msra.mxu1 %v6549_v8 }
 0xf93   :  { %6190 = vmatprep.subr.bf16.mxu0 %v6542_v7  ;;  %6210 = vmatprep.subr.bf16.mxu1 %v6550_v46 }
 0xf96   :  { %6191 = vmatpush3.bf16.msra.mxu0 %v6542_v7  ;;  %6211 = vmatpush3.bf16.msra.mxu1 %v6550_v46 }
 0xf97   :  { %6216 = vmatprep.subr.bf16.mxu0 %v6551_v53 }
0x104c   :  { %v6154_v33 = vpop.f32.mrb[88].mxu0  ;;  %v6174_v13 = vpop.f32.mrb[100].mxu1 }
0x104d   :  { %v4450_v14 = vadd.f32 %v6174_v13, %v6154_v33  ;;  %v4345_v18 = vpop.f32.mrb[89].mxu0  ;;  %v4441_v20 = vpop.f32.mrb[101].mxu1 }
0x104e   :  { %v4442_v19 = vadd.f32 %v4441_v20, %v4345_v18  ;;  %v6155_v21 = vpop.f32.mrb[90].mxu0  ;;  %v6175_v22 = vpop.f32.mrb[102].mxu1 }
0x104f   :  { %v4464_v23 = vadd.f32 %v5158_v17, %v4450_v14  ;;  %v4348_v24 = vpop.f32.mrb[91].mxu0  ;;  %v4444_v25 = vpop.f32.mrb[103].mxu1 }
0x1050   :  { %v4462_v26 = vadd.f32 %v5158_v17, %v4442_v19  ;;  %v4445_v29 = vadd.f32 %v4444_v25, %v4348_v24 }
0x1051   :  { %v4467_v32 = vmax.f32 %v4464_v23, 0.0 }
0x1052   :  { %v4463_v10 = vadd.f32 %v5158_v17, %v4445_v29  ;;  %v4465_v34 = vmax.f32 %v4462_v26, 0.0 }
0x1053   :  { %v4469_v35 = vpack.c.bf16 %v4467_v32, %v4467_v32 }
0x1054   :  { %v4466_v4 = vmax.f32 %v4463_v10, 0.0 }
0x1056   :  { %v4468_v3 = vpack.c.bf16 %v4466_v4, %v4465_v34 }
0x1058   :  { %6192 = vmatprep.mubr.bf16.mxu0 %v4468_v3 }
0x1059   :  { %6193 = vmatmul.mubr.bf16.vlgmr.msra.gmra.mrb[92].mxu0 %v4469_v35 }
0x105a   :  { %6217 = vmatpush3.bf16.msra.mxu0 %v6551_v53 }
0x105b   :  { %6218 = vmatprep.subr.bf16.mxu0 %v6552_v49 }
0x105e   :  { %6219 = vmatpush3.bf16.msra.mxu0 %v6552_v49 }
0x105f   :  { %6220 = vmatprep.subr.bf16.mxu0 %v6553_v55 }
0x1062   :  { %6221 = vmatpush3.bf16.msra.mxu0 %v6553_v55 }
0x1063   :  { %6222 = vmatprep.subr.bf16.mxu0 %v6554_v9 }
0x1066   :  { %6223 = vmatpush3.bf16.msra.mxu0 %v6554_v9 }
0x1067   :  { %6224 = vmatprep.subr.bf16.mxu0 %v6555_v39 }
0x106a   :  { %6225 = vmatpush3.bf16.msra.mxu0 %v6555_v39 }
0x106b   :  { %6226 = vmatprep.subr.bf16.mxu0 %v6556_v50 }
0x106e   :  { %6227 = vmatpush3.bf16.msra.mxu0 %v6556_v50 }
0x106f   :  { %6228 = vmatprep.subr.bf16.mxu0 %v6557_v44 }
0x1072   :  { %6229 = vmatpush3.bf16.msra.mxu0 %v6557_v44 }
0x1073   :  { %6230 = vmatprep.subr.bf16.mxu0 %v6558_v45 }
0x1076   :  { %6231 = vmatpush3.bf16.msra.mxu0 %v6558_v45 }
0x112c   :  { %v6194_v5 = vpop.f32.mrb[92].mxu0 }
0x112d   :  { %v4584_v36 = vadd.f32 %v6194_v5, %v5159_v56  ;;  %v4575_v0 = vpop.f32.mrb[93].mxu0 }
0x112e   :  { %v4576_v37 = vadd.f32 %v5159_v56, %v4575_v0  ;;  %v6195_v38 = vpop.f32.mrb[94].mxu0 }
0x112f   :  { %v4591_v2 = vmax.f32 %v7336_v27, %v4584_v36  ;;  %v4578_v40 = vpop.f32.mrb[95].mxu0 }
0x1130   :  { %v4589_v61 = vmax.f32 %v7339_v30, %v4576_v37  ;;  %v4579_v41 = vadd.f32 %v5159_v56, %v4578_v40 }
0x1131   :  { %v4599_v43 = vpack.c.bf16 %v4591_v2, %v4591_v2 }
0x1132   :  { %v4590_v6 = vmax.f32 %v7342_v31, %v4579_v41 }
0x1134   :  { %v4598_v42 = vpack.c.bf16 %v4590_v6, %v4589_v61 }
0x1136   :  { %6212 = vmatprep.mubr.bf16.mxu1 %v4598_v42 }
0x1137   :  { %6213 = vmatmul.mubr.bf16.vlgmr.msra.gmra.mrb[104].mxu1 %v4599_v43 }
0x120a   :  { %v6214_v48 = vpop.f32.mrb[104].mxu1 }
0x120b   :  { %v4714_v27 = vadd.f32 %v6214_v48, %v5168_v47  ;;  %v4705_v51 = vpop.f32.mrb[105].mxu1 }
0x120c   :  { %v4706_v30 = vadd.f32 %v5168_v47, %v4705_v51  ;;  %v6215_v52 = vpop.f32.mrb[106].mxu1 }
0x120d   :  { %v4708_v54 = vpop.f32.mrb[107].mxu1  ;;  %v4721_v57 = vmax.f32 %v4714_v27, 0.0 }
0x120e   :  { %v4709_v31 = vadd.f32 %v5168_v47, %v4708_v54  ;;  %v4719_v58 = vmax.f32 %v4706_v30, 0.0 }
0x120f   :  { %v4723_v63 = vpack.c.bf16 %v4721_v57, %v4721_v57 }
0x1210   :  { %v4720_v59 = vmax.f32 %v4709_v31, 0.0 }
0x1212   :  { %v4722_v60 = vpack.c.bf16 %v4720_v59, %v4719_v58 }
0x1214   :  { %6232 = vmatprep.mubr.bf16.mxu0 %v4722_v60 }
0x1215   :  { %6233 = vmatmul.mubr.bf16.vlgmr.msra.gmra.mrb[96].mxu0 %v4723_v63 }
0x12e8   :  { %v6234_v1 = vpop.f32.mrb[96].mxu0 }
0x12e9   :  { %4839 = vst.msk [vmem:[%s6805_s1 + $0x10] sm:$0xff] %vm4836_vm2, %v6234_v1  ;;  %v4822_v7 = vpop.f32.mrb[97].mxu0 }
0x12ea   :  { %4837 = vst.msk [vmem:[%s6805_s1] sm:$0xff] %vm4836_vm2, %v4822_v7  ;;  %v6235_v15 = vpop.f32.mrb[98].mxu0 }
0x12eb   :  { %v4825_v11 = vpop.f32.mrb[99].mxu0 }
0x12ec   :  { %4838 = vst.msk [vmem:[%s6805_s1 + $0x8] sm:$0xff] %vm4836_vm2, %v4825_v11 }

</bundles_post_ra>
